<compile_context>
chip_gen: v7x
topology: tpu7x:2x2x1
jax: 0.10.0
libtpu: 0.0.40
codegen_flags: <defaults>
</compile_context>

<pallas_src>
import functools

import jax
import jax.numpy as jnp
from jax.experimental import pallas as pl
from jax.experimental.pallas import tpu as pltpu

SELU_ALPHA = 1.6732632423543772848170429916717
SELU_SCALE = 1.0507009873554804934193349852946
BN_EPS = 1e-5


# ------------------------------ fused kernel ----------------------------------

def _make_fused_kernel(N, H, W, C, L):
    """Fused ChessNet forward. All channel dims pre-padded to C (multiple of 128)."""
    NHW = N * H * W

    def selu(x):
        # exp(min(x,0)) keeps the unselected branch finite; exp(x)-1 (not expm1)
        # for guaranteed Mosaic lowering -- difference is negligible at f32.
        neg = SELU_ALPHA * (jnp.exp(jnp.minimum(x, 0.0)) - 1.0)
        return SELU_SCALE * jnp.where(x > 0.0, x, neg)

    def bn(y, gamma, beta):
        # One-pass training-mode BatchNorm (biased variance), per channel.
        inv_n = 1.0 / NHW
        mean = jnp.sum(y, axis=0, keepdims=True) * inv_n
        ex2 = jnp.sum(y * y, axis=0, keepdims=True) * inv_n
        var = ex2 - mean * mean
        scale = jax.lax.rsqrt(var + BN_EPS) * gamma
        return (y - mean) * scale + beta

    def kernel(x_ref, w_in_ref, b_in_ref,
               wb1_ref, bb1_ref, g1_ref, be1_ref,
               wb2_ref, bb2_ref, g2_ref, be2_ref,
               w_out_ref, b_out_ref,
               o_ref, act_ref, patch_ref):

        def build_patch():
            # Scatter the 9 shifted windows into the reused bf16 im2col scratch.
            # Every store is full-sublane and starts on a 128-lane boundary.
            for idx in range(9):
                dh, dw = divmod(idx, 3)
                patch_ref[:, idx * C:(idx + 1) * C] = (
                    act_ref[:, dh:dh + H, dw:dw + W, :]
                    .reshape(NHW, C).astype(jnp.bfloat16))

        def conv(w, b):
            # w: (9*C, C) bf16, b: (1, C) f32.  One MXU matmul, f32 accumulate.
            build_patch()
            return jnp.dot(patch_ref[...], w,
                           preferred_element_type=jnp.float32) + b

        # Zero the spatially-padded activation buffer ONCE; the 1-pixel border is
        # never overwritten, so it stays zero for every conv in the network.
        act_ref[...] = jnp.zeros(act_ref.shape, act_ref.dtype)
        act_ref[:, 1:H + 1, 1:W + 1, :] = x_ref[...]

        # input conv + ReLU
        y = conv(w_in_ref[...], b_in_ref[...])
        act_ref[:, 1:H + 1, 1:W + 1, :] = jnp.maximum(y, 0.0).reshape(N, H, W, C)

        # residual blocks: stacked weights indexed dynamically inside fori_loop so
        # per-block live ranges stay bounded (no unrolled accumulator spills) and
        # only one block's temporaries are live at a time.
        def block(l, carry):
            x_in = act_ref[:, 1:H + 1, 1:W + 1, :].reshape(NHW, C)
            y = conv(wb1_ref[l], bb1_ref[l])
            y = selu(bn(y, g1_ref[l], be1_ref[l]))
            act_ref[:, 1:H + 1, 1:W + 1, :] = y.reshape(N, H, W, C)
            y = conv(wb2_ref[l], bb2_ref[l])
            y = selu(bn(y, g2_ref[l], be2_ref[l]) + x_in)
            act_ref[:, 1:H + 1, 1:W + 1, :] = y.reshape(N, H, W, C)
            return carry

        jax.lax.fori_loop(0, L, block, 0)

        # output conv, stored lane-dense as (N*H*W, C); caller slices the 2 planes.
        o_ref[...] = conv(w_out_ref[...], b_out_ref[...])

    return kernel


# --------------------------------- wrapper -------------------------------------

def chess_net_forward(x_nchw, p, *, hidden_layers, cpad):
    """x_nchw: (N, 6, H, W) f32 (PyTorch layout).  Returns (N, 2, H, W) f32."""
    N, cin, H, W = x_nchw.shape
    x = jnp.transpose(x_nchw, (0, 2, 3, 1)).astype(jnp.float32)     # NHWC
    x = jnp.pad(x, ((0, 0), (0, 0), (0, 0), (0, cpad - cin)))       # lane-pad C

    vmem = pl.BlockSpec(memory_space=pltpu.MemorySpace.VMEM)
    out = pl.pallas_call(
        _make_fused_kernel(N, H, W, cpad, hidden_layers),
        out_shape=jax.ShapeDtypeStruct((N * H * W, cpad), jnp.float32),
        in_specs=[vmem] * 13,
        out_specs=vmem,
        scratch_shapes=[
            pltpu.VMEM((N, H + 2, W + 2, cpad), jnp.float32),   # padded activation
            pltpu.VMEM((N * H * W, 9 * cpad), jnp.bfloat16),    # reused im2col patch
        ],
        compiler_params=pltpu.CompilerParams(vmem_limit_bytes=32 * 1024 * 1024),
    )(x, p["w_in"], p["b_in"],
      p["wb1"], p["bb1"], p["g1"], p["be1"],
      p["wb2"], p["bb2"], p["g2"], p["be2"],
      p["w_out"], p["b_out"])

    out = out.reshape(N, H, W, cpad)[..., :2]        # keep the 2 real planes
    return jnp.transpose(out, (0, 3, 1, 2))          # NHWC -> NCHW


# ------------------------------ parameter setup ---------------------------------

def init_raw_params(key, hidden_layers, hidden_size):
    """Logical (unpadded) parameters matching the PyTorch module shapes."""
    def conv_p(k, cin, cout):
        kw, kb = jax.random.split(k)
        w = 0.05 * jax.random.normal(kw, (3, 3, cin, cout), jnp.float32)
        b = 0.05 * jax.random.normal(kb, (cout,), jnp.float32)
        return w, b

    def bn_p(k, c):
        kg, kb = jax.random.split(k)
        g = 1.0 + 0.1 * jax.random.normal(kg, (c,), jnp.float32)
        be = 0.1 * jax.random.normal(kb, (c,), jnp.float32)
        return g, be

    keys = jax.random.split(key, 2 + hidden_layers)
    w_in, b_in = conv_p(keys[0], 6, hidden_size)
    w_out, b_out = conv_p(keys[1], hidden_size, 2)
    blocks = []
    for i in range(hidden_layers):
        k1, k2, k3, k4 = jax.random.split(keys[2 + i], 4)
        w1, b1 = conv_p(k1, hidden_size, hidden_size)
        w2, b2 = conv_p(k2, hidden_size, hidden_size)
        g1, be1 = bn_p(k3, hidden_size)
        g2, be2 = bn_p(k4, hidden_size)
        blocks.append(dict(w1=w1, b1=b1, g1=g1, beta1=be1,
                           w2=w2, b2=b2, g2=g2, beta2=be2))
    return dict(w_in=w_in, b_in=b_in, w_out=w_out, b_out=b_out, blocks=blocks)


def pack_params(raw, cpad):
    """Pad channels to cpad lanes, reshape conv weights to im2col (9*cpad, cpad)
    bf16, and stack per-block params on a leading L axis."""
    def pack_conv(w, b):
        cin, cout = w.shape[2], w.shape[3]
        wp = jnp.zeros((3, 3, cpad, cpad), jnp.float32).at[:, :, :cin, :cout].set(w)
        wp = wp.reshape(9 * cpad, cpad).astype(jnp.bfloat16)
        bp = jnp.zeros((1, cpad), jnp.float32).at[0, :cout].set(b)
        return wp, bp

    def pack_vec(v):
        return jnp.zeros((1, cpad), jnp.float32).at[0, :v.shape[0]].set(v)

    w_in, b_in = pack_conv(raw["w_in"], raw["b_in"])
    w_out, b_out = pack_conv(raw["w_out"], raw["b_out"])

    wb1, bb1, g1, be1 = [], [], [], []
    wb2, bb2, g2, be2 = [], [], [], []
    for blk in raw["blocks"]:
        w1p, b1p = pack_conv(blk["w1"], blk["b1"])
        w2p, b2p = pack_conv(blk["w2"], blk["b2"])
        wb1.append(w1p); bb1.append(b1p)
        wb2.append(w2p); bb2.append(b2p)
        g1.append(pack_vec(blk["g1"])); be1.append(pack_vec(blk["beta1"]))
        g2.append(pack_vec(blk["g2"])); be2.append(pack_vec(blk["beta2"]))

    st = lambda xs: jnp.stack(xs, axis=0)
    return dict(w_in=w_in, b_in=b_in, w_out=w_out, b_out=b_out,
                wb1=st(wb1), bb1=st(bb1), g1=st(g1), be1=st(be1),
                wb2=st(wb2), bb2=st(bb2), g2=st(g2), be2=st(be2))


# ----------------------------------- main ---------------------------------------

if __name__ == "__main__":
    HIDDEN_LAYERS = 2   # small config (PyTorch default is 4)
    HIDDEN_SIZE = 32    # small config (PyTorch default is 200)
    N, CIN, H, W = 2, 6, 8, 8                       # chess board: 6 planes, 8x8
    CPAD = max(128, -(-HIDDEN_SIZE // 128) * 128)   # channels padded to 128 lanes

    key = jax.random.PRNGKey(0)
    k_x, k_p = jax.random.split(key)
    x = jax.random.normal(k_x, (N, CIN, H, W), jnp.float32)
    packed = pack_params(init_raw_params(k_p, HIDDEN_LAYERS, HIDDEN_SIZE), CPAD)

    fwd = jax.jit(functools.partial(chess_net_forward,
                                    hidden_layers=HIDDEN_LAYERS, cpad=CPAD))
    out = jax.block_until_ready(fwd(x, packed))
    assert out.shape == (N, 2, H, W), out.shape
    assert bool(jnp.all(jnp.isfinite(out)))
    print("KERNEL_OK")
</pallas_src>

<mosaic_0001>
module attributes {stable_mosaic.version = 11 : i64} {
  func.func @kernel(%arg0: memref<2x8x8x128xf32, #tpu.memory_space<vmem>>, %arg1: memref<1152x128xbf16, #tpu.memory_space<vmem>>, %arg2: memref<1x128xf32, #tpu.memory_space<vmem>>, %arg3: memref<2x1152x128xbf16, #tpu.memory_space<vmem>>, %arg4: memref<2x1x128xf32, #tpu.memory_space<vmem>>, %arg5: memref<2x1x128xf32, #tpu.memory_space<vmem>>, %arg6: memref<2x1x128xf32, #tpu.memory_space<vmem>>, %arg7: memref<2x1152x128xbf16, #tpu.memory_space<vmem>>, %arg8: memref<2x1x128xf32, #tpu.memory_space<vmem>>, %arg9: memref<2x1x128xf32, #tpu.memory_space<vmem>>, %arg10: memref<2x1x128xf32, #tpu.memory_space<vmem>>, %arg11: memref<1152x128xbf16, #tpu.memory_space<vmem>>, %arg12: memref<1x128xf32, #tpu.memory_space<vmem>>, %arg13: memref<128x128xf32, #tpu.memory_space<vmem>>, %arg14: memref<2x10x10x128xf32, #tpu.memory_space<vmem>>, %arg15: memref<128x1152xbf16, #tpu.memory_space<vmem>>) attributes {dimension_semantics = [], scalar_prefetch = 0 : i64, scratch_operands = 2 : i64, tpu.core_type = #tpu.core_type<tc>} {
    %cst = arith.constant 0.000000e+00 : f32
    %0 = vector.broadcast %cst : f32 to vector<2x10x10x128xf32>
    %c0 = arith.constant 0 : index
    %c0_0 = arith.constant 0 : index
    %c0_1 = arith.constant 0 : index
    %c0_2 = arith.constant 0 : index
    %1 = vector.load %arg14[%c0, %c0_0, %c0_1, %c0_2] : memref<2x10x10x128xf32, #tpu.memory_space<vmem>>, vector<2x10x10x128xf32>
    tpu.vector_store %arg14[%c0, %c0_0, %c0_1, %c0_2], %0 {strides = array<i32>} : memref<2x10x10x128xf32, #tpu.memory_space<vmem>>, vector<2x10x10x128xf32>,
    %c0_3 = arith.constant 0 : index
    %c0_4 = arith.constant 0 : index
    %c0_5 = arith.constant 0 : index
    %c0_6 = arith.constant 0 : index
    %2 = vector.load %arg0[%c0_3, %c0_4, %c0_5, %c0_6] : memref<2x8x8x128xf32, #tpu.memory_space<vmem>>, vector<2x8x8x128xf32>
    %c0_7 = arith.constant 0 : index
    %c1 = arith.constant 1 : index
    %c1_8 = arith.constant 1 : index
    %c0_9 = arith.constant 0 : index
    %3 = vector.load %arg14[%c0_7, %c1, %c1_8, %c0_9] : memref<2x10x10x128xf32, #tpu.memory_space<vmem>>, vector<2x8x8x128xf32>
    tpu.vector_store %arg14[%c0_7, %c1, %c1_8, %c0_9], %2 {strides = array<i32>} : memref<2x10x10x128xf32, #tpu.memory_space<vmem>>, vector<2x8x8x128xf32>,
    %c0_10 = arith.constant 0 : index
    %c0_11 = arith.constant 0 : index
    %4 = vector.load %arg1[%c0_10, %c0_11] : memref<1152x128xbf16, #tpu.memory_space<vmem>>, vector<1152x128xbf16>
    %c0_12 = arith.constant 0 : index
    %c0_13 = arith.constant 0 : index
    %5 = vector.load %arg2[%c0_12, %c0_13] : memref<1x128xf32, #tpu.memory_space<vmem>>, vector<1x128xf32>
    %c0_14 = arith.constant 0 : index
    %c0_15 = arith.constant 0 : index
    %c0_16 = arith.constant 0 : index
    %c0_17 = arith.constant 0 : index
    %6 = vector.load %arg14[%c0_14, %c0_15, %c0_16, %c0_17] : memref<2x10x10x128xf32, #tpu.memory_space<vmem>>, vector<2x8x8x128xf32>
    %7 = vector.shape_cast %6 : vector<2x8x8x128xf32> to vector<128x128xf32>
    %8 = arith.truncf %7 : vector<128x128xf32> to vector<128x128xbf16>
    %c0_18 = arith.constant 0 : index
    %c0_19 = arith.constant 0 : index
    %9 = vector.load %arg15[%c0_18, %c0_19] : memref<128x1152xbf16, #tpu.memory_space<vmem>>, vector<128x128xbf16>
    tpu.vector_store %arg15[%c0_18, %c0_19], %8 {strides = array<i32>} : memref<128x1152xbf16, #tpu.memory_space<vmem>>, vector<128x128xbf16>,
    %c0_20 = arith.constant 0 : index
    %c0_21 = arith.constant 0 : index
    %c1_22 = arith.constant 1 : index
    %c0_23 = arith.constant 0 : index
    %10 = vector.load %arg14[%c0_20, %c0_21, %c1_22, %c0_23] : memref<2x10x10x128xf32, #tpu.memory_space<vmem>>, vector<2x8x8x128xf32>
    %11 = vector.shape_cast %10 : vector<2x8x8x128xf32> to vector<128x128xf32>
    %12 = arith.truncf %11 : vector<128x128xf32> to vector<128x128xbf16>
    %c0_24 = arith.constant 0 : index
    %c128 = arith.constant 128 : index
    %13 = vector.load %arg15[%c0_24, %c128] : memref<128x1152xbf16, #tpu.memory_space<vmem>>, vector<128x128xbf16>
    tpu.vector_store %arg15[%c0_24, %c128], %12 {strides = array<i32>} : memref<128x1152xbf16, #tpu.memory_space<vmem>>, vector<128x128xbf16>,
    %c0_25 = arith.constant 0 : index
    %c0_26 = arith.constant 0 : index
    %c2 = arith.constant 2 : index
    %c0_27 = arith.constant 0 : index
    %14 = vector.load %arg14[%c0_25, %c0_26, %c2, %c0_27] : memref<2x10x10x128xf32, #tpu.memory_space<vmem>>, vector<2x8x8x128xf32>
    %15 = vector.shape_cast %14 : vector<2x8x8x128xf32> to vector<128x128xf32>
    %16 = arith.truncf %15 : vector<128x128xf32> to vector<128x128xbf16>
    %c0_28 = arith.constant 0 : index
    %c256 = arith.constant 256 : index
    %17 = vector.load %arg15[%c0_28, %c256] : memref<128x1152xbf16, #tpu.memory_space<vmem>>, vector<128x128xbf16>
    tpu.vector_store %arg15[%c0_28, %c256], %16 {strides = array<i32>} : memref<128x1152xbf16, #tpu.memory_space<vmem>>, vector<128x128xbf16>,
    %c0_29 = arith.constant 0 : index
    %c1_30 = arith.constant 1 : index
    %c0_31 = arith.constant 0 : index
    %c0_32 = arith.constant 0 : index
    %18 = vector.load %arg14[%c0_29, %c1_30, %c0_31, %c0_32] : memref<2x10x10x128xf32, #tpu.memory_space<vmem>>, vector<2x8x8x128xf32>
    %19 = vector.shape_cast %18 : vector<2x8x8x128xf32> to vector<128x128xf32>
    %20 = arith.truncf %19 : vector<128x128xf32> to vector<128x128xbf16>
    %c0_33 = arith.constant 0 : index
    %c384 = arith.constant 384 : index
    %21 = vector.load %arg15[%c0_33, %c384] : memref<128x1152xbf16, #tpu.memory_space<vmem>>, vector<128x128xbf16>
    tpu.vector_store %arg15[%c0_33, %c384], %20 {strides = array<i32>} : memref<128x1152xbf16, #tpu.memory_space<vmem>>, vector<128x128xbf16>,
    %c0_34 = arith.constant 0 : index
    %c1_35 = arith.constant 1 : index
    %c1_36 = arith.constant 1 : index
    %c0_37 = arith.constant 0 : index
    %22 = vector.load %arg14[%c0_34, %c1_35, %c1_36, %c0_37] : memref<2x10x10x128xf32, #tpu.memory_space<vmem>>, vector<2x8x8x128xf32>
    %23 = vector.shape_cast %22 : vector<2x8x8x128xf32> to vector<128x128xf32>
    %24 = arith.truncf %23 : vector<128x128xf32> to vector<128x128xbf16>
    %c0_38 = arith.constant 0 : index
    %c512 = arith.constant 512 : index
    %25 = vector.load %arg15[%c0_38, %c512] : memref<128x1152xbf16, #tpu.memory_space<vmem>>, vector<128x128xbf16>
    tpu.vector_store %arg15[%c0_38, %c512], %24 {strides = array<i32>} : memref<128x1152xbf16, #tpu.memory_space<vmem>>, vector<128x128xbf16>,
    %c0_39 = arith.constant 0 : index
    %c1_40 = arith.constant 1 : index
    %c2_41 = arith.constant 2 : index
    %c0_42 = arith.constant 0 : index
    %26 = vector.load %arg14[%c0_39, %c1_40, %c2_41, %c0_42] : memref<2x10x10x128xf32, #tpu.memory_space<vmem>>, vector<2x8x8x128xf32>
    %27 = vector.shape_cast %26 : vector<2x8x8x128xf32> to vector<128x128xf32>
    %28 = arith.truncf %27 : vector<128x128xf32> to vector<128x128xbf16>
    %c0_43 = arith.constant 0 : index
    %c640 = arith.constant 640 : index
    %29 = vector.load %arg15[%c0_43, %c640] : memref<128x1152xbf16, #tpu.memory_space<vmem>>, vector<128x128xbf16>
    tpu.vector_store %arg15[%c0_43, %c640], %28 {strides = array<i32>} : memref<128x1152xbf16, #tpu.memory_space<vmem>>, vector<128x128xbf16>,
    %c0_44 = arith.constant 0 : index
    %c2_45 = arith.constant 2 : index
    %c0_46 = arith.constant 0 : index
    %c0_47 = arith.constant 0 : index
    %30 = vector.load %arg14[%c0_44, %c2_45, %c0_46, %c0_47] : memref<2x10x10x128xf32, #tpu.memory_space<vmem>>, vector<2x8x8x128xf32>
    %31 = vector.shape_cast %30 : vector<2x8x8x128xf32> to vector<128x128xf32>
    %32 = arith.truncf %31 : vector<128x128xf32> to vector<128x128xbf16>
    %c0_48 = arith.constant 0 : index
    %c768 = arith.constant 768 : index
    %33 = vector.load %arg15[%c0_48, %c768] : memref<128x1152xbf16, #tpu.memory_space<vmem>>, vector<128x128xbf16>
    tpu.vector_store %arg15[%c0_48, %c768], %32 {strides = array<i32>} : memref<128x1152xbf16, #tpu.memory_space<vmem>>, vector<128x128xbf16>,
    %c0_49 = arith.constant 0 : index
    %c2_50 = arith.constant 2 : index
    %c1_51 = arith.constant 1 : index
    %c0_52 = arith.constant 0 : index
    %34 = vector.load %arg14[%c0_49, %c2_50, %c1_51, %c0_52] : memref<2x10x10x128xf32, #tpu.memory_space<vmem>>, vector<2x8x8x128xf32>
    %35 = vector.shape_cast %34 : vector<2x8x8x128xf32> to vector<128x128xf32>
    %36 = arith.truncf %35 : vector<128x128xf32> to vector<128x128xbf16>
    %c0_53 = arith.constant 0 : index
    %c896 = arith.constant 896 : index
    %37 = vector.load %arg15[%c0_53, %c896] : memref<128x1152xbf16, #tpu.memory_space<vmem>>, vector<128x128xbf16>
    tpu.vector_store %arg15[%c0_53, %c896], %36 {strides = array<i32>} : memref<128x1152xbf16, #tpu.memory_space<vmem>>, vector<128x128xbf16>,
    %c0_54 = arith.constant 0 : index
    %c2_55 = arith.constant 2 : index
    %c2_56 = arith.constant 2 : index
    %c0_57 = arith.constant 0 : index
    %38 = vector.load %arg14[%c0_54, %c2_55, %c2_56, %c0_57] : memref<2x10x10x128xf32, #tpu.memory_space<vmem>>, vector<2x8x8x128xf32>
    %39 = vector.shape_cast %38 : vector<2x8x8x128xf32> to vector<128x128xf32>
    %40 = arith.truncf %39 : vector<128x128xf32> to vector<128x128xbf16>
    %c0_58 = arith.constant 0 : index
    %c1024 = arith.constant 1024 : index
    %41 = vector.load %arg15[%c0_58, %c1024] : memref<128x1152xbf16, #tpu.memory_space<vmem>>, vector<128x128xbf16>
    tpu.vector_store %arg15[%c0_58, %c1024], %40 {strides = array<i32>} : memref<128x1152xbf16, #tpu.memory_space<vmem>>, vector<128x128xbf16>,
    %c0_59 = arith.constant 0 : index
    %c0_60 = arith.constant 0 : index
    %42 = vector.load %arg15[%c0_59, %c0_60] : memref<128x1152xbf16, #tpu.memory_space<vmem>>, vector<128x1152xbf16>
    %cst_61 = arith.constant dense<0.000000e+00> : vector<128x128xf32>
    %43 = tpu.matmul %42, %4, %cst_61 {dimension_numbers = #tpu.dot_dimension_numbers<[1], [0], [0], [1], [0, 0, 1, 1], [], []>} : vector<128x1152xbf16>, vector<1152x128xbf16>, vector<128x128xf32> -> vector<128x128xf32>
    %44 = vector.broadcast %5 : vector<1x128xf32> to vector<128x128xf32>
    %45 = arith.addf %43, %44 : vector<128x128xf32>
    %cst_62 = arith.constant 0.000000e+00 : f32
    %46 = vector.broadcast %cst_62 : f32 to vector<128x128xf32>
    %47 = arith.maximumf %45, %46 : vector<128x128xf32>
    %48 = vector.shape_cast %47 : vector<128x128xf32> to vector<2x8x8x128xf32>
    %c0_63 = arith.constant 0 : index
    %c1_64 = arith.constant 1 : index
    %c1_65 = arith.constant 1 : index
    %c0_66 = arith.constant 0 : index
    %49 = vector.load %arg14[%c0_63, %c1_64, %c1_65, %c0_66] : memref<2x10x10x128xf32, #tpu.memory_space<vmem>>, vector<2x8x8x128xf32>
    tpu.vector_store %arg14[%c0_63, %c1_64, %c1_65, %c0_66], %48 {strides = array<i32>} : memref<2x10x10x128xf32, #tpu.memory_space<vmem>>, vector<2x8x8x128xf32>,
    %c0_i32 = arith.constant 0 : i32
    %c2_i32 = arith.constant 2 : i32
    %50 = arith.addi %c0_i32, %c2_i32 : i32
    %c1_i32 = arith.constant 1 : i32
    scf.for %arg16 = %c0_i32 to %50 step %c1_i32  : i32 {
      %c0_131 = arith.constant 0 : index
      %c1_132 = arith.constant 1 : index
      %c1_133 = arith.constant 1 : index
      %c0_134 = arith.constant 0 : index
      %94 = vector.load %arg14[%c0_131, %c1_132, %c1_133, %c0_134] : memref<2x10x10x128xf32, #tpu.memory_space<vmem>>, vector<2x8x8x128xf32>
      %95 = vector.shape_cast %94 : vector<2x8x8x128xf32> to vector<128x128xf32>
      %96 = arith.index_cast %arg16 : i32 to index
      %c0_135 = arith.constant 0 : index
      %c0_136 = arith.constant 0 : index
      %97 = vector.load %arg3[%96, %c0_135, %c0_136] : memref<2x1152x128xbf16, #tpu.memory_space<vmem>>, vector<1x1152x128xbf16>
      %98 = vector.shape_cast %97 : vector<1x1152x128xbf16> to vector<1152x128xbf16>
      %99 = arith.index_cast %arg16 : i32 to index
      %c0_137 = arith.constant 0 : index
      %c0_138 = arith.constant 0 : index
      %100 = vector.load %arg4[%99, %c0_137, %c0_138] : memref<2x1x128xf32, #tpu.memory_space<vmem>>, vector<1x1x128xf32>
      %101 = vector.shape_cast %100 : vector<1x1x128xf32> to vector<1x128xf32>
      %c0_139 = arith.constant 0 : index
      %c0_140 = arith.constant 0 : index
      %c0_141 = arith.constant 0 : index
      %c0_142 = arith.constant 0 : index
      %102 = vector.load %arg14[%c0_139, %c0_140, %c0_141, %c0_142] : memref<2x10x10x128xf32, #tpu.memory_space<vmem>>, vector<2x8x8x128xf32>
      %103 = vector.shape_cast %102 : vector<2x8x8x128xf32> to vector<128x128xf32>
      %104 = arith.truncf %103 : vector<128x128xf32> to vector<128x128xbf16>
      %c0_143 = arith.constant 0 : index
      %c0_144 = arith.constant 0 : index
      %105 = vector.load %arg15[%c0_143, %c0_144] : memref<128x1152xbf16, #tpu.memory_space<vmem>>, vector<128x128xbf16>
      tpu.vector_store %arg15[%c0_143, %c0_144], %104 {strides = array<i32>} : memref<128x1152xbf16, #tpu.memory_space<vmem>>, vector<128x128xbf16>,
      %c0_145 = arith.constant 0 : index
      %c0_146 = arith.constant 0 : index
      %c1_147 = arith.constant 1 : index
      %c0_148 = arith.constant 0 : index
      %106 = vector.load %arg14[%c0_145, %c0_146, %c1_147, %c0_148] : memref<2x10x10x128xf32, #tpu.memory_space<vmem>>, vector<2x8x8x128xf32>
      %107 = vector.shape_cast %106 : vector<2x8x8x128xf32> to vector<128x128xf32>
      %108 = arith.truncf %107 : vector<128x128xf32> to vector<128x128xbf16>
      %c0_149 = arith.constant 0 : index
      %c128_150 = arith.constant 128 : index
      %109 = vector.load %arg15[%c0_149, %c128_150] : memref<128x1152xbf16, #tpu.memory_space<vmem>>, vector<128x128xbf16>
      tpu.vector_store %arg15[%c0_149, %c128_150], %108 {strides = array<i32>} : memref<128x1152xbf16, #tpu.memory_space<vmem>>, vector<128x128xbf16>,
      %c0_151 = arith.constant 0 : index
      %c0_152 = arith.constant 0 : index
      %c2_153 = arith.constant 2 : index
      %c0_154 = arith.constant 0 : index
      %110 = vector.load %arg14[%c0_151, %c0_152, %c2_153, %c0_154] : memref<2x10x10x128xf32, #tpu.memory_space<vmem>>, vector<2x8x8x128xf32>
      %111 = vector.shape_cast %110 : vector<2x8x8x128xf32> to vector<128x128xf32>
      %112 = arith.truncf %111 : vector<128x128xf32> to vector<128x128xbf16>
      %c0_155 = arith.constant 0 : index
      %c256_156 = arith.constant 256 : index
      %113 = vector.load %arg15[%c0_155, %c256_156] : memref<128x1152xbf16, #tpu.memory_space<vmem>>, vector<128x128xbf16>
      tpu.vector_store %arg15[%c0_155, %c256_156], %112 {strides = array<i32>} : memref<128x1152xbf16, #tpu.memory_space<vmem>>, vector<128x128xbf16>,
      %c0_157 = arith.constant 0 : index
      %c1_158 = arith.constant 1 : index
      %c0_159 = arith.constant 0 : index
      %c0_160 = arith.constant 0 : index
      %114 = vector.load %arg14[%c0_157, %c1_158, %c0_159, %c0_160] : memref<2x10x10x128xf32, #tpu.memory_space<vmem>>, vector<2x8x8x128xf32>
      %115 = vector.shape_cast %114 : vector<2x8x8x128xf32> to vector<128x128xf32>
      %116 = arith.truncf %115 : vector<128x128xf32> to vector<128x128xbf16>
      %c0_161 = arith.constant 0 : index
      %c384_162 = arith.constant 384 : index
      %117 = vector.load %arg15[%c0_161, %c384_162] : memref<128x1152xbf16, #tpu.memory_space<vmem>>, vector<128x128xbf16>
      tpu.vector_store %arg15[%c0_161, %c384_162], %116 {strides = array<i32>} : memref<128x1152xbf16, #tpu.memory_space<vmem>>, vector<128x128xbf16>,
      %c0_163 = arith.constant 0 : index
      %c1_164 = arith.constant 1 : index
      %c1_165 = arith.constant 1 : index
      %c0_166 = arith.constant 0 : index
      %118 = vector.load %arg14[%c0_163, %c1_164, %c1_165, %c0_166] : memref<2x10x10x128xf32, #tpu.memory_space<vmem>>, vector<2x8x8x128xf32>
      %119 = vector.shape_cast %118 : vector<2x8x8x128xf32> to vector<128x128xf32>
      %120 = arith.truncf %119 : vector<128x128xf32> to vector<128x128xbf16>
      %c0_167 = arith.constant 0 : index
      %c512_168 = arith.constant 512 : index
      %121 = vector.load %arg15[%c0_167, %c512_168] : memref<128x1152xbf16, #tpu.memory_space<vmem>>, vector<128x128xbf16>
      tpu.vector_store %arg15[%c0_167, %c512_168], %120 {strides = array<i32>} : memref<128x1152xbf16, #tpu.memory_space<vmem>>, vector<128x128xbf16>,
      %c0_169 = arith.constant 0 : index
      %c1_170 = arith.constant 1 : index
      %c2_171 = arith.constant 2 : index
      %c0_172 = arith.constant 0 : index
      %122 = vector.load %arg14[%c0_169, %c1_170, %c2_171, %c0_172] : memref<2x10x10x128xf32, #tpu.memory_space<vmem>>, vector<2x8x8x128xf32>
      %123 = vector.shape_cast %122 : vector<2x8x8x128xf32> to vector<128x128xf32>
      %124 = arith.truncf %123 : vector<128x128xf32> to vector<128x128xbf16>
      %c0_173 = arith.constant 0 : index
      %c640_174 = arith.constant 640 : index
      %125 = vector.load %arg15[%c0_173, %c640_174] : memref<128x1152xbf16, #tpu.memory_space<vmem>>, vector<128x128xbf16>
      tpu.vector_store %arg15[%c0_173, %c640_174], %124 {strides = array<i32>} : memref<128x1152xbf16, #tpu.memory_space<vmem>>, vector<128x128xbf16>,
      %c0_175 = arith.constant 0 : index
      %c2_176 = arith.constant 2 : index
      %c0_177 = arith.constant 0 : index
      %c0_178 = arith.constant 0 : index
      %126 = vector.load %arg14[%c0_175, %c2_176, %c0_177, %c0_178] : memref<2x10x10x128xf32, #tpu.memory_space<vmem>>, vector<2x8x8x128xf32>
      %127 = vector.shape_cast %126 : vector<2x8x8x128xf32> to vector<128x128xf32>
      %128 = arith.truncf %127 : vector<128x128xf32> to vector<128x128xbf16>
      %c0_179 = arith.constant 0 : index
      %c768_180 = arith.constant 768 : index
      %129 = vector.load %arg15[%c0_179, %c768_180] : memref<128x1152xbf16, #tpu.memory_space<vmem>>, vector<128x128xbf16>
      tpu.vector_store %arg15[%c0_179, %c768_180], %128 {strides = array<i32>} : memref<128x1152xbf16, #tpu.memory_space<vmem>>, vector<128x128xbf16>,
      %c0_181 = arith.constant 0 : index
      %c2_182 = arith.constant 2 : index
      %c1_183 = arith.constant 1 : index
      %c0_184 = arith.constant 0 : index
      %130 = vector.load %arg14[%c0_181, %c2_182, %c1_183, %c0_184] : memref<2x10x10x128xf32, #tpu.memory_space<vmem>>, vector<2x8x8x128xf32>
      %131 = vector.shape_cast %130 : vector<2x8x8x128xf32> to vector<128x128xf32>
      %132 = arith.truncf %131 : vector<128x128xf32> to vector<128x128xbf16>
      %c0_185 = arith.constant 0 : index
      %c896_186 = arith.constant 896 : index
      %133 = vector.load %arg15[%c0_185, %c896_186] : memref<128x1152xbf16, #tpu.memory_space<vmem>>, vector<128x128xbf16>
      tpu.vector_store %arg15[%c0_185, %c896_186], %132 {strides = array<i32>} : memref<128x1152xbf16, #tpu.memory_space<vmem>>, vector<128x128xbf16>,
      %c0_187 = arith.constant 0 : index
      %c2_188 = arith.constant 2 : index
      %c2_189 = arith.constant 2 : index
      %c0_190 = arith.constant 0 : index
      %134 = vector.load %arg14[%c0_187, %c2_188, %c2_189, %c0_190] : memref<2x10x10x128xf32, #tpu.memory_space<vmem>>, vector<2x8x8x128xf32>
      %135 = vector.shape_cast %134 : vector<2x8x8x128xf32> to vector<128x128xf32>
      %136 = arith.truncf %135 : vector<128x128xf32> to vector<128x128xbf16>
      %c0_191 = arith.constant 0 : index
      %c1024_192 = arith.constant 1024 : index
      %137 = vector.load %arg15[%c0_191, %c1024_192] : memref<128x1152xbf16, #tpu.memory_space<vmem>>, vector<128x128xbf16>
      tpu.vector_store %arg15[%c0_191, %c1024_192], %136 {strides = array<i32>} : memref<128x1152xbf16, #tpu.memory_space<vmem>>, vector<128x128xbf16>,
      %c0_193 = arith.constant 0 : index
      %c0_194 = arith.constant 0 : index
      %138 = vector.load %arg15[%c0_193, %c0_194] : memref<128x1152xbf16, #tpu.memory_space<vmem>>, vector<128x1152xbf16>
      %cst_195 = arith.constant dense<0.000000e+00> : vector<128x128xf32>
      %139 = tpu.matmul %138, %98, %cst_195 {dimension_numbers = #tpu.dot_dimension_numbers<[1], [0], [0], [1], [0, 0, 1, 1], [], []>} : vector<128x1152xbf16>, vector<1152x128xbf16>, vector<128x128xf32> -> vector<128x128xf32>
      %140 = vector.broadcast %101 : vector<1x128xf32> to vector<128x128xf32>
      %141 = arith.addf %139, %140 : vector<128x128xf32>
      %142 = arith.index_cast %arg16 : i32 to index
      %c0_196 = arith.constant 0 : index
      %c0_197 = arith.constant 0 : index
      %143 = vector.load %arg5[%142, %c0_196, %c0_197] : memref<2x1x128xf32, #tpu.memory_space<vmem>>, vector<1x1x128xf32>
      %144 = vector.shape_cast %143 : vector<1x1x128xf32> to vector<1x128xf32>
      %145 = arith.index_cast %arg16 : i32 to index
      %c0_198 = arith.constant 0 : index
      %c0_199 = arith.constant 0 : index
      %146 = vector.load %arg6[%145, %c0_198, %c0_199] : memref<2x1x128xf32, #tpu.memory_space<vmem>>, vector<1x1x128xf32>
      %147 = vector.shape_cast %146 : vector<1x1x128xf32> to vector<1x128xf32>
      %cst_200 = arith.constant dense<0.000000e+00> : vector<128xf32>
      %148 = vector.multi_reduction <add>, %141, %cst_200 [0] : vector<128x128xf32> to vector<128xf32>
      %149 = vector.shape_cast %148 : vector<128xf32> to vector<1x128xf32>
      %cst_201 = arith.constant 7.812500e-03 : f32
      %150 = vector.broadcast %cst_201 : f32 to vector<1x128xf32>
      %151 = arith.mulf %149, %150 : vector<1x128xf32>
      %152 = arith.mulf %141, %141 : vector<128x128xf32>
      %cst_202 = arith.constant dense<0.000000e+00> : vector<128xf32>
      %153 = vector.multi_reduction <add>, %152, %cst_202 [0] : vector<128x128xf32> to vector<128xf32>
      %154 = vector.shape_cast %153 : vector<128xf32> to vector<1x128xf32>
      %cst_203 = arith.constant 7.812500e-03 : f32
      %155 = vector.broadcast %cst_203 : f32 to vector<1x128xf32>
      %156 = arith.mulf %154, %155 : vector<1x128xf32>
      %157 = arith.mulf %151, %151 : vector<1x128xf32>
      %158 = arith.subf %156, %157 : vector<1x128xf32>
      %cst_204 = arith.constant 9.99999974E-6 : f32
      %159 = vector.broadcast %cst_204 : f32 to vector<1x128xf32>
      %160 = arith.addf %158, %159 : vector<1x128xf32>
      %161 = math.rsqrt %160 : vector<1x128xf32>
      %162 = arith.mulf %161, %144 : vector<1x128xf32>
      %163 = vector.broadcast %151 : vector<1x128xf32> to vector<128x128xf32>
      %164 = arith.subf %141, %163 : vector<128x128xf32>
      %165 = vector.broadcast %162 : vector<1x128xf32> to vector<128x128xf32>
      %166 = arith.mulf %164, %165 : vector<128x128xf32>
      %167 = vector.broadcast %147 : vector<1x128xf32> to vector<128x128xf32>
      %168 = arith.addf %166, %167 : vector<128x128xf32>
      %cst_205 = arith.constant 0.000000e+00 : f32
      %169 = vector.broadcast %cst_205 : f32 to vector<128x128xf32>
      %170 = arith.minimumf %168, %169 : vector<128x128xf32>
      %171 = math.exp %170 : vector<128x128xf32>
      %cst_206 = arith.constant 1.000000e+00 : f32
      %172 = vector.broadcast %cst_206 : f32 to vector<128x128xf32>
      %173 = arith.subf %171, %172 : vector<128x128xf32>
      %cst_207 = arith.constant 1.67326319 : f32
      %174 = vector.broadcast %cst_207 : f32 to vector<128x128xf32>
      %175 = arith.mulf %174, %173 : vector<128x128xf32>
      %cst_208 = arith.constant 0.000000e+00 : f32
      %176 = vector.broadcast %cst_208 : f32 to vector<128x128xf32>
      %177 = arith.cmpf ogt, %168, %176 : vector<128x128xf32>
      %178 = arith.select %177, %168, %175 : vector<128x128xi1>, vector<128x128xf32>
      %cst_209 = arith.constant 1.05070102 : f32
      %179 = vector.broadcast %cst_209 : f32 to vector<128x128xf32>
      %180 = arith.mulf %179, %178 : vector<128x128xf32>
      %181 = vector.shape_cast %180 : vector<128x128xf32> to vector<2x8x8x128xf32>
      %c0_210 = arith.constant 0 : index
      %c1_211 = arith.constant 1 : index
      %c1_212 = arith.constant 1 : index
      %c0_213 = arith.constant 0 : index
      %182 = vector.load %arg14[%c0_210, %c1_211, %c1_212, %c0_213] : memref<2x10x10x128xf32, #tpu.memory_space<vmem>>, vector<2x8x8x128xf32>
      tpu.vector_store %arg14[%c0_210, %c1_211, %c1_212, %c0_213], %181 {strides = array<i32>} : memref<2x10x10x128xf32, #tpu.memory_space<vmem>>, vector<2x8x8x128xf32>,
      %183 = arith.index_cast %arg16 : i32 to index
      %c0_214 = arith.constant 0 : index
      %c0_215 = arith.constant 0 : index
      %184 = vector.load %arg7[%183, %c0_214, %c0_215] : memref<2x1152x128xbf16, #tpu.memory_space<vmem>>, vector<1x1152x128xbf16>
      %185 = vector.shape_cast %184 : vector<1x1152x128xbf16> to vector<1152x128xbf16>
      %186 = arith.index_cast %arg16 : i32 to index
      %c0_216 = arith.constant 0 : index
      %c0_217 = arith.constant 0 : index
      %187 = vector.load %arg8[%186, %c0_216, %c0_217] : memref<2x1x128xf32, #tpu.memory_space<vmem>>, vector<1x1x128xf32>
      %188 = vector.shape_cast %187 : vector<1x1x128xf32> to vector<1x128xf32>
      %c0_218 = arith.constant 0 : index
      %c0_219 = arith.constant 0 : index
      %c0_220 = arith.constant 0 : index
      %c0_221 = arith.constant 0 : index
      %189 = vector.load %arg14[%c0_218, %c0_219, %c0_220, %c0_221] : memref<2x10x10x128xf32, #tpu.memory_space<vmem>>, vector<2x8x8x128xf32>
      %190 = vector.shape_cast %189 : vector<2x8x8x128xf32> to vector<128x128xf32>
      %191 = arith.truncf %190 : vector<128x128xf32> to vector<128x128xbf16>
      %c0_222 = arith.constant 0 : index
      %c0_223 = arith.constant 0 : index
      %192 = vector.load %arg15[%c0_222, %c0_223] : memref<128x1152xbf16, #tpu.memory_space<vmem>>, vector<128x128xbf16>
      tpu.vector_store %arg15[%c0_222, %c0_223], %191 {strides = array<i32>} : memref<128x1152xbf16, #tpu.memory_space<vmem>>, vector<128x128xbf16>,
      %c0_224 = arith.constant 0 : index
      %c0_225 = arith.constant 0 : index
      %c1_226 = arith.constant 1 : index
      %c0_227 = arith.constant 0 : index
      %193 = vector.load %arg14[%c0_224, %c0_225, %c1_226, %c0_227] : memref<2x10x10x128xf32, #tpu.memory_space<vmem>>, vector<2x8x8x128xf32>
      %194 = vector.shape_cast %193 : vector<2x8x8x128xf32> to vector<128x128xf32>
      %195 = arith.truncf %194 : vector<128x128xf32> to vector<128x128xbf16>
      %c0_228 = arith.constant 0 : index
      %c128_229 = arith.constant 128 : index
      %196 = vector.load %arg15[%c0_228, %c128_229] : memref<128x1152xbf16, #tpu.memory_space<vmem>>, vector<128x128xbf16>
      tpu.vector_store %arg15[%c0_228, %c128_229], %195 {strides = array<i32>} : memref<128x1152xbf16, #tpu.memory_space<vmem>>, vector<128x128xbf16>,
      %c0_230 = arith.constant 0 : index
      %c0_231 = arith.constant 0 : index
      %c2_232 = arith.constant 2 : index
      %c0_233 = arith.constant 0 : index
      %197 = vector.load %arg14[%c0_230, %c0_231, %c2_232, %c0_233] : memref<2x10x10x128xf32, #tpu.memory_space<vmem>>, vector<2x8x8x128xf32>
      %198 = vector.shape_cast %197 : vector<2x8x8x128xf32> to vector<128x128xf32>
      %199 = arith.truncf %198 : vector<128x128xf32> to vector<128x128xbf16>
      %c0_234 = arith.constant 0 : index
      %c256_235 = arith.constant 256 : index
      %200 = vector.load %arg15[%c0_234, %c256_235] : memref<128x1152xbf16, #tpu.memory_space<vmem>>, vector<128x128xbf16>
      tpu.vector_store %arg15[%c0_234, %c256_235], %199 {strides = array<i32>} : memref<128x1152xbf16, #tpu.memory_space<vmem>>, vector<128x128xbf16>,
      %c0_236 = arith.constant 0 : index
      %c1_237 = arith.constant 1 : index
      %c0_238 = arith.constant 0 : index
      %c0_239 = arith.constant 0 : index
      %201 = vector.load %arg14[%c0_236, %c1_237, %c0_238, %c0_239] : memref<2x10x10x128xf32, #tpu.memory_space<vmem>>, vector<2x8x8x128xf32>
      %202 = vector.shape_cast %201 : vector<2x8x8x128xf32> to vector<128x128xf32>
      %203 = arith.truncf %202 : vector<128x128xf32> to vector<128x128xbf16>
      %c0_240 = arith.constant 0 : index
      %c384_241 = arith.constant 384 : index
      %204 = vector.load %arg15[%c0_240, %c384_241] : memref<128x1152xbf16, #tpu.memory_space<vmem>>, vector<128x128xbf16>
      tpu.vector_store %arg15[%c0_240, %c384_241], %203 {strides = array<i32>} : memref<128x1152xbf16, #tpu.memory_space<vmem>>, vector<128x128xbf16>,
      %c0_242 = arith.constant 0 : index
      %c1_243 = arith.constant 1 : index
      %c1_244 = arith.constant 1 : index
      %c0_245 = arith.constant 0 : index
      %205 = vector.load %arg14[%c0_242, %c1_243, %c1_244, %c0_245] : memref<2x10x10x128xf32, #tpu.memory_space<vmem>>, vector<2x8x8x128xf32>
      %206 = vector.shape_cast %205 : vector<2x8x8x128xf32> to vector<128x128xf32>
      %207 = arith.truncf %206 : vector<128x128xf32> to vector<128x128xbf16>
      %c0_246 = arith.constant 0 : index
      %c512_247 = arith.constant 512 : index
      %208 = vector.load %arg15[%c0_246, %c512_247] : memref<128x1152xbf16, #tpu.memory_space<vmem>>, vector<128x128xbf16>
      tpu.vector_store %arg15[%c0_246, %c512_247], %207 {strides = array<i32>} : memref<128x1152xbf16, #tpu.memory_space<vmem>>, vector<128x128xbf16>,
      %c0_248 = arith.constant 0 : index
      %c1_249 = arith.constant 1 : index
      %c2_250 = arith.constant 2 : index
      %c0_251 = arith.constant 0 : index
      %209 = vector.load %arg14[%c0_248, %c1_249, %c2_250, %c0_251] : memref<2x10x10x128xf32, #tpu.memory_space<vmem>>, vector<2x8x8x128xf32>
      %210 = vector.shape_cast %209 : vector<2x8x8x128xf32> to vector<128x128xf32>
      %211 = arith.truncf %210 : vector<128x128xf32> to vector<128x128xbf16>
      %c0_252 = arith.constant 0 : index
      %c640_253 = arith.constant 640 : index
      %212 = vector.load %arg15[%c0_252, %c640_253] : memref<128x1152xbf16, #tpu.memory_space<vmem>>, vector<128x128xbf16>
      tpu.vector_store %arg15[%c0_252, %c640_253], %211 {strides = array<i32>} : memref<128x1152xbf16, #tpu.memory_space<vmem>>, vector<128x128xbf16>,
      %c0_254 = arith.constant 0 : index
      %c2_255 = arith.constant 2 : index
      %c0_256 = arith.constant 0 : index
      %c0_257 = arith.constant 0 : index
      %213 = vector.load %arg14[%c0_254, %c2_255, %c0_256, %c0_257] : memref<2x10x10x128xf32, #tpu.memory_space<vmem>>, vector<2x8x8x128xf32>
      %214 = vector.shape_cast %213 : vector<2x8x8x128xf32> to vector<128x128xf32>
      %215 = arith.truncf %214 : vector<128x128xf32> to vector<128x128xbf16>
      %c0_258 = arith.constant 0 : index
      %c768_259 = arith.constant 768 : index
      %216 = vector.load %arg15[%c0_258, %c768_259] : memref<128x1152xbf16, #tpu.memory_space<vmem>>, vector<128x128xbf16>
      tpu.vector_store %arg15[%c0_258, %c768_259], %215 {strides = array<i32>} : memref<128x1152xbf16, #tpu.memory_space<vmem>>, vector<128x128xbf16>,
      %c0_260 = arith.constant 0 : index
      %c2_261 = arith.constant 2 : index
      %c1_262 = arith.constant 1 : index
      %c0_263 = arith.constant 0 : index
      %217 = vector.load %arg14[%c0_260, %c2_261, %c1_262, %c0_263] : memref<2x10x10x128xf32, #tpu.memory_space<vmem>>, vector<2x8x8x128xf32>
      %218 = vector.shape_cast %217 : vector<2x8x8x128xf32> to vector<128x128xf32>
      %219 = arith.truncf %218 : vector<128x128xf32> to vector<128x128xbf16>
      %c0_264 = arith.constant 0 : index
      %c896_265 = arith.constant 896 : index
      %220 = vector.load %arg15[%c0_264, %c896_265] : memref<128x1152xbf16, #tpu.memory_space<vmem>>, vector<128x128xbf16>
      tpu.vector_store %arg15[%c0_264, %c896_265], %219 {strides = array<i32>} : memref<128x1152xbf16, #tpu.memory_space<vmem>>, vector<128x128xbf16>,
      %c0_266 = arith.constant 0 : index
      %c2_267 = arith.constant 2 : index
      %c2_268 = arith.constant 2 : index
      %c0_269 = arith.constant 0 : index
      %221 = vector.load %arg14[%c0_266, %c2_267, %c2_268, %c0_269] : memref<2x10x10x128xf32, #tpu.memory_space<vmem>>, vector<2x8x8x128xf32>
      %222 = vector.shape_cast %221 : vector<2x8x8x128xf32> to vector<128x128xf32>
      %223 = arith.truncf %222 : vector<128x128xf32> to vector<128x128xbf16>
      %c0_270 = arith.constant 0 : index
      %c1024_271 = arith.constant 1024 : index
      %224 = vector.load %arg15[%c0_270, %c1024_271] : memref<128x1152xbf16, #tpu.memory_space<vmem>>, vector<128x128xbf16>
      tpu.vector_store %arg15[%c0_270, %c1024_271], %223 {strides = array<i32>} : memref<128x1152xbf16, #tpu.memory_space<vmem>>, vector<128x128xbf16>,
      %c0_272 = arith.constant 0 : index
      %c0_273 = arith.constant 0 : index
      %225 = vector.load %arg15[%c0_272, %c0_273] : memref<128x1152xbf16, #tpu.memory_space<vmem>>, vector<128x1152xbf16>
      %cst_274 = arith.constant dense<0.000000e+00> : vector<128x128xf32>
      %226 = tpu.matmul %225, %185, %cst_274 {dimension_numbers = #tpu.dot_dimension_numbers<[1], [0], [0], [1], [0, 0, 1, 1], [], []>} : vector<128x1152xbf16>, vector<1152x128xbf16>, vector<128x128xf32> -> vector<128x128xf32>
      %227 = vector.broadcast %188 : vector<1x128xf32> to vector<128x128xf32>
      %228 = arith.addf %226, %227 : vector<128x128xf32>
      %229 = arith.index_cast %arg16 : i32 to index
      %c0_275 = arith.constant 0 : index
      %c0_276 = arith.constant 0 : index
      %230 = vector.load %arg9[%229, %c0_275, %c0_276] : memref<2x1x128xf32, #tpu.memory_space<vmem>>, vector<1x1x128xf32>
      %231 = vector.shape_cast %230 : vector<1x1x128xf32> to vector<1x128xf32>
      %232 = arith.index_cast %arg16 : i32 to index
      %c0_277 = arith.constant 0 : index
      %c0_278 = arith.constant 0 : index
      %233 = vector.load %arg10[%232, %c0_277, %c0_278] : memref<2x1x128xf32, #tpu.memory_space<vmem>>, vector<1x1x128xf32>
      %234 = vector.shape_cast %233 : vector<1x1x128xf32> to vector<1x128xf32>
      %cst_279 = arith.constant dense<0.000000e+00> : vector<128xf32>
      %235 = vector.multi_reduction <add>, %228, %cst_279 [0] : vector<128x128xf32> to vector<128xf32>
      %236 = vector.shape_cast %235 : vector<128xf32> to vector<1x128xf32>
      %cst_280 = arith.constant 7.812500e-03 : f32
      %237 = vector.broadcast %cst_280 : f32 to vector<1x128xf32>
      %238 = arith.mulf %236, %237 : vector<1x128xf32>
      %239 = arith.mulf %228, %228 : vector<128x128xf32>
      %cst_281 = arith.constant dense<0.000000e+00> : vector<128xf32>
      %240 = vector.multi_reduction <add>, %239, %cst_281 [0] : vector<128x128xf32> to vector<128xf32>
      %241 = vector.shape_cast %240 : vector<128xf32> to vector<1x128xf32>
      %cst_282 = arith.constant 7.812500e-03 : f32
      %242 = vector.broadcast %cst_282 : f32 to vector<1x128xf32>
      %243 = arith.mulf %241, %242 : vector<1x128xf32>
      %244 = arith.mulf %238, %238 : vector<1x128xf32>
      %245 = arith.subf %243, %244 : vector<1x128xf32>
      %cst_283 = arith.constant 9.99999974E-6 : f32
      %246 = vector.broadcast %cst_283 : f32 to vector<1x128xf32>
      %247 = arith.addf %245, %246 : vector<1x128xf32>
      %248 = math.rsqrt %247 : vector<1x128xf32>
      %249 = arith.mulf %248, %231 : vector<1x128xf32>
      %250 = vector.broadcast %238 : vector<1x128xf32> to vector<128x128xf32>
      %251 = arith.subf %228, %250 : vector<128x128xf32>
      %252 = vector.broadcast %249 : vector<1x128xf32> to vector<128x128xf32>
      %253 = arith.mulf %251, %252 : vector<128x128xf32>
      %254 = vector.broadcast %234 : vector<1x128xf32> to vector<128x128xf32>
      %255 = arith.addf %253, %254 : vector<128x128xf32>
      %256 = arith.addf %255, %95 : vector<128x128xf32>
      %cst_284 = arith.constant 0.000000e+00 : f32
      %257 = vector.broadcast %cst_284 : f32 to vector<128x128xf32>
      %258 = arith.minimumf %256, %257 : vector<128x128xf32>
      %259 = math.exp %258 : vector<128x128xf32>
      %cst_285 = arith.constant 1.000000e+00 : f32
      %260 = vector.broadcast %cst_285 : f32 to vector<128x128xf32>
      %261 = arith.subf %259, %260 : vector<128x128xf32>
      %cst_286 = arith.constant 1.67326319 : f32
      %262 = vector.broadcast %cst_286 : f32 to vector<128x128xf32>
      %263 = arith.mulf %262, %261 : vector<128x128xf32>
      %cst_287 = arith.constant 0.000000e+00 : f32
      %264 = vector.broadcast %cst_287 : f32 to vector<128x128xf32>
      %265 = arith.cmpf ogt, %256, %264 : vector<128x128xf32>
      %266 = arith.select %265, %256, %263 : vector<128x128xi1>, vector<128x128xf32>
      %cst_288 = arith.constant 1.05070102 : f32
      %267 = vector.broadcast %cst_288 : f32 to vector<128x128xf32>
      %268 = arith.mulf %267, %266 : vector<128x128xf32>
      %269 = vector.shape_cast %268 : vector<128x128xf32> to vector<2x8x8x128xf32>
      %c0_289 = arith.constant 0 : index
      %c1_290 = arith.constant 1 : index
      %c1_291 = arith.constant 1 : index
      %c0_292 = arith.constant 0 : index
      %270 = vector.load %arg14[%c0_289, %c1_290, %c1_291, %c0_292] : memref<2x10x10x128xf32, #tpu.memory_space<vmem>>, vector<2x8x8x128xf32>
      tpu.vector_store %arg14[%c0_289, %c1_290, %c1_291, %c0_292], %269 {strides = array<i32>} : memref<2x10x10x128xf32, #tpu.memory_space<vmem>>, vector<2x8x8x128xf32>,
    }
    %c2_i32_67 = arith.constant 2 : i32
    %c0_68 = arith.constant 0 : index
    %c0_69 = arith.constant 0 : index
    %51 = vector.load %arg11[%c0_68, %c0_69] : memref<1152x128xbf16, #tpu.memory_space<vmem>>, vector<1152x128xbf16>
    %c0_70 = arith.constant 0 : index
    %c0_71 = arith.constant 0 : index
    %52 = vector.load %arg12[%c0_70, %c0_71] : memref<1x128xf32, #tpu.memory_space<vmem>>, vector<1x128xf32>
    %c0_72 = arith.constant 0 : index
    %c0_73 = arith.constant 0 : index
    %c0_74 = arith.constant 0 : index
    %c0_75 = arith.constant 0 : index
    %53 = vector.load %arg14[%c0_72, %c0_73, %c0_74, %c0_75] : memref<2x10x10x128xf32, #tpu.memory_space<vmem>>, vector<2x8x8x128xf32>
    %54 = vector.shape_cast %53 : vector<2x8x8x128xf32> to vector<128x128xf32>
    %55 = arith.truncf %54 : vector<128x128xf32> to vector<128x128xbf16>
    %c0_76 = arith.constant 0 : index
    %c0_77 = arith.constant 0 : index
    %56 = vector.load %arg15[%c0_76, %c0_77] : memref<128x1152xbf16, #tpu.memory_space<vmem>>, vector<128x128xbf16>
    tpu.vector_store %arg15[%c0_76, %c0_77], %55 {strides = array<i32>} : memref<128x1152xbf16, #tpu.memory_space<vmem>>, vector<128x128xbf16>,
    %c0_78 = arith.constant 0 : index
    %c0_79 = arith.constant 0 : index
    %c1_80 = arith.constant 1 : index
    %c0_81 = arith.constant 0 : index
    %57 = vector.load %arg14[%c0_78, %c0_79, %c1_80, %c0_81] : memref<2x10x10x128xf32, #tpu.memory_space<vmem>>, vector<2x8x8x128xf32>
    %58 = vector.shape_cast %57 : vector<2x8x8x128xf32> to vector<128x128xf32>
    %59 = arith.truncf %58 : vector<128x128xf32> to vector<128x128xbf16>
    %c0_82 = arith.constant 0 : index
    %c128_83 = arith.constant 128 : index
    %60 = vector.load %arg15[%c0_82, %c128_83] : memref<128x1152xbf16, #tpu.memory_space<vmem>>, vector<128x128xbf16>
    tpu.vector_store %arg15[%c0_82, %c128_83], %59 {strides = array<i32>} : memref<128x1152xbf16, #tpu.memory_space<vmem>>, vector<128x128xbf16>,
    %c0_84 = arith.constant 0 : index
    %c0_85 = arith.constant 0 : index
    %c2_86 = arith.constant 2 : index
    %c0_87 = arith.constant 0 : index
    %61 = vector.load %arg14[%c0_84, %c0_85, %c2_86, %c0_87] : memref<2x10x10x128xf32, #tpu.memory_space<vmem>>, vector<2x8x8x128xf32>
    %62 = vector.shape_cast %61 : vector<2x8x8x128xf32> to vector<128x128xf32>
    %63 = arith.truncf %62 : vector<128x128xf32> to vector<128x128xbf16>
    %c0_88 = arith.constant 0 : index
    %c256_89 = arith.constant 256 : index
    %64 = vector.load %arg15[%c0_88, %c256_89] : memref<128x1152xbf16, #tpu.memory_space<vmem>>, vector<128x128xbf16>
    tpu.vector_store %arg15[%c0_88, %c256_89], %63 {strides = array<i32>} : memref<128x1152xbf16, #tpu.memory_space<vmem>>, vector<128x128xbf16>,
    %c0_90 = arith.constant 0 : index
    %c1_91 = arith.constant 1 : index
    %c0_92 = arith.constant 0 : index
    %c0_93 = arith.constant 0 : index
    %65 = vector.load %arg14[%c0_90, %c1_91, %c0_92, %c0_93] : memref<2x10x10x128xf32, #tpu.memory_space<vmem>>, vector<2x8x8x128xf32>
    %66 = vector.shape_cast %65 : vector<2x8x8x128xf32> to vector<128x128xf32>
    %67 = arith.truncf %66 : vector<128x128xf32> to vector<128x128xbf16>
    %c0_94 = arith.constant 0 : index
    %c384_95 = arith.constant 384 : index
    %68 = vector.load %arg15[%c0_94, %c384_95] : memref<128x1152xbf16, #tpu.memory_space<vmem>>, vector<128x128xbf16>
    tpu.vector_store %arg15[%c0_94, %c384_95], %67 {strides = array<i32>} : memref<128x1152xbf16, #tpu.memory_space<vmem>>, vector<128x128xbf16>,
    %c0_96 = arith.constant 0 : index
    %c1_97 = arith.constant 1 : index
    %c1_98 = arith.constant 1 : index
    %c0_99 = arith.constant 0 : index
    %69 = vector.load %arg14[%c0_96, %c1_97, %c1_98, %c0_99] : memref<2x10x10x128xf32, #tpu.memory_space<vmem>>, vector<2x8x8x128xf32>
    %70 = vector.shape_cast %69 : vector<2x8x8x128xf32> to vector<128x128xf32>
    %71 = arith.truncf %70 : vector<128x128xf32> to vector<128x128xbf16>
    %c0_100 = arith.constant 0 : index
    %c512_101 = arith.constant 512 : index
    %72 = vector.load %arg15[%c0_100, %c512_101] : memref<128x1152xbf16, #tpu.memory_space<vmem>>, vector<128x128xbf16>
    tpu.vector_store %arg15[%c0_100, %c512_101], %71 {strides = array<i32>} : memref<128x1152xbf16, #tpu.memory_space<vmem>>, vector<128x128xbf16>,
    %c0_102 = arith.constant 0 : index
    %c1_103 = arith.constant 1 : index
    %c2_104 = arith.constant 2 : index
    %c0_105 = arith.constant 0 : index
    %73 = vector.load %arg14[%c0_102, %c1_103, %c2_104, %c0_105] : memref<2x10x10x128xf32, #tpu.memory_space<vmem>>, vector<2x8x8x128xf32>
    %74 = vector.shape_cast %73 : vector<2x8x8x128xf32> to vector<128x128xf32>
    %75 = arith.truncf %74 : vector<128x128xf32> to vector<128x128xbf16>
    %c0_106 = arith.constant 0 : index
    %c640_107 = arith.constant 640 : index
    %76 = vector.load %arg15[%c0_106, %c640_107] : memref<128x1152xbf16, #tpu.memory_space<vmem>>, vector<128x128xbf16>
    tpu.vector_store %arg15[%c0_106, %c640_107], %75 {strides = array<i32>} : memref<128x1152xbf16, #tpu.memory_space<vmem>>, vector<128x128xbf16>,
    %c0_108 = arith.constant 0 : index
    %c2_109 = arith.constant 2 : index
    %c0_110 = arith.constant 0 : index
    %c0_111 = arith.constant 0 : index
    %77 = vector.load %arg14[%c0_108, %c2_109, %c0_110, %c0_111] : memref<2x10x10x128xf32, #tpu.memory_space<vmem>>, vector<2x8x8x128xf32>
    %78 = vector.shape_cast %77 : vector<2x8x8x128xf32> to vector<128x128xf32>
    %79 = arith.truncf %78 : vector<128x128xf32> to vector<128x128xbf16>
    %c0_112 = arith.constant 0 : index
    %c768_113 = arith.constant 768 : index
    %80 = vector.load %arg15[%c0_112, %c768_113] : memref<128x1152xbf16, #tpu.memory_space<vmem>>, vector<128x128xbf16>
    tpu.vector_store %arg15[%c0_112, %c768_113], %79 {strides = array<i32>} : memref<128x1152xbf16, #tpu.memory_space<vmem>>, vector<128x128xbf16>,
    %c0_114 = arith.constant 0 : index
    %c2_115 = arith.constant 2 : index
    %c1_116 = arith.constant 1 : index
    %c0_117 = arith.constant 0 : index
    %81 = vector.load %arg14[%c0_114, %c2_115, %c1_116, %c0_117] : memref<2x10x10x128xf32, #tpu.memory_space<vmem>>, vector<2x8x8x128xf32>
    %82 = vector.shape_cast %81 : vector<2x8x8x128xf32> to vector<128x128xf32>
    %83 = arith.truncf %82 : vector<128x128xf32> to vector<128x128xbf16>
    %c0_118 = arith.constant 0 : index
    %c896_119 = arith.constant 896 : index
    %84 = vector.load %arg15[%c0_118, %c896_119] : memref<128x1152xbf16, #tpu.memory_space<vmem>>, vector<128x128xbf16>
    tpu.vector_store %arg15[%c0_118, %c896_119], %83 {strides = array<i32>} : memref<128x1152xbf16, #tpu.memory_space<vmem>>, vector<128x128xbf16>,
    %c0_120 = arith.constant 0 : index
    %c2_121 = arith.constant 2 : index
    %c2_122 = arith.constant 2 : index
    %c0_123 = arith.constant 0 : index
    %85 = vector.load %arg14[%c0_120, %c2_121, %c2_122, %c0_123] : memref<2x10x10x128xf32, #tpu.memory_space<vmem>>, vector<2x8x8x128xf32>
    %86 = vector.shape_cast %85 : vector<2x8x8x128xf32> to vector<128x128xf32>
    %87 = arith.truncf %86 : vector<128x128xf32> to vector<128x128xbf16>
    %c0_124 = arith.constant 0 : index
    %c1024_125 = arith.constant 1024 : index
    %88 = vector.load %arg15[%c0_124, %c1024_125] : memref<128x1152xbf16, #tpu.memory_space<vmem>>, vector<128x128xbf16>
    tpu.vector_store %arg15[%c0_124, %c1024_125], %87 {strides = array<i32>} : memref<128x1152xbf16, #tpu.memory_space<vmem>>, vector<128x128xbf16>,
    %c0_126 = arith.constant 0 : index
    %c0_127 = arith.constant 0 : index
    %89 = vector.load %arg15[%c0_126, %c0_127] : memref<128x1152xbf16, #tpu.memory_space<vmem>>, vector<128x1152xbf16>
    %cst_128 = arith.constant dense<0.000000e+00> : vector<128x128xf32>
    %90 = tpu.matmul %89, %51, %cst_128 {dimension_numbers = #tpu.dot_dimension_numbers<[1], [0], [0], [1], [0, 0, 1, 1], [], []>} : vector<128x1152xbf16>, vector<1152x128xbf16>, vector<128x128xf32> -> vector<128x128xf32>
    %91 = vector.broadcast %52 : vector<1x128xf32> to vector<128x128xf32>
    %92 = arith.addf %90, %91 : vector<128x128xf32>
    %c0_129 = arith.constant 0 : index
    %c0_130 = arith.constant 0 : index
    %93 = vector.load %arg13[%c0_129, %c0_130] : memref<128x128xf32, #tpu.memory_space<vmem>>, vector<128x128xf32>
    tpu.vector_store %arg13[%c0_129, %c0_130], %92 {strides = array<i32>} : memref<128x128xf32, #tpu.memory_space<vmem>>, vector<128x128xf32>,
    return
  }
}

</mosaic_0001>

<bundles_post_ra>
// kernel: chess_net_forward.1
= control target key start
LH: loop header
LB: loop body
LE: loop exit
PB: predicated region body
PF: predicated region fallthrough
CT: control target
= control target key end

     0   :  { %18 = vsyncpa [#allocation5], 0  ;;  %s11180_s0 = inlined_call_operand.vmem [shape: f32[2,8,8,128], index: 0, kind: input, shape index: {}]   ;;  %s11181_s1 = inlined_call_operand.hbm [shape: bf16[1152,128], index: 1, kind: input, shape index: {}]   ;;  %s11182_s2 = inlined_call_operand.vmem [shape: f32[1,128], index: 2, kind: input, shape index: {}]   ;;  %s11183_s3 = inlined_call_operand.hbm [shape: bf16[2,1152,128], index: 3, kind: input, shape index: {}]   ;;  %s11184_s4 = inlined_call_operand.vmem [shape: f32[2,1,128], index: 4, kind: input, shape index: {}]   ;;  %s11185_s5 = inlined_call_operand.vmem [shape: f32[2,1,128], index: 5, kind: input, shape index: {}]   ;;  %s11186_s6 = inlined_call_operand.vmem [shape: f32[2,1,128], index: 6, kind: input, shape index: {}]   ;;  %s11187_s7 = inlined_call_operand.hbm [shape: bf16[2,1152,128], index: 7, kind: input, shape index: {}]   ;;  %s11188_s8 = inlined_call_operand.vmem [shape: f32[2,1,128], index: 8, kind: input, shape index: {}]   ;;  %s11189_s9 = inlined_call_operand.vmem [shape: f32[2,1,128], index: 9, kind: input, shape index: {}]   ;;  %s11190_s10 = inlined_call_operand.vmem [shape: f32[2,1,128], index: 10, kind: input, shape index: {}]   ;;  %s11191_s11 = inlined_call_operand.hbm [shape: bf16[1152,128], index: 11, kind: input, shape index: {}]   ;;  %s11192_s12 = inlined_call_operand.vmem [shape: f32[1,128], index: 12, kind: input, shape index: {}]   ;;  %s11193_s13 = inlined_call_operand.vmem [shape: f32[128,128], index: 13, kind: output, shape index: {}]  }
   0x1   :  { %19 = vsyncpa [#allocation7], 0 }
   0x2   :  { %20 = vsyncpa [#allocation10], 0  ;;  %s8594_s25 = smov [#allocation6]   ;;  %s8595_s27 = smov [#allocation4]  }
   0x3   :  { %s42_s26 = sshll.u32 %s8594_s25, 4  ;;  %s28_s28 = sshll.u32 %s8595_s27, 4  ;;  %s43_s26 = int_to_ptr.vmem [resolvable:$true] %s42_s26  ;;  %s8671_s28 = int_to_ptr.vmem [resolvable:$true] %s28_s28 }
   0x4   :  { %s8492_s14 = scalar_lea.hbm %s11183_s3, 18432 }
   0x5   :  { %p8493_p0 = scmp.ne.s32.totalorder %s11183_s3, %s8492_s14  ;;  %p8496_p1 = scmp.lt.u32.totalorder %s8492_s14, %s11183_s3 }
   0x7   :  { %p8498_p2 = pnand %p8496_p1, %p8493_p0 }
   0x9   :  { %8501 = shalt.err (!%p8498_p2)
}
   0xa   :  { %s8502_s19 = scalar_lea.vmem %s43_s26, 18432  ;;  %p8507_p4 = scmp.lt.s32.totalorder %s43_s26, %s43_s26 }
   0xb   :  { %p8503_p3 = scmp.ne.s32.totalorder %s43_s26, %s8502_s19  ;;  %p8508_p5 = scmp.lt.s32.totalorder %s8502_s19, %s8502_s19 }
   0xd   :  { %p8509_p6 = por %p8508_p5, %p8507_p4 }
   0xf   :  { %p8510_p7 = pnand %p8509_p6, %p8503_p3 }
  0x11   :  { %8513 = shalt.err (!%p8510_p7)
}
  0x12   :  { %s8596_s20 = smov 64   ;;  %s8597_s21 = smov 4  }
  0x13   :  { %48 = dma.hbm_to_vmem [thread:$0]  %s11183_s3, 18432, %s43_s26, [#allocation7], %s8596_s20, %s8596_s20, %s8597_s21  }
  0x14   :  { %s8514_s27 = scalar_lea.hbm %s11181_s1, 9216 }
  0x15   :  { %p8515_p8 = scmp.ne.s32.totalorder %s11181_s1, %s8514_s27  ;;  %p8518_p9 = scmp.lt.u32.totalorder %s8514_s27, %s11181_s1 }
  0x17   :  { %p8520_p10 = pnand %p8518_p9, %p8515_p8 }
  0x19   :  { %8523 = shalt.err (!%p8520_p10)
}
  0x1a   :  { %s8524_s16 = scalar_lea.vmem %s8671_s28, 9216  ;;  %p8529_p12 = scmp.lt.s32.totalorder %s8671_s28, %s8671_s28 }
  0x1b   :  { %p8525_p11 = scmp.ne.s32.totalorder %s8671_s28, %s8524_s16  ;;  %p8530_p13 = scmp.lt.s32.totalorder %s8524_s16, %s8524_s16 }
  0x1d   :  { %p8531_p0 = por %p8530_p13, %p8529_p12 }
  0x1f   :  { %p8532_p1 = pnand %p8531_p0, %p8525_p11 }
  0x21   :  { %8535 = shalt.err (!%p8532_p1)
}
  0x22   :  { %34 = dma.hbm_to_vmem [thread:$0]  %s11181_s1, 9216, %s8671_s28, [#allocation5], %s8596_s20, %s8596_s20, %s8597_s21  }
  0x23   :  { %s8598_s17 = smov [#allocation8]   ;;  %s8599_s19 = smov [#allocation9]  }
  0x24   :  { %s60_s18 = sshll.u32 %s8598_s17, 4  ;;  %s78_s22 = sshll.u32 %s8599_s19, 4  ;;  %s61_s18 = int_to_ptr.vmem [resolvable:$true] %s60_s18  ;;  %s8708_s22 = int_to_ptr.vmem [resolvable:$true] %s78_s22 }
  0x25   :  { %s8536_s25 = scalar_lea.hbm %s11187_s7, 18432 }
  0x26   :  { %p8537_p2 = scmp.ne.s32.totalorder %s11187_s7, %s8536_s25  ;;  %p8540_p3 = scmp.lt.u32.totalorder %s8536_s25, %s11187_s7 }
  0x28   :  { %p8542_p4 = pnand %p8540_p3, %p8537_p2 }
  0x2a   :  { %8545 = shalt.err (!%p8542_p4)
}
  0x2b   :  { %s8546_s1 = scalar_lea.vmem %s61_s18, 18432  ;;  %p8551_p6 = scmp.lt.s32.totalorder %s61_s18, %s61_s18 }
  0x2c   :  { %p8547_p5 = scmp.ne.s32.totalorder %s61_s18, %s8546_s1  ;;  %p8552_p7 = scmp.lt.s32.totalorder %s8546_s1, %s8546_s1 }
  0x2e   :  { %p8553_p8 = por %p8552_p7, %p8551_p6 }
  0x30   :  { %p8554_p9 = pnand %p8553_p8, %p8547_p5 }
  0x32   :  { %8557 = shalt.err (!%p8554_p9)
}
  0x33   :  { %66 = dma.hbm_to_vmem [thread:$0]  %s11187_s7, 18432, %s61_s18, [#allocation7], %s8596_s20, %s8596_s20, %s8597_s21  }
  0x34   :  { %s8558_s26 = scalar_lea.hbm %s11191_s11, 9216 }
  0x35   :  { %p8559_p10 = scmp.ne.s32.totalorder %s11191_s11, %s8558_s26  ;;  %p8562_p11 = scmp.lt.u32.totalorder %s8558_s26, %s11191_s11 }
  0x37   :  { %p8564_p12 = pnand %p8562_p11, %p8559_p10 }
  0x39   :  { %8567 = shalt.err (!%p8564_p12)
}
  0x3a   :  { %s8568_s25 = scalar_lea.vmem %s8708_s22, 9216  ;;  %p8573_p0 = scmp.lt.s32.totalorder %s8708_s22, %s8708_s22 }
  0x3b   :  { %p8569_p13 = scmp.ne.s32.totalorder %s8708_s22, %s8568_s25  ;;  %p8574_p1 = scmp.lt.s32.totalorder %s8568_s25, %s8568_s25 }
  0x3d   :  { %p8575_p2 = por %p8574_p1, %p8573_p0 }
  0x3f   :  { %p8576_p3 = pnand %p8575_p2, %p8569_p13 }
  0x41   :  { %8579 = shalt.err (!%p8576_p3)
}
  0x42   :  { %84 = dma.hbm_to_vmem [thread:$0]  %s11191_s11, 9216, %s8708_s22, [#allocation10], %s8596_s20, %s8596_s20, %s8597_s21  }
  0x43   :  { %8584 = dma.done.wait [#allocation5], 9216  }
  0x44   :  { %8585 = vsyncadd [#allocation5], 4294958080 }
  0x45   :  { %8586 = dma.done.wait [#allocation7], 36864  }
  0x46   :  { %8587 = vsyncadd [#allocation7], 4294930432 }
  0x47   :  { %8588 = dma.done.wait [#allocation10], 9216  }
  0x48   :  { %8589 = vsyncadd [#allocation10], 4294958080  ;;  %v8600_v0 = vmov 0.0   ;;  %v8136_v1 = vld [vmem:[#allocation4 + $0x40] sm:$0xff]   ;;  %v8140_v5 = vld [vmem:[#allocation4 + $0x48] sm:$0xff]  }
  0x49   :  { %100 = vst [vmem:[#allocation2] sm:$0xff] %v8600_v0  ;;  %101 = vst [vmem:[#allocation2 + $0x8] sm:$0x3] %v8600_v0  ;;  %v8137_v2 = vld [vmem:[#allocation4 + $0xc0] sm:$0xff]   ;;  %6873 = vmatprep.subr.bf16.mxu0 %v8136_v1  ;;  %v8141_v6 = vld [vmem:[#allocation4 + $0xc8] sm:$0xff]  }
  0x4a   :  { %102 = vst [vmem:[#allocation2 + $0x10] sm:$0xff] %v8600_v0  ;;  %103 = vst [vmem:[#allocation2 + $0x18] sm:$0x3] %v8600_v0  ;;  %v8138_v3 = vld [vmem:[#allocation4] sm:$0xff]   ;;  %6937 = vmatprep.subr.bf16.mxu1 %v8137_v2  ;;  %v8142_v7 = vld [vmem:[#allocation4 + $0x8] sm:$0xff]  }
  0x4b   :  { %104 = vst [vmem:[#allocation2 + $0x20] sm:$0xff] %v8600_v0  ;;  %105 = vst [vmem:[#allocation2 + $0x28] sm:$0x3] %v8600_v0  ;;  %v8139_v4 = vld [vmem:[#allocation4 + $0x80] sm:$0xff]   ;;  %6874 = vmatpush3.bf16.msra.mxu0 %v8138_v3  ;;  %v8143_v8 = vld [vmem:[#allocation4 + $0x88] sm:$0xff]  }
  0x4c   :  { %106 = vst [vmem:[#allocation2 + $0x30] sm:$0xff] %v8600_v0  ;;  %107 = vst [vmem:[#allocation2 + $0x38] sm:$0x3] %v8600_v0  ;;  %6938 = vmatpush3.bf16.msra.mxu1 %v8139_v4  ;;  %6875 = vmatprep.subr.bf16.mxu0 %v8140_v5  ;;  %v8144_v9 = vld [vmem:[#allocation4 + $0x50] sm:$0xff]   ;;  %v8148_v13 = vld [vmem:[#allocation4 + $0x58] sm:$0xff]  }
  0x4d   :  { %108 = vst [vmem:[#allocation2 + $0x40] sm:$0xff] %v8600_v0  ;;  %109 = vst [vmem:[#allocation2 + $0x48] sm:$0x3] %v8600_v0  ;;  %6939 = vmatprep.subr.bf16.mxu1 %v8141_v6  ;;  %v8145_v10 = vld [vmem:[#allocation4 + $0xd0] sm:$0xff]   ;;  %v8149_v14 = vld [vmem:[#allocation4 + $0xd8] sm:$0xff]  }
  0x4e   :  { %110 = vst [vmem:[#allocation2 + $0x50] sm:$0xff] %v8600_v0  ;;  %111 = vst [vmem:[#allocation2 + $0x58] sm:$0x3] %v8600_v0  ;;  %v8146_v11 = vld [vmem:[#allocation4 + $0x10] sm:$0xff]   ;;  %v8150_v15 = vld [vmem:[#allocation4 + $0x18] sm:$0xff]  }
  0x4f   :  { %112 = vst [vmem:[#allocation2 + $0x60] sm:$0xff] %v8600_v0  ;;  %113 = vst [vmem:[#allocation2 + $0x68] sm:$0x3] %v8600_v0  ;;  %6876 = vmatpush3.bf16.msra.mxu0 %v8142_v7  ;;  %v8147_v12 = vld [vmem:[#allocation4 + $0x90] sm:$0xff]   ;;  %v8151_v16 = vld [vmem:[#allocation4 + $0x98] sm:$0xff]  }
  0x50   :  { %114 = vst [vmem:[#allocation2 + $0x70] sm:$0xff] %v8600_v0  ;;  %115 = vst [vmem:[#allocation2 + $0x78] sm:$0x3] %v8600_v0  ;;  %6940 = vmatpush3.bf16.msra.mxu1 %v8143_v8  ;;  %6877 = vmatprep.subr.bf16.mxu0 %v8144_v9  ;;  %v8152_v17 = vld [vmem:[#allocation4 + $0x60] sm:$0xff]   ;;  %v8156_v21 = vld [vmem:[#allocation4 + $0x68] sm:$0xff]  }
  0x51   :  { %116 = vst [vmem:[#allocation2 + $0x80] sm:$0xff] %v8600_v0  ;;  %117 = vst [vmem:[#allocation2 + $0x88] sm:$0x3] %v8600_v0  ;;  %6941 = vmatprep.subr.bf16.mxu1 %v8145_v10  ;;  %v8153_v18 = vld [vmem:[#allocation4 + $0xe0] sm:$0xff]   ;;  %v8157_v22 = vld [vmem:[#allocation4 + $0xe8] sm:$0xff]  }
  0x52   :  { %118 = vst [vmem:[#allocation2 + $0x90] sm:$0xff] %v8600_v0  ;;  %119 = vst [vmem:[#allocation2 + $0x98] sm:$0x3] %v8600_v0  ;;  %v8154_v19 = vld [vmem:[#allocation4 + $0x20] sm:$0xff]   ;;  %v8158_v23 = vld [vmem:[#allocation4 + $0x28] sm:$0xff]  }
  0x53   :  { %120 = vst [vmem:[#allocation2 + $0xa0] sm:$0xff] %v8600_v0  ;;  %121 = vst [vmem:[#allocation2 + $0xa8] sm:$0x3] %v8600_v0  ;;  %6878 = vmatpush3.bf16.msra.mxu0 %v8146_v11  ;;  %v8155_v20 = vld [vmem:[#allocation4 + $0xa0] sm:$0xff]   ;;  %v8159_v24 = vld [vmem:[#allocation4 + $0xa8] sm:$0xff]  }
  0x54   :  { %122 = vst [vmem:[#allocation2 + $0xb0] sm:$0xff] %v8600_v0  ;;  %123 = vst [vmem:[#allocation2 + $0xb8] sm:$0x3] %v8600_v0  ;;  %6942 = vmatpush3.bf16.msra.mxu1 %v8147_v12  ;;  %6879 = vmatprep.subr.bf16.mxu0 %v8148_v13  ;;  %v8160_v25 = vld [vmem:[#allocation4 + $0x70] sm:$0xff]   ;;  %v8164_v29 = vld [vmem:[#allocation4 + $0x78] sm:$0xff]  }
  0x55   :  { %124 = vst [vmem:[#allocation2 + $0xc0] sm:$0xff] %v8600_v0  ;;  %125 = vst [vmem:[#allocation2 + $0xc8] sm:$0x3] %v8600_v0  ;;  %6943 = vmatprep.subr.bf16.mxu1 %v8149_v14  ;;  %v8161_v26 = vld [vmem:[#allocation4 + $0xf0] sm:$0xff]   ;;  %v8165_v30 = vld [vmem:[#allocation4 + $0xf8] sm:$0xff]  }
  0x56   :  { %126 = vst [vmem:[#allocation2 + $0xd0] sm:$0xff] %v8600_v0  ;;  %127 = vst [vmem:[#allocation2 + $0xd8] sm:$0x3] %v8600_v0  ;;  %v8162_v27 = vld [vmem:[#allocation4 + $0x30] sm:$0xff]   ;;  %v8166_v31 = vld [vmem:[#allocation4 + $0x38] sm:$0xff]  }
  0x57   :  { %128 = vst [vmem:[#allocation2 + $0xe0] sm:$0xff] %v8600_v0  ;;  %129 = vst [vmem:[#allocation2 + $0xe8] sm:$0x3] %v8600_v0  ;;  %6880 = vmatpush3.bf16.msra.mxu0 %v8150_v15  ;;  %v8163_v28 = vld [vmem:[#allocation4 + $0xb0] sm:$0xff]   ;;  %v8167_v32 = vld [vmem:[#allocation4 + $0xb8] sm:$0xff]  }
  0x58   :  { %130 = vst [vmem:[#allocation2 + $0xf0] sm:$0xff] %v8600_v0  ;;  %131 = vst [vmem:[#allocation2 + $0xf8] sm:$0x3] %v8600_v0  ;;  %6944 = vmatpush3.bf16.msra.mxu1 %v8151_v16  ;;  %6881 = vmatprep.subr.bf16.mxu0 %v8152_v17  ;;  %v8788_v33 = vld [vmem:[%s11180_s0] sm:$0xff]  ;;  %v8793_v35 = vld [vmem:[%s11180_s0 + $0x8] sm:$0xff] }
  0x59   :  { %132 = vst [vmem:[#allocation2 + $0x100] sm:$0xff] %v8600_v0  ;;  %133 = vst [vmem:[#allocation2 + $0x108] sm:$0x3] %v8600_v0  ;;  %6945 = vmatprep.subr.bf16.mxu1 %v8153_v18  ;;  %v350_v34 = vld [vmem:[#allocation2 + $0x1] sm:$0xff]  ;;  %v8803_v41 = vld [vmem:[%s11180_s0 + $0x10] sm:$0xff] }
  0x5a   :  { %134 = vst [vmem:[#allocation2 + $0x110] sm:$0xff] %v8600_v0  ;;  %135 = vst [vmem:[#allocation2 + $0x118] sm:$0x3] %v8600_v0  ;;  %v366_v36 = vpack.c.bf16 %v8788_v33, %v350_v34  ;;  %v8168_v38 = vld [vmem:[#allocation4 + $0x140] sm:$0xff]   ;;  %v8808_v42 = vld [vmem:[%s11180_s0 + $0x18] sm:$0xff]  ;;  %v8813_v44 = vpack.c.bf16 %v8803_v41, %v8793_v35 }
  0x5b   :  { %136 = vst [vmem:[#allocation2 + $0x120] sm:$0xff] %v8600_v0  ;;  %137 = vst [vmem:[#allocation2 + $0x128] sm:$0x3] %v8600_v0  ;;  %6882 = vmatpush3.bf16.msra.mxu0 %v8154_v19  ;;  %v8169_v39 = vld [vmem:[#allocation4 + $0x1c0] sm:$0xff]   ;;  %v8172_v50 = vld [vmem:[#allocation4 + $0x148] sm:$0xff]  }
  0x5c   :  { %138 = vst [vmem:[#allocation2 + $0x130] sm:$0xff] %v8600_v0  ;;  %139 = vst [vmem:[#allocation2 + $0x138] sm:$0x3] %v8600_v0  ;;  %6946 = vmatpush3.bf16.msra.mxu1 %v8155_v20  ;;  %6883 = vmatprep.subr.bf16.mxu0 %v8156_v21  ;;  %v382_v40 = vld [vmem:[#allocation2 + $0x2] sm:$0xff]  ;;  %v8176_v62 = vld [vmem:[#allocation4 + $0x150] sm:$0xff]  }
  0x5d   :  { %6947 = vmatprep.subr.bf16.mxu1 %v8157_v22  ;;  %157 = vst [vmem:[#allocation2 + $0x11] sm:$0xff] %v8788_v33  ;;  %158 = vst [vmem:[#allocation2 + $0x21] sm:$0xff] %v8793_v35  ;;  %1149 = vmatprep.mubr.bf16.mxu0 %v366_v36  ;;  %v8170_v43 = vld [vmem:[#allocation4 + $0x100] sm:$0xff]   ;;  %v8173_v51 = vld [vmem:[#allocation4 + $0x1c8] sm:$0xff]  }
  0x5e   :  { %159 = vst [vmem:[#allocation2 + $0x31] sm:$0xff] %v8803_v41  ;;  %160 = vst [vmem:[#allocation2 + $0x41] sm:$0xff] %v8808_v42  ;;  %v8171_v46 = vld [vmem:[#allocation4 + $0x180] sm:$0xff]   ;;  %v8174_v56 = vld [vmem:[#allocation4 + $0x108] sm:$0xff]  }
  0x5f   :  { %6884 = vmatpush3.bf16.msra.mxu0 %v8158_v23  ;;  %v8175_v58 = vld [vmem:[#allocation4 + $0x188] sm:$0xff]   ;;  %v8829_v59 = vld [vmem:[%s11180_s0 + $0x20] sm:$0xff]  ;;  %v8177_v8 = vld [vmem:[#allocation4 + $0x1d0] sm:$0xff]  }
  0x60   :  { %6948 = vmatpush3.bf16.msra.mxu1 %v8159_v24  ;;  %6885 = vmatprep.subr.bf16.mxu0 %v8160_v25  ;;  %v8834_v60 = vld [vmem:[%s11180_s0 + $0x28] sm:$0xff]  ;;  %161 = vst [vmem:[#allocation2 + $0x51] sm:$0xff] %v8829_v59  ;;  %v8839_v61 = vpack.c.bf16 %v8829_v59, %v8808_v42  ;;  %v8178_v10 = vld [vmem:[#allocation4 + $0x110] sm:$0xff]   ;;  %v8863_v13 = vld [vmem:[%s11180_s0 + $0x38] sm:$0xff] }
  0x61   :  { %6949 = vmatprep.subr.bf16.mxu1 %v8161_v26  ;;  %162 = vst [vmem:[#allocation2 + $0x61] sm:$0xff] %v8834_v60  ;;  %v8179_v11 = vld [vmem:[#allocation4 + $0x190] sm:$0xff]   ;;  %164 = vst [vmem:[#allocation2 + $0x81] sm:$0xff] %v8863_v13  ;;  %v8180_v15 = vld [vmem:[#allocation4 + $0x158] sm:$0xff]  }
  0x62   :  { %v8858_v12 = vld [vmem:[%s11180_s0 + $0x30] sm:$0xff]  ;;  %v8181_v24 = vld [vmem:[#allocation4 + $0x1d8] sm:$0xff]  }
  0x63   :  { %6886 = vmatpush3.bf16.msra.mxu0 %v8162_v27  ;;  %163 = vst [vmem:[#allocation2 + $0x71] sm:$0xff] %v8858_v12  ;;  %v8868_v14 = vpack.c.bf16 %v8858_v12, %v8834_v60  ;;  %v8182_v26 = vld [vmem:[#allocation4 + $0x118] sm:$0xff]  }
  0x64   :  { %6950 = vmatpush3.bf16.msra.mxu1 %v8163_v28  ;;  %6887 = vmatprep.subr.bf16.mxu0 %v8164_v29  ;;  %v414_v47 = vld [vmem:[#allocation2 + $0x10] sm:$0xff]  ;;  %v415_v48 = vld [vmem:[#allocation2 + $0x20] sm:$0xff]  ;;  %v8183_v27 = vld [vmem:[#allocation4 + $0x198] sm:$0xff]  }
  0x65   :  { %6951 = vmatprep.subr.bf16.mxu1 %v8165_v30  ;;  %v8818_v49 = vld [vmem:[#allocation2 + $0x12] sm:$0xff]  ;;  %v430_v52 = vpack.c.bf16 %v415_v48, %v414_v47  ;;  %v334_v53 = vpack.c.bf16 %v414_v47, %v8600_v0  ;;  %v8822_v55 = vld [vmem:[#allocation2 + $0x22] sm:$0xff] }
  0x66   :  { %v398_v54 = vpack.c.bf16 %v8818_v49, %v382_v40  ;;  %v494_v57 = vpack.c.bf16 %v8822_v55, %v8818_v49  ;;  %v416_v1 = vld [vmem:[#allocation2 + $0x30] sm:$0xff]  ;;  %v417_v2 = vld [vmem:[#allocation2 + $0x40] sm:$0xff] }
  0x67   :  { %6888 = vmatpush3.bf16.msra.mxu0 %v8166_v31  ;;  %1246 = vmatprep.mubr.bf16.mxu1 %v430_v52  ;;  %v8845_v3 = vld [vmem:[#allocation2 + $0x32] sm:$0xff]  ;;  %v431_v4 = vpack.c.bf16 %v417_v2, %v416_v1  ;;  %v8847_v5 = vpack.c.bf16 %v416_v1, %v415_v48  ;;  %v8851_v7 = vld [vmem:[#allocation2 + $0x42] sm:$0xff] }
  0x68   :  { %6952 = vmatpush3.bf16.msra.mxu1 %v8167_v32  ;;  %7001 = vmatprep.subr.bf16.mxu0 %v8168_v38  ;;  %v399_v6 = vpack.c.bf16 %v8845_v3, %v8822_v55  ;;  %v418_v17 = vld [vmem:[#allocation2 + $0x50] sm:$0xff]  ;;  %v419_v18 = vld [vmem:[#allocation2 + $0x60] sm:$0xff]  ;;  %v8897_v31 = vld [vmem:[%s11180_s0 + $0x48] sm:$0xff] }
  0x69   :  { %7065 = vmatprep.subr.bf16.mxu1 %v8169_v39  ;;  %v8874_v19 = vld [vmem:[#allocation2 + $0x52] sm:$0xff]  ;;  %v432_v20 = vpack.c.bf16 %v419_v18, %v418_v17  ;;  %v8877_v21 = vpack.c.bf16 %v418_v17, %v417_v2  ;;  %v8883_v23 = vld [vmem:[#allocation2 + $0x62] sm:$0xff]  ;;  %166 = vst [vmem:[#allocation2 + $0xc1] sm:$0xff] %v8897_v31 }
  0x6a   :  { %1150 = vmatmul.mubr.bf16.vlgmr.msra.gmra.mrb[0].mxu0 %v334_v53  ;;  %v8881_v22 = vpack.c.bf16 %v8874_v19, %v8851_v7  ;;  %v8890_v28 = vld [vmem:[%s11180_s0 + $0x40] sm:$0xff]  ;;  %v420_v32 = vld [vmem:[#allocation2 + $0x70] sm:$0xff]  ;;  %v8188_v1 = vld [vmem:[#allocation4 + $0x168] sm:$0xff]  }
  0x6b   :  { %1247 = vmatmul.mubr.bf16.vlgmr.msra.gmra.mrb[0].mxu1 %v398_v54  ;;  %7002 = vmatpush3.bf16.msra.mxu0 %v8170_v43  ;;  %v358_v29 = vld [vmem:[#allocation2 + $0xa1] sm:$0xff]  ;;  %165 = vst [vmem:[#allocation2 + $0xb1] sm:$0xff] %v8890_v28  ;;  %v8899_v36 = vld [vmem:[#allocation2 + $0x72] sm:$0xff]  ;;  %v8904_v40 = vpack.c.bf16 %v420_v32, %v419_v18 }
  0x6c   :  { %7066 = vmatpush3.bf16.msra.mxu1 %v8171_v46  ;;  %1157 = vmatprep.mubr.bf16.mxu0 %v8813_v44  ;;  %v370_v30 = vpack.c.bf16 %v8890_v28, %v358_v29  ;;  %v421_v34 = vld [vmem:[#allocation2 + $0x80] sm:$0xff]  ;;  %v8908_v43 = vpack.c.bf16 %v8899_v36, %v8883_v23  ;;  %v8921_v53 = vld [vmem:[%s11180_s0 + $0x50] sm:$0xff]  ;;  %v8190_v18 = vld [vmem:[#allocation4 + $0x128] sm:$0xff]  }
  0x6d   :  { %7003 = vmatprep.subr.bf16.mxu0 %v8172_v50  ;;  %7067 = vmatprep.subr.bf16.mxu1 %v8173_v51  ;;  %v433_v39 = vpack.c.bf16 %v421_v34, %v420_v32  ;;  %v8184_v46 = vld [vmem:[#allocation4 + $0x160] sm:$0xff]   ;;  %v8911_v47 = vpack.c.bf16 %v8600_v0, %v421_v34  ;;  %167 = vst [vmem:[#allocation2 + $0xd1] sm:$0xff] %v8921_v53  ;;  %v8192_v34 = vld [vmem:[#allocation4 + $0x170] sm:$0xff]   ;;  %v8205_v55 = vld [vmem:[#allocation4 + $0x228] sm:$0xff]  }
  0x6e   :  { %1254 = vmatprep.mubr.bf16.mxu1 %v431_v4  ;;  %v8914_v48 = vld [vmem:[#allocation2 + $0xa2] sm:$0xff]  ;;  %v8926_v54 = vpack.c.bf16 %v8921_v53, %v8897_v31  ;;  %v9029_v45 = vld [vmem:[#allocation2 + $0x131] sm:$0xff] }
  0x6f   :  { %7004 = vmatpush3.bf16.msra.mxu0 %v8174_v56  ;;  %v8185_v50 = vld [vmem:[#allocation4 + $0x1e0] sm:$0xff]   ;;  %v8931_v56 = vld [vmem:[%s11180_s0 + $0x58] sm:$0xff] }
  0x70   :  { %7068 = vmatpush3.bf16.msra.mxu1 %v8175_v58  ;;  %7005 = vmatprep.subr.bf16.mxu0 %v8176_v62  ;;  %v8186_v51 = vld [vmem:[#allocation4 + $0x120] sm:$0xff]   ;;  %168 = vst [vmem:[#allocation2 + $0xe1] sm:$0xff] %v8931_v56  ;;  %v9037_v9 = vld [vmem:[#allocation2 + $0x32] sm:$0xff] }
  0x71   :  { %7069 = vmatprep.subr.bf16.mxu1 %v8177_v8  ;;  %v8187_v52 = vld [vmem:[#allocation4 + $0x1a0] sm:$0xff]   ;;  %v9039_v37 = vld [vmem:[#allocation2 + $0x92] sm:$0xff] }
  0x72   :  { %1158 = vmatmul.mubr.bf16.gmra.mrb[4].mxu0 %v8847_v5  ;;  %v422_v58 = vld [vmem:[#allocation2 + $0xb0] sm:$0xff]  ;;  %v423_v4 = vld [vmem:[#allocation2 + $0xc0] sm:$0xff] }
  0x73   :  { %1255 = vmatmul.mubr.bf16.gmra.mrb[4].mxu1 %v399_v6  ;;  %1165 = vmatprep.mubr.bf16.mxu0 %v8839_v61  ;;  %v8933_v62 = vld [vmem:[#allocation2 + $0xb2] sm:$0xff]  ;;  %v338_v6 = vpack.c.bf16 %v422_v58, %v8600_v0  ;;  %v8200_v17 = vld [vmem:[#allocation4 + $0x200] sm:$0xff]  }
  0x74   :  { %7006 = vmatpush3.bf16.msra.mxu0 %v8178_v10  ;;  %7070 = vmatpush3.bf16.msra.mxu1 %v8179_v11  ;;  %v402_v8 = vpack.c.bf16 %v8933_v62, %v8914_v48  ;;  %v8941_v10 = vld [vmem:[#allocation2 + $0xc2] sm:$0xff]  ;;  %v434_v11 = vpack.c.bf16 %v423_v4, %v422_v58  ;;  %v424_v29 = vld [vmem:[#allocation2 + $0xd0] sm:$0xff]  ;;  %v8197_v58 = vld [vmem:[#allocation4 + $0x1f8] sm:$0xff]  }
  0x75   :  { %1262 = vmatprep.mubr.bf16.mxu1 %v432_v20  ;;  %7007 = vmatprep.subr.bf16.mxu0 %v8180_v15  ;;  %v8189_v15 = vld [vmem:[#allocation4 + $0x1e8] sm:$0xff]   ;;  %v8962_v32 = vld [vmem:[#allocation2 + $0xd2] sm:$0xff]  ;;  %v8204_v49 = vld [vmem:[#allocation4 + $0x220] sm:$0xff]  }
  0x76   :  { %7071 = vmatprep.subr.bf16.mxu1 %v8181_v24  ;;  %v8191_v20 = vld [vmem:[#allocation4 + $0x1a8] sm:$0xff]   ;;  %v8949_v24 = vld [vmem:[%s11180_s0 + $0x60] sm:$0xff]  ;;  %v8971_v48 = vpack.c.bf16 %v8962_v32, %v8941_v10 }
  0x77   :  { %169 = vst [vmem:[#allocation2 + $0xf1] sm:$0xff] %v8949_v24 }
  0x78   :  { %7008 = vmatpush3.bf16.msra.mxu0 %v8182_v26  ;;  %7072 = vmatpush3.bf16.msra.mxu1 %v8183_v27  ;;  %v8955_v26 = vpack.c.bf16 %v8949_v24, %v8931_v56  ;;  %v8960_v27 = vld [vmem:[%s11180_s0 + $0x68] sm:$0xff] }
  0x79   :  { %7009 = vmatprep.subr.bf16.mxu0 %v8184_v46  ;;  %7073 = vmatprep.subr.bf16.mxu1 %v8185_v50  ;;  %170 = vst [vmem:[#allocation2 + $0x101] sm:$0xff] %v8960_v27  ;;  %v8967_v46 = vpack.c.bf16 %v424_v29, %v423_v4  ;;  %v8973_v50 = vld [vmem:[#allocation2 + $0xe2] sm:$0xff]  ;;  %v8980_v4 = vld [vmem:[%s11180_s0 + $0x70] sm:$0xff] }
  0x7a   :  { %1166 = vmatmul.mubr.bf16.gmra.mrb[8].mxu0 %v8877_v21  ;;  %171 = vst [vmem:[#allocation2 + $0x111] sm:$0xff] %v8980_v4 }
  0x7b   :  { %1263 = vmatmul.mubr.bf16.gmra.mrb[8].mxu1 %v8881_v22  ;;  %1173 = vmatprep.mubr.bf16.mxu0 %v8868_v14 }
  0x7c   :  { %1270 = vmatprep.mubr.bf16.mxu1 %v433_v39  ;;  %7010 = vmatpush3.bf16.msra.mxu0 %v8186_v51  ;;  %v425_v39 = vld [vmem:[#allocation2 + $0xe0] sm:$0xff] }
  0x7d   :  { %7074 = vmatpush3.bf16.msra.mxu1 %v8187_v52  ;;  %7011 = vmatprep.subr.bf16.mxu0 %v8188_v1  ;;  %v435_v51 = vpack.c.bf16 %v425_v39, %v424_v29  ;;  %v8193_v52 = vld [vmem:[#allocation4 + $0x1f0] sm:$0xff]  }
  0x7e   :  { %7075 = vmatprep.subr.bf16.mxu1 %v8189_v15  ;;  %v8194_v1 = vld [vmem:[#allocation4 + $0x130] sm:$0xff]   ;;  %v8985_v15 = vpack.c.bf16 %v8980_v4, %v8960_v27 }
  0x7f   :  { %v8992_v29 = vld [vmem:[#allocation2 + $0xf2] sm:$0xff] }
  0x80   :  { %7012 = vmatpush3.bf16.msra.mxu0 %v8190_v18  ;;  %v8990_v18 = vld [vmem:[%s11180_s0 + $0x78] sm:$0xff]  ;;  %v9002_v2 = vpack.c.bf16 %v8992_v29, %v8973_v50 }
  0x81   :  { %7076 = vmatpush3.bf16.msra.mxu1 %v8191_v20  ;;  %7013 = vmatprep.subr.bf16.mxu0 %v8192_v34  ;;  %v426_v20 = vld [vmem:[#allocation2 + $0xf0] sm:$0xff]  ;;  %172 = vst [vmem:[#allocation2 + $0x121] sm:$0xff] %v8990_v18  ;;  %v8196_v34 = vld [vmem:[#allocation4 + $0x178] sm:$0xff]  }
  0x82   :  { %1174 = vmatmul.mubr.bf16.gmra.mrb[12].mxu0 %v8904_v40  ;;  %7077 = vmatprep.subr.bf16.mxu1 %v8193_v52  ;;  %v8198_v52 = vld [vmem:[#allocation4 + $0x138] sm:$0xff]  }
  0x83   :  { %1271 = vmatmul.mubr.bf16.gmra.mrb[12].mxu1 %v8908_v43  ;;  %1181 = vmatprep.mubr.bf16.mxu0 %v370_v30  ;;  %v8998_v30 = vpack.c.bf16 %v426_v20, %v425_v39  ;;  %v428_v39 = vld [vmem:[#allocation2 + $0x110] sm:$0xff] }
  0x84   :  { %1278 = vmatprep.mubr.bf16.mxu1 %v434_v11  ;;  %v8195_v11 = vld [vmem:[#allocation4 + $0x1b0] sm:$0xff]   ;;  %7014 = vmatpush3.bf16.msra.mxu0 %v8194_v1  ;;  %v427_v1 = vld [vmem:[#allocation2 + $0x100] sm:$0xff] }
  0x85   :  { %7078 = vmatpush3.bf16.msra.mxu1 %v8195_v11  ;;  %v436_v11 = vpack.c.bf16 %v427_v1, %v426_v20  ;;  %7015 = vmatprep.subr.bf16.mxu0 %v8196_v34  ;;  %v9008_v16 = vld [vmem:[#allocation2 + $0x112] sm:$0xff]  ;;  %v9010_v25 = vpack.c.bf16 %v428_v39, %v427_v1 }
  0x86   :  { %7079 = vmatprep.subr.bf16.mxu1 %v8197_v58  ;;  %v9017_v58 = vld [vmem:[#allocation2 + $0x82] sm:$0xff]  ;;  %v550_v1 = vld [vmem:[#allocation2 + $0x91] sm:$0xff] }
  0x88   :  { %7016 = vmatpush3.bf16.msra.mxu0 %v8198_v52  ;;  %v429_v63 = vld [vmem:[#allocation2 + $0x120] sm:$0xff]  ;;  %v497_v52 = vpack.c.bf16 %v9017_v58, %v8899_v36  ;;  %v11211_v36 = vpack.c.bf16 %v8793_v35, %v8788_v33  ;;  %v11213_v33 = vpack.c.bf16 %v8808_v42, %v8803_v41  ;;  %v11214_v35 = vpack.c.bf16 %v8883_v23, %v8874_v19  ;;  %v8206_v42 = vld [vmem:[#allocation4 + $0x230] sm:$0xff]  }
  0x89   :  { %7961 = vmatprep.subr.bf16.mxu0 %v8200_v17  ;;  %v437_v20 = vpack.c.bf16 %v429_v63, %v428_v39  ;;  %v9020_v34 = vpack.c.bf16 %v8600_v0, %v429_v63  ;;  %v9027_v38 = vld [vmem:[#allocation2 + $0x122] sm:$0xff]  ;;  %v8202_v0 = vld [vmem:[#allocation4 + $0x210] sm:$0xff]   ;;  %v11215_v41 = vpack.c.bf16 %v8834_v60, %v8829_v59  ;;  %v11217_v59 = vpack.c.bf16 %v8941_v10, %v8933_v62 }
  0x8a   :  { %1182 = vmatmul.mubr.bf16.gmra.mrb[16].mxu0 %v338_v6  ;;  %v9004_v6 = vld [vmem:[#allocation2 + $0x102] sm:$0xff]  ;;  %v501_v39 = vpack.c.bf16 %v9027_v38, %v9008_v16  ;;  %v11218_v60 = vpack.c.bf16 %v8897_v31, %v8890_v28 }
  0x8b   :  { %1279 = vmatmul.mubr.bf16.gmra.mrb[16].mxu1 %v402_v8  ;;  %1189 = vmatprep.mubr.bf16.mxu0 %v8926_v54  ;;  %v8199_v8 = vld [vmem:[#allocation4 + $0x1b8] sm:$0xff]   ;;  %v9035_v63 = vld [vmem:[#allocation2 + $0x22] sm:$0xff] }
  0x8c   :  { %1286 = vmatprep.mubr.bf16.mxu1 %v435_v51  ;;  %7080 = vmatpush3.bf16.msra.mxu1 %v8199_v8  ;;  %v9014_v51 = vpack.c.bf16 %v9008_v16, %v9004_v6  ;;  %v562_v8 = vpack.c.bf16 %v550_v1, %v8863_v13  ;;  %v9046_v1 = vld [vmem:[#allocation2 + $0x132] sm:$0xff]  ;;  %v11225_v19 = vpack.c.bf16 %v9037_v9, %v9035_v63 }
  0x8d   :  { %8089 = vmatprep.subr.bf16.mxu1 %v8200_v17  ;;  %v11227_v16 = vpack.c.bf16 %v9046_v1, %v9027_v38 }
  0x92   :  { %1190 = vmatmul.mubr.bf16.gmra.mrb[20].mxu0 %v8967_v46 }
  0x93   :  { %1287 = vmatmul.mubr.bf16.gmra.mrb[20].mxu1 %v8971_v48  ;;  %1197 = vmatprep.mubr.bf16.mxu0 %v8955_v26 }
  0x94   :  { %1294 = vmatprep.mubr.bf16.mxu1 %v436_v11  ;;  %v8201_v11 = vld [vmem:[#allocation4 + $0x208] sm:$0xff]  }
  0x9a   :  { %1198 = vmatmul.mubr.bf16.gmra.mrb[24].mxu0 %v8998_v30 }
  0x9b   :  { %1295 = vmatmul.mubr.bf16.gmra.mrb[24].mxu1 %v9002_v2  ;;  %1205 = vmatprep.mubr.bf16.mxu0 %v8985_v15 }
  0x9c   :  { %1302 = vmatprep.mubr.bf16.mxu1 %v437_v20  ;;  %v11212_v20 = vpack.c.bf16 %v8851_v7, %v8845_v3  ;;  %v11219_v3 = vpack.c.bf16 %v8973_v50, %v8962_v32  ;;  %v11221_v7 = vpack.c.bf16 %v9004_v6, %v8992_v29 }
  0xa2   :  { %1206 = vmatmul.mubr.bf16.gmra.mrb[28].mxu0 %v9010_v25 }
  0xa3   :  { %1303 = vmatmul.mubr.bf16.gmra.mrb[28].mxu1 %v9014_v51  ;;  %1343 = vmatprep.mubr.bf16.mxu0 %v494_v57  ;;  %v8207_v57 = vld [vmem:[#allocation4 + $0x238] sm:$0xff]  }
  0xa4   :  { %1440 = vmatprep.mubr.bf16.mxu1 %v8813_v44  ;;  %v8203_v44 = vld [vmem:[#allocation4 + $0x218] sm:$0xff]  }
  0xaa   :  { %1344 = vmatmul.mubr.bf16.vlgmr.msra.gmra.mrb[32].mxu0 %v11211_v36 }
  0xab   :  { %1441 = vmatmul.mubr.bf16.vlgmr.msra.gmra.mrb[32].mxu1 %v8847_v5  ;;  %7962 = vmatpush3.bf16.msra.mxu0 %v8200_v17  ;;  %v11220_v5 = vpack.c.bf16 %v8931_v56, %v8921_v53 }
  0xac   :  { %8097 = vmatpush3.bf16.msra.mxu1 %v8200_v17  ;;  %1351 = vmatprep.mubr.bf16.mxu0 %v11212_v20 }
  0xad   :  { %1448 = vmatprep.mubr.bf16.mxu1 %v8839_v61  ;;  %7963 = vmatprep.subr.bf16.mxu0 %v8201_v11  ;;  %v11216_v61 = vpack.c.bf16 %v8863_v13, %v8858_v12  ;;  %v11222_v12 = vpack.c.bf16 %v8960_v27, %v8949_v24  ;;  %v11223_v13 = vpack.c.bf16 %v9029_v45, %v8990_v18 }
  0xae   :  { %8090 = vmatprep.subr.bf16.mxu1 %v8201_v11  ;;  %v11226_v45 = vpack.c.bf16 %v9039_v37, %v9017_v58 }
  0xaf   :  { %7964 = vmatpush3.bf16.msra.mxu0 %v8201_v11 }
  0xb0   :  { %8098 = vmatpush3.bf16.msra.mxu1 %v8201_v11  ;;  %7965 = vmatprep.subr.bf16.mxu0 %v8202_v0 }
  0xb1   :  { %8091 = vmatprep.subr.bf16.mxu1 %v8202_v0 }
  0xb2   :  { %1352 = vmatmul.mubr.bf16.gmra.mrb[36].mxu0 %v11213_v33 }
  0xb3   :  { %1449 = vmatmul.mubr.bf16.gmra.mrb[36].mxu1 %v8877_v21  ;;  %1359 = vmatprep.mubr.bf16.mxu0 %v11214_v35 }
  0xb4   :  { %1456 = vmatprep.mubr.bf16.mxu1 %v8868_v14  ;;  %7966 = vmatpush3.bf16.msra.mxu0 %v8202_v0  ;;  %v11224_v14 = vpack.c.bf16 %v8990_v18, %v8980_v4 }
  0xb5   :  { %8099 = vmatpush3.bf16.msra.mxu1 %v8202_v0  ;;  %7967 = vmatprep.subr.bf16.mxu0 %v8203_v44 }
  0xb6   :  { %8092 = vmatprep.subr.bf16.mxu1 %v8203_v44 }
  0xb8   :  { %7968 = vmatpush3.bf16.msra.mxu0 %v8203_v44 }
  0xb9   :  { %8100 = vmatpush3.bf16.msra.mxu1 %v8203_v44  ;;  %7969 = vmatprep.subr.bf16.mxu0 %v8204_v49 }
  0xba   :  { %1360 = vmatmul.mubr.bf16.gmra.mrb[40].mxu0 %v11215_v41  ;;  %8093 = vmatprep.subr.bf16.mxu1 %v8204_v49 }
  0xbb   :  { %1457 = vmatmul.mubr.bf16.gmra.mrb[40].mxu1 %v8904_v40  ;;  %1367 = vmatprep.mubr.bf16.mxu0 %v497_v52 }
  0xbc   :  { %1464 = vmatprep.mubr.bf16.mxu1 %v562_v8  ;;  %7970 = vmatpush3.bf16.msra.mxu0 %v8204_v49 }
  0xbd   :  { %8101 = vmatpush3.bf16.msra.mxu1 %v8204_v49  ;;  %7971 = vmatprep.subr.bf16.mxu0 %v8205_v55 }
  0xbe   :  { %8094 = vmatprep.subr.bf16.mxu1 %v8205_v55 }
  0xc0   :  { %7972 = vmatpush3.bf16.msra.mxu0 %v8205_v55 }
  0xc1   :  { %8102 = vmatpush3.bf16.msra.mxu1 %v8205_v55  ;;  %7973 = vmatprep.subr.bf16.mxu0 %v8206_v42 }
  0xc2   :  { %1368 = vmatmul.mubr.bf16.gmra.mrb[44].mxu0 %v11216_v61  ;;  %8095 = vmatprep.subr.bf16.mxu1 %v8206_v42 }
  0xc3   :  { %1465 = vmatmul.mubr.bf16.gmra.mrb[44].mxu1 %v8911_v47  ;;  %1375 = vmatprep.mubr.bf16.mxu0 %v11217_v59 }
  0xc4   :  { %1472 = vmatprep.mubr.bf16.mxu1 %v8926_v54  ;;  %7974 = vmatpush3.bf16.msra.mxu0 %v8206_v42 }
  0xc5   :  { %8103 = vmatpush3.bf16.msra.mxu1 %v8206_v42  ;;  %7975 = vmatprep.subr.bf16.mxu0 %v8207_v57 }
  0xc6   :  { %8096 = vmatprep.subr.bf16.mxu1 %v8207_v57 }
  0xc8   :  { %7976 = vmatpush3.bf16.msra.mxu0 %v8207_v57 }
  0xc9   :  { %8104 = vmatpush3.bf16.msra.mxu1 %v8207_v57 }
  0xca   :  { %1376 = vmatmul.mubr.bf16.gmra.mrb[48].mxu0 %v11218_v60 }
  0xcb   :  { %1473 = vmatmul.mubr.bf16.gmra.mrb[48].mxu1 %v8967_v46  ;;  %1383 = vmatprep.mubr.bf16.mxu0 %v11219_v3 }
  0xcc   :  { %1480 = vmatprep.mubr.bf16.mxu1 %v8955_v26 }
  0xd2   :  { %1384 = vmatmul.mubr.bf16.gmra.mrb[52].mxu0 %v11220_v5 }
  0xd3   :  { %1481 = vmatmul.mubr.bf16.gmra.mrb[52].mxu1 %v8998_v30  ;;  %1391 = vmatprep.mubr.bf16.mxu0 %v11221_v7 }
  0xd4   :  { %1488 = vmatprep.mubr.bf16.mxu1 %v8985_v15 }
  0xda   :  { %1392 = vmatmul.mubr.bf16.gmra.mrb[56].mxu0 %v11222_v12 }
  0xdb   :  { %1489 = vmatmul.mubr.bf16.gmra.mrb[56].mxu1 %v9010_v25  ;;  %1399 = vmatprep.mubr.bf16.mxu0 %v501_v39 }
  0xdc   :  { %1496 = vmatprep.mubr.bf16.mxu1 %v11223_v13 }
  0xe2   :  { %1400 = vmatmul.mubr.bf16.gmra.mrb[60].mxu0 %v11224_v14 }
  0xe3   :  { %1497 = vmatmul.mubr.bf16.gmra.mrb[60].mxu1 %v9020_v34  ;;  %7977 = vmatprep.mubr.bf16.mxu0 %v11225_v19 }
  0xe4   :  { %7985 = vmatprep.mubr.bf16.mxu1 %v8971_v48 }
  0xea   :  { %7978 = vmatmul.mubr.bf16.vlgmr.msra.gmra.mrb[64].mxu0 %v8881_v22  ;;  %v9133_v22 = vld [vmem:[%s11182_s2] ss:$0 sm:$0xff]  ;;  %s9229_s2 = smov 0  }
  0xeb   :  { %7986 = vmatmul.mubr.bf16.vlgmr.msra.gmra.mrb[64].mxu1 %v9002_v2  ;;  %7981 = vmatprep.mubr.bf16.mxu0 %v8908_v43 }
  0xec   :  { %7989 = vmatprep.mubr.bf16.mxu1 %v9014_v51 }
  0xf2   :  { %7982 = vmatmul.mubr.bf16.gmra.mrb[68].mxu0 %v11226_v45 }
  0xf3   :  { %7990 = vmatmul.mubr.bf16.gmra.mrb[68].mxu1 %v11227_v16 }
 0x13d   :  { %v6889_v9 = vpop.f32.mrb[0].mxu0 }
 0x13e   :  { %v6953_v21 = vpop.f32.mrb[0].mxu1  ;;  %v6890_v23 = vpop.f32.mrb[1].mxu0 }
 0x13f   :  { %v6891_v25 = vadd.f32 %v6890_v23, %v6889_v9  ;;  %v6954_v28 = vpop.f32.mrb[1].mxu1  ;;  %v6892_v31 = vpop.f32.mrb[2].mxu0 }
 0x140   :  { %v6955_v40 = vadd.f32 %v6954_v28, %v6953_v21  ;;  %v6956_v43 = vpop.f32.mrb[2].mxu1  ;;  %v6893_v47 = vpop.f32.mrb[3].mxu0 }
 0x141   :  { %v1152_v37 = vadd.f32 %v6891_v25, %v9133_v22  ;;  %v6894_v53 = vadd.f32 %v6893_v47, %v6892_v31  ;;  %v6957_v54 = vpop.f32.mrb[3].mxu1 }
 0x142   :  { %v6958_v38 = vadd.f32 %v6957_v54, %v6956_v43 }
 0x143   :  { %v9136_v56 = vadd.f32 %v6955_v40, %v1152_v37  ;;  %v1155_v62 = vadd.f32 %v6894_v53, %v9133_v22 }
 0x145   :  { %v9139_v2 = vadd.f32 %v6958_v38, %v1155_v62  ;;  %v6895_v10 = vpop.f32.mrb[4].mxu0 }
 0x146   :  { %v6959_v17 = vpop.f32.mrb[4].mxu1  ;;  %v6896_v24 = vpop.f32.mrb[5].mxu0 }
 0x147   :  { %v6897_v26 = vadd.f32 %v6896_v24, %v6895_v10  ;;  %v6960_v27 = vpop.f32.mrb[5].mxu1  ;;  %v6898_v32 = vpop.f32.mrb[6].mxu0 }
 0x148   :  { %v6961_v30 = vadd.f32 %v6960_v27, %v6959_v17  ;;  %v6962_v46 = vpop.f32.mrb[6].mxu1  ;;  %v6899_v48 = vpop.f32.mrb[7].mxu0 }
 0x149   :  { %v1160_v50 = vadd.f32 %v6897_v26, %v9133_v22  ;;  %v6900_v4 = vadd.f32 %v6899_v48, %v6898_v32  ;;  %v6963_v15 = vpop.f32.mrb[7].mxu1 }
 0x14a   :  { %v6964_v18 = vadd.f32 %v6963_v15, %v6962_v46 }
 0x14b   :  { %v9142_v29 = vadd.f32 %v6961_v30, %v1160_v50  ;;  %v1163_v6 = vadd.f32 %v6900_v4, %v9133_v22 }
 0x14d   :  { %v9145_v51 = vadd.f32 %v6964_v18, %v1163_v6  ;;  %v6901_v58 = vpop.f32.mrb[8].mxu0 }
 0x14e   :  { %v6965_v34 = vpop.f32.mrb[8].mxu1  ;;  %v6902_v52 = vpop.f32.mrb[9].mxu0 }
 0x14f   :  { %v6903_v8 = vadd.f32 %v6902_v52, %v6901_v58  ;;  %v6966_v39 = vpop.f32.mrb[9].mxu1  ;;  %v6904_v0 = vpop.f32.mrb[10].mxu0 }
 0x150   :  { %v6967_v63 = vadd.f32 %v6966_v39, %v6965_v34  ;;  %v6968_v36 = vpop.f32.mrb[10].mxu1  ;;  %v6905_v11 = vpop.f32.mrb[11].mxu0 }
 0x151   :  { %v1168_v1 = vadd.f32 %v6903_v8, %v9133_v22  ;;  %v6906_v20 = vadd.f32 %v6905_v11, %v6904_v0  ;;  %v6969_v44 = vpop.f32.mrb[11].mxu1 }
 0x152   :  { %v6970_v33 = vadd.f32 %v6969_v44, %v6968_v36 }
 0x153   :  { %v9148_v35 = vadd.f32 %v6967_v63, %v1168_v1  ;;  %v1171_v49 = vadd.f32 %v6906_v20, %v9133_v22 }
 0x155   :  { %v9151_v55 = vadd.f32 %v6970_v33, %v1171_v49  ;;  %v6907_v41 = vpop.f32.mrb[12].mxu0 }
 0x156   :  { %v6971_v42 = vpop.f32.mrb[12].mxu1  ;;  %v6908_v57 = vpop.f32.mrb[13].mxu0 }
 0x157   :  { %v6909_v61 = vadd.f32 %v6908_v57, %v6907_v41  ;;  %v6972_v59 = vpop.f32.mrb[13].mxu1  ;;  %v6910_v60 = vpop.f32.mrb[14].mxu0 }
 0x158   :  { %v6973_v3 = vadd.f32 %v6972_v59, %v6971_v42  ;;  %v6974_v5 = vpop.f32.mrb[14].mxu1  ;;  %v6911_v7 = vpop.f32.mrb[15].mxu0 }
 0x159   :  { %v1176_v12 = vadd.f32 %v6909_v61, %v9133_v22  ;;  %v6912_v13 = vadd.f32 %v6911_v7, %v6910_v60  ;;  %v6975_v14 = vpop.f32.mrb[15].mxu1 }
 0x15a   :  { %v6976_v19 = vadd.f32 %v6975_v14, %v6974_v5 }
 0x15b   :  { %v9154_v45 = vadd.f32 %v6973_v3, %v1176_v12  ;;  %v1179_v16 = vadd.f32 %v6912_v13, %v9133_v22 }
 0x15d   :  { %v9157_v9 = vadd.f32 %v6976_v19, %v1179_v16  ;;  %v6913_v21 = vpop.f32.mrb[16].mxu0 }
 0x15e   :  { %v6977_v23 = vpop.f32.mrb[16].mxu1  ;;  %v6914_v25 = vpop.f32.mrb[17].mxu0 }
 0x15f   :  { %v6915_v28 = vadd.f32 %v6914_v25, %v6913_v21  ;;  %v6978_v31 = vpop.f32.mrb[17].mxu1  ;;  %v6916_v40 = vpop.f32.mrb[18].mxu0 }
 0x160   :  { %v6979_v43 = vadd.f32 %v6978_v31, %v6977_v23  ;;  %v6980_v47 = vpop.f32.mrb[18].mxu1  ;;  %v6917_v37 = vpop.f32.mrb[19].mxu0 }
 0x161   :  { %v1184_v53 = vadd.f32 %v6915_v28, %v9133_v22  ;;  %v6918_v54 = vadd.f32 %v6917_v37, %v6916_v40  ;;  %v6981_v38 = vpop.f32.mrb[19].mxu1 }
 0x162   :  { %v6982_v62 = vadd.f32 %v6981_v38, %v6980_v47 }
 0x163   :  { %v9160_v10 = vadd.f32 %v6979_v43, %v1184_v53  ;;  %v1187_v17 = vadd.f32 %v6918_v54, %v9133_v22 }
 0x165   :  { %v9163_v24 = vadd.f32 %v6982_v62, %v1187_v17  ;;  %v6919_v26 = vpop.f32.mrb[20].mxu0 }
 0x166   :  { %v6983_v27 = vpop.f32.mrb[20].mxu1  ;;  %v6920_v32 = vpop.f32.mrb[21].mxu0 }
 0x167   :  { %v6921_v30 = vadd.f32 %v6920_v32, %v6919_v26  ;;  %v6984_v46 = vpop.f32.mrb[21].mxu1  ;;  %v6922_v48 = vpop.f32.mrb[22].mxu0 }
 0x168   :  { %v6985_v50 = vadd.f32 %v6984_v46, %v6983_v27  ;;  %v6986_v4 = vpop.f32.mrb[22].mxu1  ;;  %v6923_v15 = vpop.f32.mrb[23].mxu0 }
 0x169   :  { %v1192_v18 = vadd.f32 %v6921_v30, %v9133_v22  ;;  %v6924_v6 = vadd.f32 %v6923_v15, %v6922_v48  ;;  %v6987_v58 = vpop.f32.mrb[23].mxu1 }
 0x16a   :  { %v6988_v34 = vadd.f32 %v6987_v58, %v6986_v4 }
 0x16b   :  { %v9166_v52 = vadd.f32 %v6985_v50, %v1192_v18  ;;  %v1195_v8 = vadd.f32 %v6924_v6, %v9133_v22 }
 0x16d   :  { %v9169_v39 = vadd.f32 %v6988_v34, %v1195_v8  ;;  %v6925_v0 = vpop.f32.mrb[24].mxu0 }
 0x16e   :  { %v6989_v63 = vpop.f32.mrb[24].mxu1  ;;  %v6926_v36 = vpop.f32.mrb[25].mxu0 }
 0x16f   :  { %v6927_v11 = vadd.f32 %v6926_v36, %v6925_v0  ;;  %v6990_v1 = vpop.f32.mrb[25].mxu1  ;;  %v6928_v20 = vpop.f32.mrb[26].mxu0 }
 0x170   :  { %v6991_v44 = vadd.f32 %v6990_v1, %v6989_v63  ;;  %v6992_v33 = vpop.f32.mrb[26].mxu1  ;;  %v6929_v49 = vpop.f32.mrb[27].mxu0 }
 0x171   :  { %v1200_v41 = vadd.f32 %v6927_v11, %v9133_v22  ;;  %v6930_v42 = vadd.f32 %v6929_v49, %v6928_v20  ;;  %v6993_v57 = vpop.f32.mrb[27].mxu1 }
 0x172   :  { %v6994_v61 = vadd.f32 %v6993_v57, %v6992_v33 }
 0x173   :  { %v9172_v59 = vadd.f32 %v6991_v44, %v1200_v41  ;;  %v1203_v60 = vadd.f32 %v6930_v42, %v9133_v22 }
 0x175   :  { %v9175_v3 = vadd.f32 %v6994_v61, %v1203_v60  ;;  %v6931_v5 = vpop.f32.mrb[28].mxu0 }
 0x176   :  { %v6995_v7 = vpop.f32.mrb[28].mxu1  ;;  %v6932_v12 = vpop.f32.mrb[29].mxu0 }
 0x177   :  { %v6933_v13 = vadd.f32 %v6932_v12, %v6931_v5  ;;  %v6996_v14 = vpop.f32.mrb[29].mxu1  ;;  %v6934_v19 = vpop.f32.mrb[30].mxu0 }
 0x178   :  { %v6997_v16 = vadd.f32 %v6996_v14, %v6995_v7  ;;  %v6998_v21 = vpop.f32.mrb[30].mxu1  ;;  %v6935_v23 = vpop.f32.mrb[31].mxu0 }
 0x179   :  { %v1208_v25 = vadd.f32 %v6933_v13, %v9133_v22  ;;  %v6936_v28 = vadd.f32 %v6935_v23, %v6934_v19  ;;  %v6999_v31 = vpop.f32.mrb[31].mxu1 }
 0x17a   :  { %v7000_v40 = vadd.f32 %v6999_v31, %v6998_v21 }
 0x17b   :  { %v9178_v43 = vadd.f32 %v6997_v16, %v1208_v25  ;;  %v1211_v47 = vadd.f32 %v6936_v28, %v9133_v22 }
 0x17d   :  { %v9181_v37 = vadd.f32 %v7000_v40, %v1211_v47  ;;  %v7017_v53 = vpop.f32.mrb[32].mxu0 }
 0x17e   :  { %v7081_v54 = vpop.f32.mrb[32].mxu1  ;;  %v7018_v38 = vpop.f32.mrb[33].mxu0 }
 0x17f   :  { %v7019_v62 = vadd.f32 %v7018_v38, %v7017_v53  ;;  %v7082_v17 = vpop.f32.mrb[33].mxu1  ;;  %v7020_v26 = vpop.f32.mrb[34].mxu0 }
 0x180   :  { %v7083_v27 = vadd.f32 %v7082_v17, %v7081_v54  ;;  %v7084_v32 = vpop.f32.mrb[34].mxu1  ;;  %v7021_v30 = vpop.f32.mrb[35].mxu0 }
 0x181   :  { %v1346_v46 = vadd.f32 %v7019_v62, %v9136_v56  ;;  %v7022_v48 = vadd.f32 %v7021_v30, %v7020_v26  ;;  %v7085_v50 = vpop.f32.mrb[35].mxu1 }
 0x182   :  { %v7086_v4 = vadd.f32 %v7085_v50, %v7084_v32 }
 0x183   :  { %v1349_v15 = vadd.f32 %v7022_v48, %v9139_v2  ;;  %v9185_v18 = vadd.f32 %v7083_v27, %v1346_v46 }
 0x185   :  { %v7023_v22 = vpop.f32.mrb[36].mxu0  ;;  %v9187_v6 = vadd.f32 %v7086_v4, %v1349_v15 }
 0x186   :  { %v7087_v58 = vpop.f32.mrb[36].mxu1  ;;  %v7024_v34 = vpop.f32.mrb[37].mxu0 }
 0x187   :  { %v7025_v8 = vadd.f32 %v7024_v34, %v7023_v22  ;;  %v7088_v0 = vpop.f32.mrb[37].mxu1  ;;  %v7026_v63 = vpop.f32.mrb[38].mxu0 }
 0x188   :  { %v7089_v36 = vadd.f32 %v7088_v0, %v7087_v58  ;;  %v7090_v11 = vpop.f32.mrb[38].mxu1  ;;  %v7027_v1 = vpop.f32.mrb[39].mxu0 }
 0x189   :  { %v1354_v56 = vadd.f32 %v7025_v8, %v9142_v29  ;;  %v7028_v20 = vadd.f32 %v7027_v1, %v7026_v63  ;;  %v7091_v44 = vpop.f32.mrb[39].mxu1 }
 0x18a   :  { %v7092_v33 = vadd.f32 %v7091_v44, %v7090_v11 }
 0x18b   :  { %v1357_v2 = vadd.f32 %v7028_v20, %v9145_v51  ;;  %v9191_v49 = vadd.f32 %v7089_v36, %v1354_v56 }
 0x18d   :  { %v7029_v41 = vpop.f32.mrb[40].mxu0  ;;  %v9193_v42 = vadd.f32 %v7092_v33, %v1357_v2 }
 0x18e   :  { %v7093_v57 = vpop.f32.mrb[40].mxu1  ;;  %v7030_v61 = vpop.f32.mrb[41].mxu0 }
 0x18f   :  { %v7031_v60 = vadd.f32 %v7030_v61, %v7029_v41  ;;  %v7094_v5 = vpop.f32.mrb[41].mxu1  ;;  %v7032_v7 = vpop.f32.mrb[42].mxu0 }
 0x190   :  { %v7095_v12 = vadd.f32 %v7094_v5, %v7093_v57  ;;  %v7096_v13 = vpop.f32.mrb[42].mxu1  ;;  %v7033_v14 = vpop.f32.mrb[43].mxu0 }
 0x191   :  { %v1362_v29 = vadd.f32 %v7031_v60, %v9148_v35  ;;  %v7034_v19 = vadd.f32 %v7033_v14, %v7032_v7  ;;  %v7097_v16 = vpop.f32.mrb[43].mxu1 }
 0x192   :  { %v7098_v21 = vadd.f32 %v7097_v16, %v7096_v13 }
 0x193   :  { %v1365_v51 = vadd.f32 %v7034_v19, %v9151_v55  ;;  %v9197_v23 = vadd.f32 %v7095_v12, %v1362_v29 }
 0x195   :  { %v7035_v25 = vpop.f32.mrb[44].mxu0  ;;  %v9199_v28 = vadd.f32 %v7098_v21, %v1365_v51 }
 0x196   :  { %v7099_v31 = vpop.f32.mrb[44].mxu1  ;;  %v7036_v40 = vpop.f32.mrb[45].mxu0 }
 0x197   :  { %v7037_v47 = vadd.f32 %v7036_v40, %v7035_v25  ;;  %v7100_v53 = vpop.f32.mrb[45].mxu1  ;;  %v7038_v54 = vpop.f32.mrb[46].mxu0 }
 0x198   :  { %v7101_v38 = vadd.f32 %v7100_v53, %v7099_v31  ;;  %v7102_v62 = vpop.f32.mrb[46].mxu1  ;;  %v7039_v17 = vpop.f32.mrb[47].mxu0 }
 0x199   :  { %v1370_v35 = vadd.f32 %v7037_v47, %v9154_v45  ;;  %v7040_v26 = vadd.f32 %v7039_v17, %v7038_v54  ;;  %v7103_v27 = vpop.f32.mrb[47].mxu1 }
 0x19a   :  { %v7104_v32 = vadd.f32 %v7103_v27, %v7102_v62 }
 0x19b   :  { %v1373_v55 = vadd.f32 %v7040_v26, %v9157_v9  ;;  %v9203_v30 = vadd.f32 %v7101_v38, %v1370_v35 }
 0x19d   :  { %v7041_v46 = vpop.f32.mrb[48].mxu0  ;;  %v9205_v48 = vadd.f32 %v7104_v32, %v1373_v55 }
 0x19e   :  { %v7105_v50 = vpop.f32.mrb[48].mxu1  ;;  %v7042_v4 = vpop.f32.mrb[49].mxu0 }
 0x19f   :  { %v7043_v15 = vadd.f32 %v7042_v4, %v7041_v46  ;;  %v7106_v22 = vpop.f32.mrb[49].mxu1  ;;  %v7044_v58 = vpop.f32.mrb[50].mxu0 }
 0x1a0   :  { %v7107_v34 = vadd.f32 %v7106_v22, %v7105_v50  ;;  %v7108_v8 = vpop.f32.mrb[50].mxu1  ;;  %v7045_v0 = vpop.f32.mrb[51].mxu0 }
 0x1a1   :  { %v1378_v45 = vadd.f32 %v7043_v15, %v9160_v10  ;;  %v7046_v63 = vadd.f32 %v7045_v0, %v7044_v58  ;;  %v7109_v36 = vpop.f32.mrb[51].mxu1 }
 0x1a2   :  { %v7110_v11 = vadd.f32 %v7109_v36, %v7108_v8 }
 0x1a3   :  { %v1381_v9 = vadd.f32 %v7046_v63, %v9163_v24  ;;  %v1475_v1 = vadd.f32 %v7107_v34, %v1378_v45 }
 0x1a5   :  { %v7047_v56 = vpop.f32.mrb[52].mxu0  ;;  %v9209_v20 = vadd.f32 %v7110_v11, %v1381_v9 }
 0x1a6   :  { %v7111_v44 = vpop.f32.mrb[52].mxu1  ;;  %v7048_v33 = vpop.f32.mrb[53].mxu0 }
 0x1a7   :  { %v7049_v2 = vadd.f32 %v7048_v33, %v7047_v56  ;;  %v7112_v41 = vpop.f32.mrb[53].mxu1  ;;  %v7050_v57 = vpop.f32.mrb[54].mxu0 }
 0x1a8   :  { %v7113_v61 = vadd.f32 %v7112_v41, %v7111_v44  ;;  %v7114_v60 = vpop.f32.mrb[54].mxu1  ;;  %v7051_v5 = vpop.f32.mrb[55].mxu0 }
 0x1a9   :  { %v1386_v7 = vadd.f32 %v7049_v2, %v9166_v52  ;;  %v7052_v10 = vadd.f32 %v7051_v5, %v7050_v57  ;;  %v7115_v12 = vpop.f32.mrb[55].mxu1 }
 0x1aa   :  { %v7116_v13 = vadd.f32 %v7115_v12, %v7114_v60 }
 0x1ab   :  { %v1389_v14 = vadd.f32 %v7052_v10, %v9169_v39  ;;  %v1483_v24 = vadd.f32 %v7113_v61, %v1386_v7 }
 0x1ad   :  { %v7053_v29 = vpop.f32.mrb[56].mxu0  ;;  %v1486_v19 = vadd.f32 %v7116_v13, %v1389_v14 }
 0x1ae   :  { %v7117_v16 = vpop.f32.mrb[56].mxu1  ;;  %v7054_v21 = vpop.f32.mrb[57].mxu0 }
 0x1af   :  { %v7055_v51 = vadd.f32 %v7054_v21, %v7053_v29  ;;  %v7118_v25 = vpop.f32.mrb[57].mxu1  ;;  %v7056_v31 = vpop.f32.mrb[58].mxu0 }
 0x1b0   :  { %v7119_v40 = vadd.f32 %v7118_v25, %v7117_v16  ;;  %v7120_v47 = vpop.f32.mrb[58].mxu1  ;;  %v7057_v53 = vpop.f32.mrb[59].mxu0 }
 0x1b1   :  { %v1394_v54 = vadd.f32 %v7055_v51, %v9172_v59  ;;  %v7058_v38 = vadd.f32 %v7057_v53, %v7056_v31  ;;  %v7121_v52 = vpop.f32.mrb[59].mxu1 }
 0x1b2   :  { %v7122_v62 = vadd.f32 %v7121_v52, %v7120_v47 }
 0x1b3   :  { %v1397_v17 = vadd.f32 %v7058_v38, %v9175_v3  ;;  %v1491_v35 = vadd.f32 %v7119_v40, %v1394_v54 }
 0x1b5   :  { %v7059_v39 = vpop.f32.mrb[60].mxu0  ;;  %v9215_v26 = vadd.f32 %v7122_v62, %v1397_v17 }
 0x1b6   :  { %v7123_v27 = vpop.f32.mrb[60].mxu1  ;;  %v7060_v32 = vpop.f32.mrb[61].mxu0 }
 0x1b7   :  { %v7061_v55 = vadd.f32 %v7060_v32, %v7059_v39  ;;  %v7124_v46 = vpop.f32.mrb[61].mxu1  ;;  %v7062_v50 = vpop.f32.mrb[62].mxu0 }
 0x1b8   :  { %v7125_v4 = vadd.f32 %v7124_v46, %v7123_v27  ;;  %v7126_v15 = vpop.f32.mrb[62].mxu1  ;;  %v7063_v22 = vpop.f32.mrb[63].mxu0 }
 0x1b9   :  { %v1402_v58 = vadd.f32 %v7061_v55, %v9178_v43  ;;  %v7064_v59 = vadd.f32 %v7063_v22, %v7062_v50  ;;  %v7127_v34 = vpop.f32.mrb[63].mxu1 }
 0x1ba   :  { %v7128_v8 = vadd.f32 %v7127_v34, %v7126_v15 }
 0x1bb   :  { %v1405_v0 = vadd.f32 %v7064_v59, %v9181_v37  ;;  %v1499_v3 = vadd.f32 %v7125_v4, %v1402_v58 }
 0x1bd   :  { %v7979_v45 = vpop.f32.mrb[64].mxu0  ;;  %v1502_v63 = vadd.f32 %v7128_v8, %v1405_v0 }
 0x1be   :  { %v1548_v36 = vadd.f32 %v7979_v45, %v9191_v49  ;;  %v7987_v11 = vpop.f32.mrb[64].mxu1  ;;  %v1539_v9 = vpop.f32.mrb[65].mxu0 }
 0x1bf   :  { %v1580_v56 = vadd.f32 %v7987_v11, %v1483_v24  ;;  %v1540_v44 = vadd.f32 %v1539_v9, %v9185_v18  ;;  %v1571_v33 = vpop.f32.mrb[65].mxu1  ;;  %v7980_v2 = vpop.f32.mrb[66].mxu0 }
 0x1c0   :  { %v1604_v41 = vmax.f32 %v1548_v36, 0.0  ;;  %v1572_v57 = vadd.f32 %v1571_v33, %v1475_v1  ;;  %v1551_v43 = vadd.f32 %v7980_v2, %v9193_v42  ;;  %v7988_v61 = vpop.f32.mrb[66].mxu1  ;;  %v1542_v60 = vpop.f32.mrb[67].mxu0 }
 0x1c1   :  { %v1612_v5 = vmax.f32 %v1580_v56, 0.0  ;;  %v1602_v37 = vmax.f32 %v1540_v44, 0.0  ;;  %v1583_v7 = vadd.f32 %v7988_v61, %v1486_v19  ;;  %v1543_v10 = vadd.f32 %v1542_v60, %v9187_v6  ;;  %v1574_v12 = vpop.f32.mrb[67].mxu1 }
 0x1c2   :  { %1620 = vst [vmem:[#allocation2 + $0x31] sm:$0xff] %v1604_v41  ;;  %v1610_v49 = vmax.f32 %v1572_v57, 0.0  ;;  %v1605_v13 = vmax.f32 %v1551_v43, 0.0  ;;  %v1575_v14 = vadd.f32 %v1574_v12, %v9209_v20 }
 0x1c3   :  { %1628 = vst [vmem:[#allocation2 + $0xd1] sm:$0xff] %v1612_v5  ;;  %1618 = vst [vmem:[#allocation2 + $0x11] sm:$0xff] %v1602_v37  ;;  %v1613_v18 = vmax.f32 %v1583_v7, 0.0  ;;  %v1603_v24 = vmax.f32 %v1543_v10, 0.0 }
 0x1c4   :  { %1626 = vst [vmem:[#allocation2 + $0xb1] sm:$0xff] %v1610_v49  ;;  %1621 = vst [vmem:[#allocation2 + $0x41] sm:$0xff] %v1605_v13  ;;  %v1611_v42 = vmax.f32 %v1575_v14, 0.0 }
 0x1c5   :  { %1629 = vst [vmem:[#allocation2 + $0xe1] sm:$0xff] %v1613_v18  ;;  %1619 = vst [vmem:[#allocation2 + $0x21] sm:$0xff] %v1603_v24  ;;  %v7983_v1 = vpop.f32.mrb[68].mxu0 }
 0x1c6   :  { %1627 = vst [vmem:[#allocation2 + $0xc1] sm:$0xff] %v1611_v42  ;;  %v1564_v29 = vadd.f32 %v7983_v1, %v9203_v30  ;;  %v7991_v6 = vpop.f32.mrb[68].mxu1  ;;  %v1555_v19 = vpop.f32.mrb[69].mxu0 }
 0x1c7   :  { %v1596_v16 = vadd.f32 %v7991_v6, %v1499_v3  ;;  %v1556_v21 = vadd.f32 %v1555_v19, %v9197_v23  ;;  %v1587_v51 = vpop.f32.mrb[69].mxu1  ;;  %v7984_v20 = vpop.f32.mrb[70].mxu0 }
 0x1c8   :  { %v1608_v25 = vmax.f32 %v1564_v29, 0.0  ;;  %v1588_v31 = vadd.f32 %v1587_v51, %v1491_v35  ;;  %v1567_v40 = vadd.f32 %v7984_v20, %v9205_v48  ;;  %v7992_v47 = vpop.f32.mrb[70].mxu1  ;;  %v1558_v53 = vpop.f32.mrb[71].mxu0 }
 0x1c9   :  { %v1616_v54 = vmax.f32 %v1596_v16, 0.0  ;;  %v1606_v38 = vmax.f32 %v1556_v21, 0.0  ;;  %v1599_v52 = vadd.f32 %v7992_v47, %v1502_v63  ;;  %v1559_v62 = vadd.f32 %v1558_v53, %v9199_v28  ;;  %v1590_v17 = vpop.f32.mrb[71].mxu1 }
 0x1ca   :  { %1624 = vst [vmem:[#allocation2 + $0x71] sm:$0xff] %v1608_v25  ;;  %v1614_v30 = vmax.f32 %v1588_v31, 0.0  ;;  %v1609_v39 = vmax.f32 %v1567_v40, 0.0  ;;  %v1591_v27 = vadd.f32 %v1590_v17, %v9215_v26 }
 0x1cb   :  { %1632 = vst [vmem:[#allocation2 + $0x111] sm:$0xff] %v1616_v54  ;;  %1622 = vst [vmem:[#allocation2 + $0x51] sm:$0xff] %v1606_v38  ;;  %v1617_v23 = vmax.f32 %v1599_v52, 0.0  ;;  %v1607_v32 = vmax.f32 %v1559_v62, 0.0 }
 0x1cc   :  { %1630 = vst [vmem:[#allocation2 + $0xf1] sm:$0xff] %v1614_v30  ;;  %1625 = vst [vmem:[#allocation2 + $0x81] sm:$0xff] %v1609_v39  ;;  %v1615_v48 = vmax.f32 %v1591_v27, 0.0 }
 0x1cd   :  { %1633 = vst [vmem:[#allocation2 + $0x121] sm:$0xff] %v1617_v23  ;;  %1623 = vst [vmem:[#allocation2 + $0x61] sm:$0xff] %v1607_v32 }
 0x1ce   :  { %1631 = vst [vmem:[#allocation2 + $0x101] sm:$0xff] %v1615_v48 }
 0x1cf LB: > { %v1837_v28 = vld [vmem:[#allocation2 + $0x1] sm:$0xff]  ;;  %v9234_v35 = vld [vmem:[#allocation2 + $0x11] sm:$0xff]  ;;  %s6871_s3 = smul.u32 576, %s8592_s2  ;;  %s1803_s23 = scalar_lea.vmem %s11184_s4, %s8592_s2  ;;  %s8592_s2 = sphi %s9229_s2, %s1639_s2  }
 0x1d0   : > { %v1853_v26 = vpack.c.bf16 %v9234_v35, %v1837_v28  ;;  %v9237_v55 = vld [vmem:[#allocation2 + $0x10] sm:$0xff]  ;;  %v9239_v46 = vld [vmem:[#allocation2 + $0x20] sm:$0xff]  ;;  %s3088_s18 = scalar_lea.vmem %s11185_s5, %s8592_s2  ;;  %s3090_s21 = scalar_lea.vmem %s11186_s6, %s8592_s2 }
 0x1d1   : > { %v1917_v50 = vpack.c.bf16 %v9239_v46, %v9237_v55  ;;  %s9246_s26 = scalar_lea.vmem [#allocation6], %s6871_s3  ;;  %v1805_v10 = vld [vmem:[#allocation2] sm:$0xff]  ;;  %v9277_v13 = vld [vmem:[#allocation2 + $0x31] sm:$0xff]  ;;  %s9577_s24 = scalar_lea.vmem [#allocation8], %s6871_s3 }
 0x1d2   : > { %2635 = vmatprep.mubr.bf16.mxu0 %v1853_v26  ;;  %v8208_v4 = vld [vmem:[%s9246_s26 + $0x40] sm:$0xff]   ;;  %v8212_v59 = vld [vmem:[%s9246_s26 + $0x48] sm:$0xff]   ;;  %v8216_v3 = vld [vmem:[%s9246_s26 + $0x50] sm:$0xff]   ;;  %v1821_v16 = vpack.c.bf16 %v9237_v55, %v1805_v10  ;;  %s3505_s29 = scalar_lea.vmem %s11188_s8, %s8592_s2  ;;  %s4790_s1 = scalar_lea.vmem %s11189_s9, %s8592_s2 }
 0x1d3   : > { %2732 = vmatprep.mubr.bf16.mxu1 %v1917_v50  ;;  %v8209_v15 = vld [vmem:[%s9246_s26] sm:$0xff]   ;;  %7145 = vmatprep.subr.bf16.mxu0 %v8208_v4  ;;  %v8213_v34 = vld [vmem:[%s9246_s26 + $0x8] sm:$0xff]   ;;  %v8217_v45 = vld [vmem:[%s9246_s26 + $0x10] sm:$0xff]   ;;  %s4792_s0 = scalar_lea.vmem %s11190_s10, %s8592_s2  ;;  %s1639_s2 = sadd.s32 1, %s8592_s2  }
 0x1d4   : > { %v8210_v22 = vld [vmem:[%s9246_s26 + $0xc0] sm:$0xff]   ;;  %7146 = vmatpush3.bf16.msra.mxu0 %v8209_v15  ;;  %v8214_v8 = vld [vmem:[%s9246_s26 + $0xc8] sm:$0xff]   ;;  %v8218_v63 = vld [vmem:[%s9246_s26 + $0xd0] sm:$0xff]   ;;  %p1636_p4 = scmp.ge.s32.totalorder %s1639_s2, 2  }
 0x1d5   : > { %v8211_v58 = vld [vmem:[%s9246_s26 + $0x80] sm:$0xff]   ;;  %7209 = vmatprep.subr.bf16.mxu1 %v8210_v22  ;;  %7147 = vmatprep.subr.bf16.mxu0 %v8212_v59  ;;  %v8215_v0 = vld [vmem:[%s9246_s26 + $0x88] sm:$0xff]   ;;  %v8219_v36 = vld [vmem:[%s9246_s26 + $0x90] sm:$0xff]  }
 0x1d6   : > { %7210 = vmatpush3.bf16.msra.mxu1 %v8211_v58  ;;  %v8220_v11 = vld [vmem:[%s9246_s26 + $0x58] sm:$0xff]   ;;  %v8224_v33 = vld [vmem:[%s9246_s26 + $0x60] sm:$0xff]   ;;  %v8228_v43 = vld [vmem:[%s9246_s26 + $0x68] sm:$0xff]  }
 0x1d7   : > { %7211 = vmatprep.subr.bf16.mxu1 %v8214_v8  ;;  %v8221_v9 = vld [vmem:[%s9246_s26 + $0x18] sm:$0xff]   ;;  %v8225_v2 = vld [vmem:[%s9246_s26 + $0x20] sm:$0xff]   ;;  %v8229_v61 = vld [vmem:[%s9246_s26 + $0x28] sm:$0xff]  }
 0x1d8   : > { %7148 = vmatpush3.bf16.msra.mxu0 %v8213_v34  ;;  %v8222_v56 = vld [vmem:[%s9246_s26 + $0xd8] sm:$0xff]   ;;  %v8226_v41 = vld [vmem:[%s9246_s26 + $0xe0] sm:$0xff]   ;;  %v8230_v60 = vld [vmem:[%s9246_s26 + $0xe8] sm:$0xff]  }
 0x1d9   : > { %7149 = vmatprep.subr.bf16.mxu0 %v8216_v3  ;;  %v8223_v44 = vld [vmem:[%s9246_s26 + $0x98] sm:$0xff]   ;;  %v8227_v57 = vld [vmem:[%s9246_s26 + $0xa0] sm:$0xff]   ;;  %v8231_v5 = vld [vmem:[%s9246_s26 + $0xa8] sm:$0xff]  }
 0x1da   : > { %7212 = vmatpush3.bf16.msra.mxu1 %v8215_v0  ;;  %v8232_v37 = vld [vmem:[%s9246_s26 + $0x70] sm:$0xff]   ;;  %v9275_v49 = vld [vmem:[#allocation2 + $0x21] sm:$0xff]  ;;  %v8236_v42 = vld [vmem:[%s9246_s26 + $0x78] sm:$0xff]  }
 0x1db   : > { %7213 = vmatprep.subr.bf16.mxu1 %v8218_v63  ;;  %v8233_v7 = vld [vmem:[%s9246_s26 + $0x30] sm:$0xff]   ;;  %v1869_v18 = vld [vmem:[#allocation2 + $0x2] sm:$0xff]  ;;  %v8237_v6 = vld [vmem:[%s9246_s26 + $0x38] sm:$0xff]   ;;  %v9289_v51 = vpack.c.bf16 %v9277_v13, %v9275_v49 }
 0x1dc   : > { %7150 = vmatpush3.bf16.msra.mxu0 %v8217_v45  ;;  %v8234_v12 = vld [vmem:[%s9246_s26 + $0xf0] sm:$0xff]   ;;  %v1904_v29 = vld [vmem:[#allocation2 + $0x40] sm:$0xff]  ;;  %v8238_v19 = vld [vmem:[%s9246_s26 + $0xf8] sm:$0xff]  }
 0x1dd   : > { %7151 = vmatprep.subr.bf16.mxu0 %v8220_v11  ;;  %v8235_v14 = vld [vmem:[%s9246_s26 + $0xb0] sm:$0xff]   ;;  %v8239_v21 = vld [vmem:[%s9246_s26 + $0xb8] sm:$0xff]   ;;  %v8240_v20 = vld [vmem:[%s9246_s26 + $0x140] sm:$0xff]  }
 0x1de   : > { %7214 = vmatpush3.bf16.msra.mxu1 %v8219_v36  ;;  %v9280_v24 = vld [vmem:[#allocation2 + $0x12] sm:$0xff]  ;;  %v8241_v31 = vld [vmem:[%s9246_s26 + $0x100] sm:$0xff]   ;;  %v8242_v47 = vld [vmem:[%s9246_s26 + $0x148] sm:$0xff]  }
 0x1df   : > { %7215 = vmatprep.subr.bf16.mxu1 %v8222_v56  ;;  %v1808_v1 = vld [vmem:[#allocation2 + $0x30] sm:$0xff]  ;;  %v1885_v25 = vpack.c.bf16 %v9280_v24, %v1869_v18  ;;  %v9295_v53 = vld [vmem:[#allocation2 + $0x41] sm:$0xff]  ;;  %v8246_v26 = vld [vmem:[%s9246_s26 + $0x158] sm:$0xff]  }
 0x1e0   : > { %7152 = vmatpush3.bf16.msra.mxu0 %v8221_v9  ;;  %v1918_v40 = vpack.c.bf16 %v1904_v29, %v1808_v1  ;;  %v8243_v54 = vld [vmem:[%s9246_s26 + $0x108] sm:$0xff]   ;;  %v9301_v52 = vld [vmem:[#allocation2 + $0x51] sm:$0xff]  ;;  %v9307_v30 = vpack.c.bf16 %v1808_v1, %v9239_v46  ;;  %v1906_v27 = vld [vmem:[#allocation2 + $0x60] sm:$0xff] }
 0x1e1   : > { %7153 = vmatprep.subr.bf16.mxu0 %v8224_v33  ;;  %v9299_v38 = vld [vmem:[#allocation2 + $0x22] sm:$0xff]  ;;  %v9303_v62 = vld [vmem:[#allocation2 + $0x32] sm:$0xff]  ;;  %v9311_v23 = vpack.c.bf16 %v9301_v52, %v9295_v53 }
 0x1e2   : > { %7216 = vmatpush3.bf16.msra.mxu1 %v8223_v44  ;;  %v8244_v17 = vld [vmem:[%s9246_s26 + $0x150] sm:$0xff]   ;;  %v9316_v48 = vpack.c.bf16 %v9303_v62, %v9299_v38  ;;  %v9321_v55 = vld [vmem:[#allocation2 + $0x42] sm:$0xff]  ;;  %v8247_v4 = vld [vmem:[%s9246_s26 + $0x118] sm:$0xff]  }
 0x1e3   : > { %7217 = vmatprep.subr.bf16.mxu1 %v8226_v41  ;;  %v1810_v39 = vld [vmem:[#allocation2 + $0x50] sm:$0xff]  ;;  %v9325_v50 = vld [vmem:[#allocation2 + $0x61] sm:$0xff] }
 0x1e4   : > { %7154 = vmatpush3.bf16.msra.mxu0 %v8225_v2  ;;  %v8245_v32 = vld [vmem:[%s9246_s26 + $0x110] sm:$0xff]   ;;  %v1919_v28 = vpack.c.bf16 %v1906_v27, %v1810_v39  ;;  %v8248_v58 = vld [vmem:[%s9246_s26 + $0x160] sm:$0xff]   ;;  %v9332_v59 = vpack.c.bf16 %v1810_v39, %v1904_v29  ;;  %v8252_v9 = vld [vmem:[%s9246_s26 + $0x1c8] sm:$0xff]  }
 0x1e5   : > { %7155 = vmatprep.subr.bf16.mxu0 %v8228_v43  ;;  %v9323_v46 = vld [vmem:[#allocation2 + $0x52] sm:$0xff]  ;;  %v9334_v34 = vld [vmem:[#allocation2 + $0x80] sm:$0xff]  ;;  %v8253_v41 = vld [vmem:[%s9246_s26 + $0x188] sm:$0xff]  }
 0x1e6   : > { %7218 = vmatpush3.bf16.msra.mxu1 %v8227_v57  ;;  %v9329_v15 = vld [vmem:[#allocation2 + $0x71] sm:$0xff]  ;;  %v8249_v8 = vld [vmem:[%s9246_s26 + $0x1c0] sm:$0xff]   ;;  %v9344_v45 = vpack.c.bf16 %v9323_v46, %v9321_v55  ;;  %v8254_v43 = vld [vmem:[%s9246_s26 + $0x168] sm:$0xff]  }
 0x1e7   : > { %7219 = vmatprep.subr.bf16.mxu1 %v8230_v60  ;;  %v1812_v22 = vld [vmem:[#allocation2 + $0x70] sm:$0xff]  ;;  %v9339_v0 = vpack.c.bf16 %v9329_v15, %v9325_v50  ;;  %v8250_v3 = vld [vmem:[%s9246_s26 + $0x120] sm:$0xff]   ;;  %v8255_v60 = vld [vmem:[%s9246_s26 + $0x128] sm:$0xff]  }
 0x1e8   : > { %7156 = vmatpush3.bf16.msra.mxu0 %v8229_v61  ;;  %v8251_v63 = vld [vmem:[%s9246_s26 + $0x180] sm:$0xff]   ;;  %v1920_v36 = vpack.c.bf16 %v9334_v34, %v1812_v22  ;;  %v9353_v44 = vld [vmem:[#allocation2 + $0x72] sm:$0xff]  ;;  %v9360_v61 = vpack.c.bf16 %v1812_v22, %v1906_v27 }
 0x1e9   : > { %7157 = vmatprep.subr.bf16.mxu0 %v8232_v37  ;;  %v1845_v11 = vld [vmem:[#allocation2 + $0xa1] sm:$0xff]  ;;  %v9355_v33 = vld [vmem:[#allocation2 + $0xb1] sm:$0xff] }
 0x1ea   : > { %7220 = vmatpush3.bf16.msra.mxu1 %v8231_v5  ;;  %v9351_v56 = vld [vmem:[#allocation2 + $0x62] sm:$0xff]  ;;  %v1814_v2 = vld [vmem:[#allocation2 + $0xb0] sm:$0xff]  ;;  %v1857_v5 = vpack.c.bf16 %v9355_v33, %v1845_v11 }
 0x1eb   : > { %7221 = vmatprep.subr.bf16.mxu1 %v8234_v12  ;;  %v1910_v57 = vld [vmem:[#allocation2 + $0xc0] sm:$0xff]  ;;  %v9366_v37 = vpack.c.bf16 %v9353_v44, %v9351_v56  ;;  %v9374_v29 = vld [vmem:[#allocation2 + $0xb2] sm:$0xff] }
 0x1ec   : > { %7158 = vmatpush3.bf16.msra.mxu0 %v8233_v7  ;;  %v8256_v7 = vld [vmem:[%s9246_s26 + $0x1d0] sm:$0xff]   ;;  %v1813_v10 = vld [vmem:[#allocation2 + $0xa0] sm:$0xff]  ;;  %v1921_v12 = vpack.c.bf16 %v1910_v57, %v1814_v2 }
 0x1ed   : > { %7159 = vmatprep.subr.bf16.mxu0 %v8236_v42  ;;  %v9371_v18 = vld [vmem:[#allocation2 + $0xc1] sm:$0xff]  ;;  %v8258_v42 = vld [vmem:[%s9246_s26 + $0x1d8] sm:$0xff]   ;;  %v1818_v22 = vld [vmem:[#allocation2 + $0xf0] sm:$0xff] }
 0x1ee   : > { %7222 = vmatpush3.bf16.msra.mxu1 %v8235_v14  ;;  %v8257_v14 = vld [vmem:[%s9246_s26 + $0x190] sm:$0xff]   ;;  %v1877_v1 = vld [vmem:[#allocation2 + $0xa2] sm:$0xff] }
 0x1ef   : > { %7223 = vmatprep.subr.bf16.mxu1 %v8238_v19  ;;  %v1816_v19 = vld [vmem:[#allocation2 + $0xd0] sm:$0xff]  ;;  %v8263_v39 = vld [vmem:[%s9246_s26 + $0x1a0] sm:$0xff]  }
 0x1f0   : > { %7160 = vmatpush3.bf16.msra.mxu0 %v8237_v6  ;;  %v9376_v6 = vld [vmem:[#allocation2 + $0xd1] sm:$0xff]  ;;  %v9389_v27 = vld [vmem:[#allocation2 + $0xe1] sm:$0xff] }
 0x1f1   : > { %7273 = vmatprep.subr.bf16.mxu0 %v8240_v20  ;;  %v8260_v20 = vld [vmem:[%s9246_s26 + $0x170] sm:$0xff]  }
 0x1f2   : > { %7224 = vmatpush3.bf16.msra.mxu1 %v8239_v21  ;;  %v1912_v21 = vld [vmem:[#allocation2 + $0xe0] sm:$0xff] }
 0x1f3   : > { %2636 = vmatmul.mubr.bf16.vlgmr.msra.gmra.mrb[0].mxu0 %v1821_v16  ;;  %7337 = vmatprep.subr.bf16.mxu1 %v8249_v8  ;;  %v8259_v16 = vld [vmem:[%s9246_s26 + $0x198] sm:$0xff]   ;;  %v1914_v8 = vld [vmem:[#allocation2 + $0x100] sm:$0xff] }
 0x1f4   : > { %7274 = vmatpush3.bf16.msra.mxu0 %v8241_v31  ;;  %2643 = vmatprep.mubr.bf16.mxu0 %v9289_v51  ;;  %v8261_v31 = vld [vmem:[%s9246_s26 + $0x130] sm:$0xff]  }
 0x1f5   : > { %2733 = vmatmul.mubr.bf16.vlgmr.msra.gmra.mrb[0].mxu1 %v1885_v25  ;;  %7275 = vmatprep.subr.bf16.mxu0 %v8242_v47  ;;  %v1825_v25 = vpack.c.bf16 %v1814_v2, %v1813_v10  ;;  %v1889_v47 = vpack.c.bf16 %v9374_v29, %v1877_v1  ;;  %v8268_v2 = vld [vmem:[%s9246_s26 + $0x1f0] sm:$0xff]   ;;  %v8271_v10 = vld [vmem:[%s9246_s26 + $0x1b8] sm:$0xff]  }
 0x1f6   : > { %2740 = vmatprep.mubr.bf16.mxu1 %v1918_v40  ;;  %7338 = vmatpush3.bf16.msra.mxu1 %v8251_v63  ;;  %v9384_v40 = vpack.c.bf16 %v9376_v6, %v9371_v18  ;;  %v9401_v63 = vpack.c.bf16 %v1816_v19, %v1910_v57  ;;  %v9415_v57 = vld [vmem:[#allocation2 + $0x101] sm:$0xff]  ;;  %v1820_v1 = vld [vmem:[#allocation2 + $0x110] sm:$0xff] }
 0x1f7   : > { %7339 = vmatprep.subr.bf16.mxu1 %v8252_v9 }
 0x1f8   : > { %7276 = vmatpush3.bf16.msra.mxu0 %v8243_v54  ;;  %v8262_v54 = vld [vmem:[%s9246_s26 + $0x1e0] sm:$0xff]  }
 0x1f9   : > { %7277 = vmatprep.subr.bf16.mxu0 %v8244_v17  ;;  %v1922_v17 = vpack.c.bf16 %v1912_v21, %v1816_v19  ;;  %v9430_v19 = vld [vmem:[#allocation2 + $0x120] sm:$0xff] }
 0x1fa   : > { %7340 = vmatpush3.bf16.msra.mxu1 %v8253_v41  ;;  %v1923_v41 = vpack.c.bf16 %v1914_v8, %v1818_v22 }
 0x1fb   : > { %2644 = vmatmul.mubr.bf16.gmra.mrb[4].mxu0 %v9307_v30  ;;  %7341 = vmatprep.subr.bf16.mxu1 %v8256_v7  ;;  %v9421_v7 = vld [vmem:[#allocation2 + $0xe2] sm:$0xff] }
 0x1fc   : > { %2651 = vmatprep.mubr.bf16.mxu0 %v9311_v23  ;;  %7278 = vmatpush3.bf16.msra.mxu0 %v8245_v32  ;;  %v8264_v32 = vld [vmem:[%s9246_s26 + $0x1e8] sm:$0xff]  }
 0x1fd   : > { %2741 = vmatmul.mubr.bf16.gmra.mrb[4].mxu1 %v9316_v48  ;;  %7279 = vmatprep.subr.bf16.mxu0 %v8246_v26  ;;  %v9395_v26 = vld [vmem:[#allocation2 + $0xd2] sm:$0xff] }
 0x1fe   : > { %2748 = vmatprep.mubr.bf16.mxu1 %v1919_v28  ;;  %7342 = vmatpush3.bf16.msra.mxu1 %v8257_v14  ;;  %v9393_v28 = vld [vmem:[#allocation2 + $0xc2] sm:$0xff]  ;;  %v9426_v14 = vld [vmem:[#allocation2 + $0xf2] sm:$0xff] }
 0x1ff   : > { %7343 = vmatprep.subr.bf16.mxu1 %v8258_v42  ;;  %v9410_v9 = vpack.c.bf16 %v9395_v26, %v9393_v28  ;;  %v9428_v42 = vpack.c.bf16 %v1818_v22, %v1912_v21  ;;  %v9444_v21 = vld [vmem:[#allocation2 + $0x102] sm:$0xff] }
 0x200   : > { %7280 = vmatpush3.bf16.msra.mxu0 %v8247_v4  ;;  %v9397_v4 = vld [vmem:[#allocation2 + $0xf1] sm:$0xff]  ;;  %v8273_v22 = vld [vmem:[%s9246_s26 + $0x208] sm:$0xff]  }
 0x201   : > { %7281 = vmatprep.subr.bf16.mxu0 %v8248_v58  ;;  %v8265_v58 = vld [vmem:[%s9246_s26 + $0x1a8] sm:$0xff]   ;;  %v9406_v11 = vpack.c.bf16 %v9397_v4, %v9389_v27 }
 0x202   : > { %7344 = vmatpush3.bf16.msra.mxu1 %v8259_v16 }
 0x203   : > { %2652 = vmatmul.mubr.bf16.gmra.mrb[8].mxu0 %v9332_v59  ;;  %7345 = vmatprep.subr.bf16.mxu1 %v8262_v54  ;;  %v1981_v54 = vpack.c.bf16 %v9299_v38, %v9280_v24  ;;  %v8274_v24 = vld [vmem:[%s9246_s26 + $0x210] sm:$0xff]   ;;  %v9473_v38 = vld [vmem:[#allocation2 + $0x82] sm:$0xff] }
 0x204   : > { %2659 = vmatprep.mubr.bf16.mxu0 %v9339_v0  ;;  %7282 = vmatpush3.bf16.msra.mxu0 %v8250_v3  ;;  %v8266_v3 = vld [vmem:[%s9246_s26 + $0x178] sm:$0xff]  }
 0x205   : > { %2749 = vmatmul.mubr.bf16.gmra.mrb[8].mxu1 %v9344_v45  ;;  %7283 = vmatprep.subr.bf16.mxu0 %v8254_v43  ;;  %v8269_v43 = vld [vmem:[%s9246_s26 + $0x1b0] sm:$0xff]  }
 0x206   : > { %2756 = vmatprep.mubr.bf16.mxu1 %v1920_v36  ;;  %7346 = vmatpush3.bf16.msra.mxu1 %v8263_v39  ;;  %v8267_v36 = vld [vmem:[%s9246_s26 + $0x138] sm:$0xff]   ;;  %v1949_v39 = vpack.c.bf16 %v9275_v49, %v9234_v35  ;;  %v1983_v35 = vpack.c.bf16 %v9351_v56, %v9323_v46 }
 0x207   : > { %7347 = vmatprep.subr.bf16.mxu1 %v8264_v32  ;;  %v1982_v32 = vpack.c.bf16 %v9321_v55, %v9303_v62  ;;  %v8275_v49 = vld [vmem:[%s9246_s26 + $0x218] sm:$0xff]   ;;  %v8276_v62 = vld [vmem:[%s9246_s26 + $0x220] sm:$0xff]   ;;  %v8277_v55 = vld [vmem:[%s9246_s26 + $0x228] sm:$0xff]  }
 0x208   : > { %7284 = vmatpush3.bf16.msra.mxu0 %v8255_v60  ;;  %v9417_v60 = vld [vmem:[#allocation2 + $0x111] sm:$0xff] }
 0x209   : > { %7285 = vmatprep.subr.bf16.mxu0 %v8260_v20  ;;  %v9434_v16 = vpack.c.bf16 %v9417_v60, %v9415_v57  ;;  %v9438_v20 = vpack.c.bf16 %v9426_v14, %v9421_v7 }
 0x20a   : > { %7348 = vmatpush3.bf16.msra.mxu1 %v8265_v58 }
 0x20b   : > { %2660 = vmatmul.mubr.bf16.gmra.mrb[12].mxu0 %v9360_v61  ;;  %7349 = vmatprep.subr.bf16.mxu1 %v8268_v2 }
 0x20c   : > { %2667 = vmatprep.mubr.bf16.mxu0 %v1857_v5  ;;  %7286 = vmatpush3.bf16.msra.mxu0 %v8261_v31  ;;  %v8270_v5 = vld [vmem:[%s9246_s26 + $0x1f8] sm:$0xff]  }
 0x20d   : > { %2757 = vmatmul.mubr.bf16.gmra.mrb[12].mxu1 %v9366_v37  ;;  %7287 = vmatprep.subr.bf16.mxu0 %v8266_v3  ;;  %v9446_v31 = vld [vmem:[#allocation2 + $0x112] sm:$0xff] }
 0x20e   : > { %2764 = vmatprep.mubr.bf16.mxu1 %v1921_v12  ;;  %7350 = vmatpush3.bf16.msra.mxu1 %v8269_v43  ;;  %v8272_v12 = vld [vmem:[%s9246_s26 + $0x200] sm:$0xff]  }
 0x20f   : > { %7351 = vmatprep.subr.bf16.mxu1 %v8270_v5 }
 0x210   : > { %7288 = vmatpush3.bf16.msra.mxu0 %v8267_v36 }
 0x211   : > { %7993 = vmatprep.subr.bf16.mxu0 %v8272_v12 }
 0x212   : > { %7352 = vmatpush3.bf16.msra.mxu1 %v8271_v10 }
 0x213   : > { %2668 = vmatmul.mubr.bf16.gmra.mrb[16].mxu0 %v1825_v25  ;;  %v1924_v25 = vpack.c.bf16 %v9430_v19, %v1820_v1 }
 0x214   : > { %2675 = vmatprep.mubr.bf16.mxu0 %v9384_v40 }
 0x215   : > { %2765 = vmatmul.mubr.bf16.gmra.mrb[16].mxu1 %v1889_v47  ;;  %v9448_v47 = vpack.c.bf16 %v1820_v1, %v1914_v8 }
 0x216   : > { %2772 = vmatprep.mubr.bf16.mxu1 %v1922_v17  ;;  %v9454_v17 = vpack.c.bf16 %v9446_v31, %v9444_v21 }
 0x21b   : > { %2676 = vmatmul.mubr.bf16.gmra.mrb[20].mxu0 %v9401_v63 }
 0x21c   : > { %2683 = vmatprep.mubr.bf16.mxu0 %v9406_v11 }
 0x21d   : > { %2773 = vmatmul.mubr.bf16.gmra.mrb[20].mxu1 %v9410_v9 }
 0x21e   : > { %2780 = vmatprep.mubr.bf16.mxu1 %v1923_v41 }
 0x223   : > { %2684 = vmatmul.mubr.bf16.gmra.mrb[24].mxu0 %v9428_v42 }
 0x224   : > { %2691 = vmatprep.mubr.bf16.mxu0 %v9434_v16 }
 0x225   : > { %2781 = vmatmul.mubr.bf16.gmra.mrb[24].mxu1 %v9438_v20 }
 0x226   : > { %2788 = vmatprep.mubr.bf16.mxu1 %v1924_v25 }
 0x22b   : > { %2692 = vmatmul.mubr.bf16.gmra.mrb[28].mxu0 %v9448_v47 }
 0x22c   : > { %2829 = vmatprep.mubr.bf16.mxu0 %v1981_v54 }
 0x22d   : > { %2789 = vmatmul.mubr.bf16.gmra.mrb[28].mxu1 %v9454_v17 }
 0x22e   : > { %2926 = vmatprep.mubr.bf16.mxu1 %v9289_v51  ;;  %v1950_v51 = vpack.c.bf16 %v9295_v53, %v9277_v13  ;;  %v1951_v13 = vpack.c.bf16 %v9325_v50, %v9301_v52  ;;  %v1940_v53 = vld [vmem:[#allocation2 + $0x81] sm:$0xff]  ;;  %v1985_v50 = vpack.c.bf16 %v9393_v28, %v9374_v29  ;;  %v1987_v29 = vpack.c.bf16 %v9444_v21, %v9426_v14  ;;  %v2044_v28 = vld [vmem:[#allocation2 + $0x131] sm:$0xff] }
 0x22f   : > { %v1952_v52 = vpack.c.bf16 %v1940_v53, %v9329_v15  ;;  %v1986_v15 = vpack.c.bf16 %v9421_v7, %v9395_v26 }
 0x233   : > { %2830 = vmatmul.mubr.bf16.vlgmr.msra.gmra.mrb[32].mxu0 %v1949_v39 }
 0x234   : > { %7994 = vmatpush3.bf16.msra.mxu0 %v8272_v12  ;;  %2837 = vmatprep.mubr.bf16.mxu0 %v1982_v32 }
 0x235   : > { %2927 = vmatmul.mubr.bf16.vlgmr.msra.gmra.mrb[32].mxu1 %v9307_v30  ;;  %7995 = vmatprep.subr.bf16.mxu0 %v8273_v22  ;;  %v2036_v30 = vld [vmem:[#allocation2 + $0x91] sm:$0xff] }
 0x236   : > { %2934 = vmatprep.mubr.bf16.mxu1 %v9311_v23  ;;  %v1984_v23 = vpack.c.bf16 %v9473_v38, %v9353_v44  ;;  %v2048_v46 = vpack.c.bf16 %v2036_v30, %v1940_v53  ;;  %v8279_v44 = vld [vmem:[%s9246_s26 + $0x238] sm:$0xff]  }
 0x238   : > { %7996 = vmatpush3.bf16.msra.mxu0 %v8273_v22 }
 0x239   : > { %7997 = vmatprep.subr.bf16.mxu0 %v8274_v24 }
 0x23b   : > { %2838 = vmatmul.mubr.bf16.gmra.mrb[36].mxu0 %v1950_v51 }
 0x23c   : > { %2845 = vmatprep.mubr.bf16.mxu0 %v1983_v35  ;;  %7998 = vmatpush3.bf16.msra.mxu0 %v8274_v24 }
 0x23d   : > { %2935 = vmatmul.mubr.bf16.gmra.mrb[36].mxu1 %v9332_v59  ;;  %7999 = vmatprep.subr.bf16.mxu0 %v8275_v49  ;;  %v8278_v59 = vld [vmem:[%s9246_s26 + $0x230] sm:$0xff]  }
 0x23e   : > { %2942 = vmatprep.mubr.bf16.mxu1 %v9339_v0  ;;  %v2004_v0 = vld [vmem:[#allocation2 + $0x90] sm:$0xff] }
 0x23f   : > { %v2016_v56 = vpack.c.bf16 %v2004_v0, %v9334_v34  ;;  %v1954_v34 = vpack.c.bf16 %v9389_v27, %v9376_v6  ;;  %v2012_v6 = vld [vmem:[#allocation2 + $0x130] sm:$0xff] }
 0x240   : > { %8000 = vmatpush3.bf16.msra.mxu0 %v8275_v49  ;;  %v2020_v8 = vpack.c.bf16 %v2012_v6, %v9430_v19 }
 0x241   : > { %8001 = vmatprep.subr.bf16.mxu0 %v8276_v62 }
 0x243   : > { %2846 = vmatmul.mubr.bf16.gmra.mrb[40].mxu0 %v1951_v13 }
 0x244   : > { %2853 = vmatprep.mubr.bf16.mxu0 %v1984_v23  ;;  %8002 = vmatpush3.bf16.msra.mxu0 %v8276_v62 }
 0x245   : > { %2943 = vmatmul.mubr.bf16.gmra.mrb[40].mxu1 %v9360_v61  ;;  %8003 = vmatprep.subr.bf16.mxu0 %v8277_v55  ;;  %v1953_v61 = vpack.c.bf16 %v9371_v18, %v9355_v33  ;;  %v1980_v33 = vld [vmem:[#allocation2 + $0x122] sm:$0xff]  ;;  %v1955_v18 = vpack.c.bf16 %v9415_v57, %v9397_v4  ;;  %v2068_v4 = vld [vmem:[#allocation2 + $0x92] sm:$0xff] }
 0x246   : > { %2950 = vmatprep.mubr.bf16.mxu1 %v2048_v46  ;;  %v1988_v26 = vpack.c.bf16 %v1980_v33, %v9446_v31  ;;  %v2080_v3 = vpack.c.bf16 %v2068_v4, %v9473_v38 }
 0x248   : > { %8004 = vmatpush3.bf16.msra.mxu0 %v8277_v55 }
 0x249   : > { %8005 = vmatprep.subr.bf16.mxu0 %v8278_v59 }
 0x24b   : > { %2854 = vmatmul.mubr.bf16.gmra.mrb[44].mxu0 %v1952_v52 }
 0x24c   : > { %2861 = vmatprep.mubr.bf16.mxu0 %v1985_v50  ;;  %8006 = vmatpush3.bf16.msra.mxu0 %v8278_v59 }
 0x24d   : > { %2951 = vmatmul.mubr.bf16.gmra.mrb[44].mxu1 %v2016_v56  ;;  %8007 = vmatprep.subr.bf16.mxu0 %v8279_v44 }
 0x24e   : > { %2958 = vmatprep.mubr.bf16.mxu1 %v9384_v40  ;;  %v1948_v40 = vld [vmem:[#allocation2 + $0x121] sm:$0xff] }
 0x24f   : > { %v2052_v58 = vpack.c.bf16 %v2044_v28, %v1948_v40  ;;  %v1956_v27 = vpack.c.bf16 %v1948_v40, %v9417_v60 }
 0x250   : > { %8008 = vmatpush3.bf16.msra.mxu0 %v8279_v44 }
 0x253   : > { %2862 = vmatmul.mubr.bf16.gmra.mrb[48].mxu0 %v1953_v61 }
 0x254   : > { %2869 = vmatprep.mubr.bf16.mxu0 %v1986_v15 }
 0x255   : > { %2959 = vmatmul.mubr.bf16.gmra.mrb[48].mxu1 %v9401_v63  ;;  %v2076_v63 = vld [vmem:[#allocation2 + $0x132] sm:$0xff] }
 0x256   : > { %2966 = vmatprep.mubr.bf16.mxu1 %v9406_v11  ;;  %v2084_v36 = vpack.c.bf16 %v2076_v63, %v1980_v33 }
 0x25b   : > { %2870 = vmatmul.mubr.bf16.gmra.mrb[52].mxu0 %v1954_v34 }
 0x25c   : > { %2877 = vmatprep.mubr.bf16.mxu0 %v1987_v29 }
 0x25d   : > { %2967 = vmatmul.mubr.bf16.gmra.mrb[52].mxu1 %v9428_v42 }
 0x25e   : > { %2974 = vmatprep.mubr.bf16.mxu1 %v9434_v16 }
 0x263   : > { %2878 = vmatmul.mubr.bf16.gmra.mrb[56].mxu0 %v1955_v18 }
 0x264   : > { %2885 = vmatprep.mubr.bf16.mxu0 %v1988_v26 }
 0x265   : > { %2975 = vmatmul.mubr.bf16.gmra.mrb[56].mxu1 %v9448_v47 }
 0x266   : > { %2982 = vmatprep.mubr.bf16.mxu1 %v2052_v58 }
 0x26b   : > { %2886 = vmatmul.mubr.bf16.gmra.mrb[60].mxu0 %v1956_v27 }
 0x26c   : > { %8009 = vmatprep.mubr.bf16.mxu0 %v9316_v48 }
 0x26d   : > { %2983 = vmatmul.mubr.bf16.gmra.mrb[60].mxu1 %v2020_v8 }
 0x273   : > { %8010 = vmatmul.mubr.bf16.vlgmr.msra.gmra.mrb[64].mxu0 %v9344_v45  ;;  %v9519_v45 = vld [vmem:[%s1803_s23] ss:$0 sm:$0xff] }
 0x274   : > { %8013 = vmatprep.mubr.bf16.mxu0 %v9366_v37 }
 0x27b   : > { %8014 = vmatmul.mubr.bf16.gmra.mrb[68].mxu0 %v2080_v3 }
 0x27c   : > { %8017 = vmatprep.mubr.bf16.mxu0 %v9410_v9 }
 0x283   : > { %8018 = vmatmul.mubr.bf16.gmra.mrb[72].mxu0 %v9438_v20 }
 0x284   : > { %8021 = vmatprep.mubr.bf16.mxu0 %v9454_v17 }
 0x28b   : > { %8022 = vmatmul.mubr.bf16.gmra.mrb[76].mxu0 %v2084_v36 }
 0x2c6   : > { %v7161_v48 = vpop.f32.mrb[0].mxu0 }
 0x2c7   : > { %v7162_v37 = vpop.f32.mrb[1].mxu0 }
 0x2c8   : > { %v7163_v11 = vadd.f32 %v7162_v37, %v7161_v48  ;;  %v7164_v2 = vpop.f32.mrb[2].mxu0  ;;  %v7225_v41 = vpop.f32.mrb[0].mxu1 }
 0x2c9   : > { %v7165_v43 = vpop.f32.mrb[3].mxu0  ;;  %v7226_v9 = vpop.f32.mrb[1].mxu1 }
 0x2ca   : > { %v2638_v57 = vadd.f32 %v7163_v11, %v9519_v45  ;;  %v7166_v60 = vadd.f32 %v7165_v43, %v7164_v2  ;;  %v7227_v5 = vadd.f32 %v7226_v9, %v7225_v41  ;;  %v7228_v7 = vpop.f32.mrb[2].mxu1 }
 0x2cb   : > { %v7229_v10 = vpop.f32.mrb[3].mxu1 }
 0x2cc   : > { %v2641_v12 = vadd.f32 %v7166_v60, %v9519_v45  ;;  %v9523_v14 = vadd.f32 %v7227_v5, %v2638_v57  ;;  %v7230_v42 = vadd.f32 %v7229_v10, %v7228_v7 }
 0x2ce   : > { %v9525_v1 = vadd.f32 %v7230_v42, %v2641_v12  ;;  %v7167_v19 = vpop.f32.mrb[4].mxu0 }
 0x2cf   : > { %v7168_v16 = vpop.f32.mrb[5].mxu0 }
 0x2d0   : > { %v7169_v20 = vadd.f32 %v7168_v16, %v7167_v19  ;;  %v7170_v25 = vpop.f32.mrb[6].mxu0  ;;  %v7231_v21 = vpop.f32.mrb[4].mxu1 }
 0x2d1   : > { %v7171_v31 = vpop.f32.mrb[7].mxu0  ;;  %v7232_v47 = vpop.f32.mrb[5].mxu1 }
 0x2d2   : > { %v2646_v54 = vadd.f32 %v7169_v20, %v9519_v45  ;;  %v7172_v17 = vadd.f32 %v7171_v31, %v7170_v25  ;;  %v7233_v39 = vadd.f32 %v7232_v47, %v7231_v21  ;;  %v7234_v32 = vpop.f32.mrb[6].mxu1 }
 0x2d3   : > { %v7235_v22 = vpop.f32.mrb[7].mxu1 }
 0x2d4   : > { %v2649_v24 = vadd.f32 %v7172_v17, %v9519_v45  ;;  %v9529_v51 = vadd.f32 %v7233_v39, %v2646_v54  ;;  %v7236_v35 = vadd.f32 %v7235_v22, %v7234_v32 }
 0x2d6   : > { %v9531_v49 = vadd.f32 %v7236_v35, %v2649_v24  ;;  %v7173_v38 = vpop.f32.mrb[8].mxu0 }
 0x2d7   : > { %v7174_v62 = vpop.f32.mrb[9].mxu0 }
 0x2d8   : > { %v7175_v13 = vadd.f32 %v7174_v62, %v7173_v38  ;;  %v7176_v53 = vpop.f32.mrb[10].mxu0  ;;  %v7237_v30 = vpop.f32.mrb[8].mxu1 }
 0x2d9   : > { %v7177_v23 = vpop.f32.mrb[11].mxu0  ;;  %v7238_v55 = vpop.f32.mrb[9].mxu1 }
 0x2da   : > { %v2654_v46 = vadd.f32 %v7175_v13, %v9519_v45  ;;  %v7178_v59 = vadd.f32 %v7177_v23, %v7176_v53  ;;  %v7239_v0 = vadd.f32 %v7238_v55, %v7237_v30  ;;  %v7240_v52 = vpop.f32.mrb[10].mxu1 }
 0x2db   : > { %v7241_v50 = vpop.f32.mrb[11].mxu1 }
 0x2dc   : > { %v2657_v56 = vadd.f32 %v7178_v59, %v9519_v45  ;;  %v9535_v44 = vadd.f32 %v7239_v0, %v2654_v46  ;;  %v7242_v61 = vadd.f32 %v7241_v50, %v7240_v52 }
 0x2de   : > { %v9537_v15 = vadd.f32 %v7242_v61, %v2657_v56  ;;  %v7179_v34 = vpop.f32.mrb[12].mxu0 }
 0x2df   : > { %v7180_v29 = vpop.f32.mrb[13].mxu0 }
 0x2e0   : > { %v7181_v33 = vadd.f32 %v7180_v29, %v7179_v34  ;;  %v7182_v18 = vpop.f32.mrb[14].mxu0  ;;  %v7243_v40 = vpop.f32.mrb[12].mxu1 }
 0x2e1   : > { %v7183_v28 = vpop.f32.mrb[15].mxu0  ;;  %v7244_v26 = vpop.f32.mrb[13].mxu1 }
 0x2e2   : > { %v2662_v58 = vadd.f32 %v7181_v33, %v9519_v45  ;;  %v7184_v6 = vadd.f32 %v7183_v28, %v7182_v18  ;;  %v7245_v27 = vadd.f32 %v7244_v26, %v7243_v40  ;;  %v7246_v8 = vpop.f32.mrb[14].mxu1 }
 0x2e3   : > { %v7247_v4 = vpop.f32.mrb[15].mxu1 }
 0x2e4   : > { %v2665_v3 = vadd.f32 %v7184_v6, %v9519_v45  ;;  %v9541_v63 = vadd.f32 %v7245_v27, %v2662_v58  ;;  %v7248_v36 = vadd.f32 %v7247_v4, %v7246_v8 }
 0x2e6   : > { %v9543_v48 = vadd.f32 %v7248_v36, %v2665_v3  ;;  %v7185_v37 = vpop.f32.mrb[16].mxu0 }
 0x2e7   : > { %v7186_v11 = vpop.f32.mrb[17].mxu0 }
 0x2e8   : > { %v7187_v2 = vadd.f32 %v7186_v11, %v7185_v37  ;;  %v7188_v41 = vpop.f32.mrb[18].mxu0  ;;  %v7249_v43 = vpop.f32.mrb[16].mxu1 }
 0x2e9   : > { %v7189_v9 = vpop.f32.mrb[19].mxu0  ;;  %v7250_v57 = vpop.f32.mrb[17].mxu1 }
 0x2ea   : > { %v2670_v60 = vadd.f32 %v7187_v2, %v9519_v45  ;;  %v7190_v5 = vadd.f32 %v7189_v9, %v7188_v41  ;;  %v7251_v7 = vadd.f32 %v7250_v57, %v7249_v43  ;;  %v7252_v10 = vpop.f32.mrb[18].mxu1 }
 0x2eb   : > { %v7253_v12 = vpop.f32.mrb[19].mxu1 }
 0x2ec   : > { %v2673_v42 = vadd.f32 %v7190_v5, %v9519_v45  ;;  %v9547_v19 = vadd.f32 %v7251_v7, %v2670_v60  ;;  %v7254_v16 = vadd.f32 %v7253_v12, %v7252_v10 }
 0x2ee   : > { %v9549_v20 = vadd.f32 %v7254_v16, %v2673_v42  ;;  %v7191_v25 = vpop.f32.mrb[20].mxu0 }
 0x2ef   : > { %v7192_v21 = vpop.f32.mrb[21].mxu0 }
 0x2f0   : > { %v7193_v31 = vadd.f32 %v7192_v21, %v7191_v25  ;;  %v7194_v47 = vpop.f32.mrb[22].mxu0  ;;  %v7255_v54 = vpop.f32.mrb[20].mxu1 }
 0x2f1   : > { %v7195_v17 = vpop.f32.mrb[23].mxu0  ;;  %v7256_v39 = vpop.f32.mrb[21].mxu1 }
 0x2f2   : > { %v2678_v32 = vadd.f32 %v7193_v31, %v9519_v45  ;;  %v7196_v22 = vadd.f32 %v7195_v17, %v7194_v47  ;;  %v7257_v24 = vadd.f32 %v7256_v39, %v7255_v54  ;;  %v7258_v35 = vpop.f32.mrb[22].mxu1 }
 0x2f3   : > { %v7259_v38 = vpop.f32.mrb[23].mxu1 }
 0x2f4   : > { %v2681_v62 = vadd.f32 %v7196_v22, %v9519_v45  ;;  %v9553_v13 = vadd.f32 %v7257_v24, %v2678_v32  ;;  %v7260_v53 = vadd.f32 %v7259_v38, %v7258_v35 }
 0x2f6   : > { %v9555_v30 = vadd.f32 %v7260_v53, %v2681_v62  ;;  %v7197_v23 = vpop.f32.mrb[24].mxu0 }
 0x2f7   : > { %v7198_v55 = vpop.f32.mrb[25].mxu0 }
 0x2f8   : > { %v7199_v46 = vadd.f32 %v7198_v55, %v7197_v23  ;;  %v7200_v59 = vpop.f32.mrb[26].mxu0  ;;  %v7261_v0 = vpop.f32.mrb[24].mxu1 }
 0x2f9   : > { %v7201_v52 = vpop.f32.mrb[27].mxu0  ;;  %v7262_v50 = vpop.f32.mrb[25].mxu1 }
 0x2fa   : > { %v2686_v56 = vadd.f32 %v7199_v46, %v9519_v45  ;;  %v7202_v61 = vadd.f32 %v7201_v52, %v7200_v59  ;;  %v7263_v34 = vadd.f32 %v7262_v50, %v7261_v0  ;;  %v7264_v29 = vpop.f32.mrb[26].mxu1  ;;  %v8281_v46 = vld [vmem:[%s9577_s24] sm:$0xff]  }
 0x2fb   : > { %v7265_v33 = vpop.f32.mrb[27].mxu1  ;;  %v8289_v59 = vld [vmem:[%s9577_s24 + $0xc0] sm:$0xff]  }
 0x2fc   : > { %v2689_v18 = vadd.f32 %v7202_v61, %v9519_v45  ;;  %v9559_v40 = vadd.f32 %v7263_v34, %v2686_v56  ;;  %v7266_v28 = vadd.f32 %v7265_v33, %v7264_v29  ;;  %v8291_v61 = vld [vmem:[%s9577_s24 + $0x80] sm:$0xff]   ;;  %v8282_v29 = vld [vmem:[%s9577_s24 + $0x48] sm:$0xff]   ;;  %7481 = vmatprep.subr.bf16.mxu0 %v8289_v59 }
 0x2fd   : > { %7482 = vmatpush3.bf16.msra.mxu0 %v8291_v61  ;;  %v8296_v61 = vld [vmem:[%s9577_s24 + $0x28] sm:$0xff]  }
 0x2fe   : > { %v9561_v26 = vadd.f32 %v7266_v28, %v2689_v18  ;;  %v7203_v58 = vpop.f32.mrb[28].mxu0 }
 0x2ff   : > { %v7204_v6 = vpop.f32.mrb[29].mxu0 }
 0x300   : > { %v7205_v27 = vadd.f32 %v7204_v6, %v7203_v58  ;;  %v7206_v8 = vpop.f32.mrb[30].mxu0  ;;  %v7267_v4 = vpop.f32.mrb[28].mxu1  ;;  %v8283_v58 = vld [vmem:[%s9577_s24 + $0x8] sm:$0xff]  }
 0x301   : > { %v7207_v3 = vpop.f32.mrb[31].mxu0  ;;  %v7268_v36 = vpop.f32.mrb[29].mxu1 }
 0x302   : > { %v2694_v37 = vadd.f32 %v7205_v27, %v9519_v45  ;;  %v7208_v11 = vadd.f32 %v7207_v3, %v7206_v8  ;;  %v7269_v2 = vadd.f32 %v7268_v36, %v7267_v4  ;;  %v7270_v41 = vpop.f32.mrb[30].mxu1  ;;  %v8292_v27 = vld [vmem:[%s9577_s24 + $0xc8] sm:$0xff]   ;;  %v8284_v4 = vld [vmem:[%s9577_s24 + $0x50] sm:$0xff]  }
 0x303   : > { %v7271_v43 = vpop.f32.mrb[31].mxu1  ;;  %7483 = vmatprep.subr.bf16.mxu0 %v8292_v27 }
 0x304   : > { %v2697_v9 = vadd.f32 %v7208_v11, %v9519_v45  ;;  %v9565_v57 = vadd.f32 %v7269_v2, %v2694_v37  ;;  %v7272_v60 = vadd.f32 %v7271_v43, %v7270_v41  ;;  %v8293_v11 = vld [vmem:[%s9577_s24 + $0x88] sm:$0xff]  }
 0x305   : > { %7484 = vmatpush3.bf16.msra.mxu0 %v8293_v11 }
 0x306   : > { %v9567_v5 = vadd.f32 %v7272_v60, %v2697_v9  ;;  %v7289_v7 = vpop.f32.mrb[32].mxu0 }
 0x307   : > { %v7290_v10 = vpop.f32.mrb[33].mxu0 }
 0x308   : > { %v7291_v12 = vadd.f32 %v7290_v10, %v7289_v7  ;;  %v7292_v42 = vpop.f32.mrb[34].mxu0  ;;  %v7353_v16 = vpop.f32.mrb[32].mxu1  ;;  %v8295_v10 = vld [vmem:[%s9577_s24 + $0xd0] sm:$0xff]  }
 0x309   : > { %v7293_v25 = vpop.f32.mrb[35].mxu0  ;;  %v7354_v21 = vpop.f32.mrb[33].mxu1  ;;  %7485 = vmatprep.subr.bf16.mxu0 %v8295_v10 }
 0x30a   : > { %v2832_v31 = vadd.f32 %v7291_v12, %v9523_v14  ;;  %v7294_v47 = vadd.f32 %v7293_v25, %v7292_v42  ;;  %v7355_v54 = vadd.f32 %v7354_v21, %v7353_v16  ;;  %v7356_v17 = vpop.f32.mrb[34].mxu1  ;;  %v8280_v14 = vld [vmem:[%s9577_s24 + $0x40] sm:$0xff]   ;;  %v8286_v42 = vld [vmem:[%s9577_s24 + $0x58] sm:$0xff]  }
 0x30b   : > { %v7357_v39 = vpop.f32.mrb[35].mxu1  ;;  %7417 = vmatprep.subr.bf16.mxu1 %v8280_v14 }
 0x30c   : > { %v2835_v45 = vadd.f32 %v7294_v47, %v9525_v1  ;;  %v7358_v32 = vadd.f32 %v7357_v39, %v7356_v17  ;;  %v9571_v22 = vadd.f32 %v7355_v54, %v2832_v31  ;;  %7418 = vmatpush3.bf16.msra.mxu1 %v8281_v46  ;;  %v8287_v31 = vld [vmem:[%s9577_s24 + $0x18] sm:$0xff]   ;;  %v8297_v54 = vld [vmem:[%s9577_s24 + $0x90] sm:$0xff]   ;;  %v8288_v39 = vld [vmem:[%s9577_s24 + $0x60] sm:$0xff]  }
 0x30d   : > { %7419 = vmatprep.subr.bf16.mxu1 %v8282_v29  ;;  %7486 = vmatpush3.bf16.msra.mxu0 %v8297_v54  ;;  %v8299_v46 = vld [vmem:[%s9577_s24 + $0x98] sm:$0xff]  }
 0x30e   : > { %v7295_v24 = vpop.f32.mrb[36].mxu0  ;;  %v9573_v35 = vadd.f32 %v7358_v32, %v2835_v45 }
 0x30f   : > { %v7296_v38 = vpop.f32.mrb[37].mxu0 }
 0x310   : > { %v7297_v62 = vadd.f32 %v7296_v38, %v7295_v24  ;;  %v7298_v53 = vpop.f32.mrb[38].mxu0  ;;  %v7359_v23 = vpop.f32.mrb[36].mxu1  ;;  %7420 = vmatpush3.bf16.msra.mxu1 %v8283_v58  ;;  %v8298_v38 = vld [vmem:[%s9577_s24 + $0xd8] sm:$0xff]  }
 0x311   : > { %v7299_v1 = vpop.f32.mrb[39].mxu0  ;;  %v7360_v55 = vpop.f32.mrb[37].mxu1  ;;  %7421 = vmatprep.subr.bf16.mxu1 %v8284_v4  ;;  %7487 = vmatprep.subr.bf16.mxu0 %v8298_v38 }
 0x312   : > { %v2840_v0 = vadd.f32 %v7297_v62, %v9529_v51  ;;  %v7300_v52 = vadd.f32 %v7299_v1, %v7298_v53  ;;  %v7361_v50 = vadd.f32 %v7360_v55, %v7359_v23  ;;  %v7362_v56 = vpop.f32.mrb[38].mxu1  ;;  %7488 = vmatpush3.bf16.msra.mxu0 %v8299_v46 }
 0x313   : > { %v7363_v34 = vpop.f32.mrb[39].mxu1 }
 0x314   : > { %v2843_v33 = vadd.f32 %v7300_v52, %v9531_v49  ;;  %v7364_v18 = vadd.f32 %v7363_v34, %v7362_v56  ;;  %v9586_v28 = vadd.f32 %v7361_v50, %v2840_v0  ;;  %v8285_v49 = vld [vmem:[%s9577_s24 + $0x10] sm:$0xff]   ;;  %v8294_v0 = vld [vmem:[%s9577_s24 + $0x68] sm:$0xff]   ;;  %v8301_v34 = vld [vmem:[%s9577_s24 + $0xe0] sm:$0xff]  }
 0x315   : > { %7422 = vmatpush3.bf16.msra.mxu1 %v8285_v49  ;;  %7489 = vmatprep.subr.bf16.mxu0 %v8301_v34 }
 0x316   : > { %v7301_v51 = vpop.f32.mrb[40].mxu0  ;;  %v9589_v6 = vadd.f32 %v7364_v18, %v2843_v33  ;;  %7423 = vmatprep.subr.bf16.mxu1 %v8286_v42  ;;  %v8302_v18 = vld [vmem:[%s9577_s24 + $0x30] sm:$0xff]   ;;  %v8308_v42 = vld [vmem:[%s9577_s24 + $0x38] sm:$0xff]  }
 0x317   : > { %v7302_v8 = vpop.f32.mrb[41].mxu0 }
 0x318   : > { %v7303_v3 = vadd.f32 %v7302_v8, %v7301_v51  ;;  %v7304_v36 = vpop.f32.mrb[42].mxu0  ;;  %v7365_v37 = vpop.f32.mrb[40].mxu1  ;;  %v8303_v51 = vld [vmem:[%s9577_s24 + $0xa0] sm:$0xff]  }
 0x319   : > { %v7305_v2 = vpop.f32.mrb[43].mxu0  ;;  %v7366_v41 = vpop.f32.mrb[41].mxu1  ;;  %7424 = vmatpush3.bf16.msra.mxu1 %v8287_v31  ;;  %7490 = vmatpush3.bf16.msra.mxu0 %v8303_v51 }
 0x31a   : > { %v2848_v43 = vadd.f32 %v7303_v3, %v9535_v44  ;;  %v7306_v9 = vadd.f32 %v7305_v2, %v7304_v36  ;;  %v7367_v60 = vadd.f32 %v7366_v41, %v7365_v37  ;;  %v7368_v7 = vpop.f32.mrb[42].mxu1  ;;  %7425 = vmatprep.subr.bf16.mxu1 %v8288_v39  ;;  %v8304_v36 = vld [vmem:[%s9577_s24 + $0xe8] sm:$0xff]  }
 0x31b   : > { %v7369_v12 = vpop.f32.mrb[43].mxu1  ;;  %v8305_v37 = vld [vmem:[%s9577_s24 + $0xa8] sm:$0xff]   ;;  %7491 = vmatprep.subr.bf16.mxu0 %v8304_v36 }
 0x31c   : > { %v2851_v16 = vadd.f32 %v7306_v9, %v9537_v15  ;;  %v7370_v25 = vadd.f32 %v7369_v12, %v7368_v7  ;;  %v9599_v21 = vadd.f32 %v7367_v60, %v2848_v43  ;;  %v8290_v15 = vld [vmem:[%s9577_s24 + $0x20] sm:$0xff]   ;;  %v8306_v43 = vld [vmem:[%s9577_s24 + $0x78] sm:$0xff]   ;;  %v8307_v60 = vld [vmem:[%s9577_s24 + $0xf0] sm:$0xff]  }
 0x31d   : > { %7426 = vmatpush3.bf16.msra.mxu1 %v8290_v15  ;;  %7492 = vmatpush3.bf16.msra.mxu0 %v8305_v37 }
 0x31e   : > { %v7307_v44 = vpop.f32.mrb[44].mxu0  ;;  %v9602_v47 = vadd.f32 %v7370_v25, %v2851_v16  ;;  %7427 = vmatprep.subr.bf16.mxu1 %v8294_v0  ;;  %7493 = vmatprep.subr.bf16.mxu0 %v8307_v60  ;;  %v8309_v25 = vld [vmem:[%s9577_s24 + $0xb0] sm:$0xff]  }
 0x31f   : > { %v7308_v17 = vpop.f32.mrb[45].mxu0 }
 0x320   : > { %v7309_v45 = vadd.f32 %v7308_v17, %v7307_v44  ;;  %v7310_v32 = vpop.f32.mrb[46].mxu0  ;;  %v7371_v24 = vpop.f32.mrb[44].mxu1  ;;  %v8310_v44 = vld [vmem:[%s9577_s24 + $0xf8] sm:$0xff]  }
 0x321   : > { %v7311_v14 = vpop.f32.mrb[47].mxu0  ;;  %v7372_v62 = vpop.f32.mrb[45].mxu1  ;;  %7428 = vmatpush3.bf16.msra.mxu1 %v8296_v61  ;;  %7494 = vmatpush3.bf16.msra.mxu0 %v8309_v25 }
 0x322   : > { %v2856_v53 = vadd.f32 %v7309_v45, %v9541_v63  ;;  %v7312_v23 = vadd.f32 %v7311_v14, %v7310_v32  ;;  %v7373_v1 = vadd.f32 %v7372_v62, %v7371_v24  ;;  %v7374_v55 = vpop.f32.mrb[46].mxu1  ;;  %v8300_v63 = vld [vmem:[%s9577_s24 + $0x70] sm:$0xff]   ;;  %v8311_v32 = vld [vmem:[%s9577_s24 + $0xb8] sm:$0xff]   ;;  %7495 = vmatprep.subr.bf16.mxu0 %v8310_v44 }
 0x323   : > { %v7375_v59 = vpop.f32.mrb[47].mxu1  ;;  %7429 = vmatprep.subr.bf16.mxu1 %v8300_v63 }
 0x324   : > { %v2859_v52 = vadd.f32 %v7312_v23, %v9543_v48  ;;  %v7376_v50 = vadd.f32 %v7375_v59, %v7374_v55  ;;  %v9612_v56 = vadd.f32 %v7373_v1, %v2856_v53  ;;  %v8312_v55 = vld [vmem:[%s9577_s24 + $0x140] sm:$0xff]  }
 0x325   : > { %7430 = vmatpush3.bf16.msra.mxu1 %v8302_v18  ;;  %7496 = vmatpush3.bf16.msra.mxu0 %v8311_v32 }
 0x326   : > { %v7313_v29 = vpop.f32.mrb[48].mxu0  ;;  %v9617_v33 = vadd.f32 %v7376_v50, %v2859_v52  ;;  %7431 = vmatprep.subr.bf16.mxu1 %v8306_v43 }
 0x327   : > { %v7314_v58 = vpop.f32.mrb[49].mxu0 }
 0x328   : > { %v7315_v48 = vadd.f32 %v7314_v58, %v7313_v29  ;;  %v7316_v27 = vpop.f32.mrb[50].mxu0  ;;  %v7377_v8 = vpop.f32.mrb[48].mxu1 }
 0x329   : > { %v7317_v4 = vpop.f32.mrb[51].mxu0  ;;  %v7378_v3 = vpop.f32.mrb[49].mxu1  ;;  %7432 = vmatpush3.bf16.msra.mxu1 %v8308_v42 }
 0x32a   : > { %v2864_v49 = vadd.f32 %v7315_v48, %v9547_v19  ;;  %v7318_v11 = vadd.f32 %v7317_v4, %v7316_v27  ;;  %v7379_v2 = vadd.f32 %v7378_v3, %v7377_v8  ;;  %v7380_v41 = vpop.f32.mrb[50].mxu1  ;;  %7545 = vmatprep.subr.bf16.mxu1 %v8312_v55 }
 0x32b   : > { %v7381_v9 = vpop.f32.mrb[51].mxu1 }
 0x32c   : > { %v2867_v7 = vadd.f32 %v7318_v11, %v9549_v20  ;;  %v7382_v10 = vadd.f32 %v7381_v9, %v7380_v41  ;;  %v9627_v12 = vadd.f32 %v7379_v2, %v2864_v49 }
 0x32e   : > { %v7319_v19 = vpop.f32.mrb[52].mxu0  ;;  %v9630_v16 = vadd.f32 %v7382_v10, %v2867_v7 }
 0x32f   : > { %v7320_v31 = vpop.f32.mrb[53].mxu0 }
 0x330   : > { %v7321_v54 = vadd.f32 %v7320_v31, %v7319_v19  ;;  %v7322_v17 = vpop.f32.mrb[54].mxu0  ;;  %v7383_v39 = vpop.f32.mrb[52].mxu1 }
 0x331   : > { %v7323_v20 = vpop.f32.mrb[55].mxu0  ;;  %v7384_v45 = vpop.f32.mrb[53].mxu1 }
 0x332   : > { %v2872_v24 = vadd.f32 %v7321_v54, %v9553_v13  ;;  %v7324_v15 = vadd.f32 %v7323_v20, %v7322_v17  ;;  %v7385_v38 = vadd.f32 %v7384_v45, %v7383_v39  ;;  %v7386_v14 = vpop.f32.mrb[54].mxu1 }
 0x333   : > { %v7387_v62 = vpop.f32.mrb[55].mxu1 }
 0x334   : > { %v2875_v53 = vadd.f32 %v7324_v15, %v9555_v30  ;;  %v7388_v23 = vadd.f32 %v7387_v62, %v7386_v14  ;;  %v9637_v1 = vadd.f32 %v7385_v38, %v2872_v24 }
 0x336   : > { %v7325_v46 = vpop.f32.mrb[56].mxu0  ;;  %v9640_v59 = vadd.f32 %v7388_v23, %v2875_v53 }
 0x337   : > { %v7326_v0 = vpop.f32.mrb[57].mxu0 }
 0x338   : > { %v7327_v52 = vadd.f32 %v7326_v0, %v7325_v46  ;;  %v7328_v50 = vpop.f32.mrb[58].mxu0  ;;  %v7389_v13 = vpop.f32.mrb[56].mxu1 }
 0x339   : > { %v7329_v61 = vpop.f32.mrb[59].mxu0  ;;  %v7390_v63 = vpop.f32.mrb[57].mxu1 }
 0x33a   : > { %v2880_v34 = vadd.f32 %v7327_v52, %v9559_v40  ;;  %v7330_v29 = vadd.f32 %v7329_v61, %v7328_v50  ;;  %v7391_v18 = vadd.f32 %v7390_v63, %v7389_v13  ;;  %v7392_v30 = vpop.f32.mrb[58].mxu1  ;;  %v8321_v61 = vld [vmem:[%s9577_s24 + $0x1c0] sm:$0xff]  }
 0x33b   : > { %v7393_v58 = vpop.f32.mrb[59].mxu1  ;;  %7609 = vmatprep.subr.bf16.mxu0 %v8321_v61 }
 0x33c   : > { %v2883_v51 = vadd.f32 %v7330_v29, %v9561_v26  ;;  %v7394_v48 = vadd.f32 %v7393_v58, %v7392_v30  ;;  %v9644_v27 = vadd.f32 %v7391_v18, %v2880_v34 }
 0x33e   : > { %v7331_v8 = vpop.f32.mrb[60].mxu0  ;;  %v9646_v4 = vadd.f32 %v7394_v48, %v2883_v51 }
 0x33f   : > { %v7332_v3 = vpop.f32.mrb[61].mxu0 }
 0x340   : > { %v7333_v36 = vadd.f32 %v7332_v3, %v7331_v8  ;;  %v7334_v37 = vpop.f32.mrb[62].mxu0  ;;  %v7395_v49 = vpop.f32.mrb[60].mxu1 }
 0x341   : > { %v7335_v11 = vpop.f32.mrb[63].mxu0  ;;  %v7396_v2 = vpop.f32.mrb[61].mxu1 }
 0x342   : > { %v2888_v40 = vadd.f32 %v7333_v36, %v9565_v57  ;;  %v7336_v41 = vadd.f32 %v7335_v11, %v7334_v37  ;;  %v7397_v43 = vadd.f32 %v7396_v2, %v7395_v49  ;;  %v7398_v9 = vpop.f32.mrb[62].mxu1 }
 0x343   : > { %v7399_v60 = vpop.f32.mrb[63].mxu1 }
 0x344   : > { %v2891_v26 = vadd.f32 %v7336_v41, %v9567_v5  ;;  %v7400_v7 = vadd.f32 %v7399_v60, %v7398_v9  ;;  %v2985_v10 = vadd.f32 %v7397_v43, %v2888_v40 }
 0x346   : > { %v8011_v42 = vpop.f32.mrb[64].mxu0  ;;  %v9650_v19 = vadd.f32 %v7400_v7, %v2891_v26 }
 0x347   : > { %v9653_v25 = vadd.f32 %v8011_v42, %v9586_v28  ;;  %v3025_v31 = vpop.f32.mrb[65].mxu0 }
 0x348   : > { %v9656_v44 = vadd.f32 %v3025_v31, %v9571_v22  ;;  %v8012_v54 = vpop.f32.mrb[66].mxu0 }
 0x349   : > { %v9659_v57 = vadd.f32 %v8012_v54, %v9589_v6  ;;  %v3028_v17 = vpop.f32.mrb[67].mxu0  ;;  %v3116_v22 = vmul.f32 %v9653_v25, %v9653_v25 }
 0x34a   : > { %v9662_v39 = vadd.f32 %v3028_v17, %v9573_v35  ;;  %v3114_v5 = vmul.f32 %v9656_v44, %v9656_v44 }
 0x34b   : > { %v3117_v15 = vmul.f32 %v9659_v57, %v9659_v57 }
 0x34c   : > { %v3092_v20 = vadd.f32 %v9662_v39, %v9656_v44  ;;  %v3115_v28 = vmul.f32 %v9662_v39, %v9662_v39 }
 0x34e   : > { %v3093_v45 = vadd.f32 %v3092_v20, %v9653_v25  ;;  %v3130_v6 = vadd.f32 %v3115_v28, %v3114_v5  ;;  %v8015_v32 = vpop.f32.mrb[68].mxu0 }
 0x34f   : > { %v9674_v24 = vadd.f32 %v8015_v32, %v9612_v56  ;;  %v3041_v35 = vpop.f32.mrb[69].mxu0 }
 0x350   : > { %v3131_v38 = vadd.f32 %v3130_v6, %v3116_v22  ;;  %v9679_v14 = vadd.f32 %v3041_v35, %v9599_v21  ;;  %v3094_v62 = vadd.f32 %v3093_v45, %v9659_v57  ;;  %v8016_v53 = vpop.f32.mrb[70].mxu0 }
 0x351   : > { %v9683_v23 = vadd.f32 %v8016_v53, %v9617_v33  ;;  %v3044_v55 = vpop.f32.mrb[71].mxu0  ;;  %v3120_v33 = vmul.f32 %v9674_v24, %v9674_v24 }
 0x352   : > { %v3095_v46 = vadd.f32 %v3094_v62, %v9679_v14  ;;  %v3118_v56 = vmul.f32 %v9679_v14, %v9679_v14  ;;  %v3132_v0 = vadd.f32 %v3131_v38, %v3117_v15  ;;  %v9689_v52 = vadd.f32 %v3044_v55, %v9602_v47 }
 0x353   : > { %v3121_v30 = vmul.f32 %v9683_v23, %v9683_v23 }
 0x354   : > { %v3133_v50 = vadd.f32 %v3132_v0, %v3118_v56  ;;  %v3096_v21 = vadd.f32 %v3095_v46, %v9689_v52  ;;  %v3119_v13 = vmul.f32 %v9689_v52, %v9689_v52 }
 0x356   : > { %v3097_v63 = vadd.f32 %v3096_v21, %v9674_v24  ;;  %v3134_v34 = vadd.f32 %v3133_v50, %v3119_v13  ;;  %v8019_v29 = vpop.f32.mrb[72].mxu0 }
 0x357   : > { %v9699_v18 = vadd.f32 %v8019_v29, %v9637_v1  ;;  %v3057_v47 = vpop.f32.mrb[73].mxu0 }
 0x358   : > { %v3135_v58 = vadd.f32 %v3134_v34, %v3120_v33  ;;  %v9704_v51 = vadd.f32 %v3057_v47, %v9627_v12  ;;  %v3098_v48 = vadd.f32 %v3097_v63, %v9683_v23  ;;  %v8020_v8 = vpop.f32.mrb[74].mxu0 }
 0x359   : > { %v9708_v3 = vadd.f32 %v8020_v8, %v9640_v59  ;;  %v3060_v36 = vpop.f32.mrb[75].mxu0  ;;  %v3124_v59 = vmul.f32 %v9699_v18, %v9699_v18 }
 0x35a   : > { %v3099_v37 = vadd.f32 %v3098_v48, %v9704_v51  ;;  %v3122_v1 = vmul.f32 %v9704_v51, %v9704_v51  ;;  %v3136_v49 = vadd.f32 %v3135_v58, %v3121_v30  ;;  %v9714_v11 = vadd.f32 %v3060_v36, %v9630_v16 }
 0x35b   : > { %v3125_v16 = vmul.f32 %v9708_v3, %v9708_v3 }
 0x35c   : > { %v3137_v2 = vadd.f32 %v3136_v49, %v3122_v1  ;;  %v3100_v12 = vadd.f32 %v3099_v37, %v9714_v11  ;;  %v3123_v40 = vmul.f32 %v9714_v11, %v9714_v11 }
 0x35e   : > { %v3101_v41 = vadd.f32 %v3100_v12, %v9699_v18  ;;  %v3138_v43 = vadd.f32 %v3137_v2, %v3123_v40  ;;  %v8023_v9 = vpop.f32.mrb[76].mxu0 }
 0x35f   : > { %v9722_v60 = vadd.f32 %v8023_v9, %v2985_v10  ;;  %v3073_v26 = vpop.f32.mrb[77].mxu0  ;;  %v9793_v9 = vld [vmem:[%s3090_s21] ss:$0 sm:$0xff] }
 0x360   : > { %v3139_v7 = vadd.f32 %v3138_v43, %v3124_v59  ;;  %v9727_v42 = vadd.f32 %v3073_v26, %v9644_v27  ;;  %v3102_v31 = vadd.f32 %v3101_v41, %v9708_v3  ;;  %v8024_v54 = vpop.f32.mrb[78].mxu0 }
 0x361   : > { %v9731_v17 = vadd.f32 %v8024_v54, %v9650_v19  ;;  %v3076_v5 = vpop.f32.mrb[79].mxu0  ;;  %v3128_v27 = vmul.f32 %v9722_v60, %v9722_v60 }
 0x362   : > { %v3103_v20 = vadd.f32 %v3102_v31, %v9727_v42  ;;  %v3126_v10 = vmul.f32 %v9727_v42, %v9727_v42  ;;  %v3140_v28 = vadd.f32 %v3139_v7, %v3125_v16  ;;  %v3077_v22 = vadd.f32 %v3076_v5, %v9646_v4 }
 0x363   : > { %v3129_v19 = vmul.f32 %v9731_v17, %v9731_v17 }
 0x364   : > { %v3141_v45 = vadd.f32 %v3140_v28, %v3126_v10  ;;  %v3104_v6 = vadd.f32 %v3103_v20, %v3077_v22  ;;  %v3127_v32 = vmul.f32 %v3077_v22, %v3077_v22 }
 0x366   : > { %v3105_v35 = vadd.f32 %v3104_v6, %v9722_v60  ;;  %v3142_v15 = vadd.f32 %v3141_v45, %v3127_v32 }
 0x368   : > { %v3106_v38 = vadd.f32 %v3105_v35, %v9731_v17  ;;  %v3143_v62 = vadd.f32 %v3142_v15, %v3128_v27 }
 0x36a   : > { %v3107_v53 = vrot.slane %v3106_v38, 4  ;;  %v3144_v55 = vadd.f32 %v3143_v62, %v3129_v19 }
 0x36c   : > { %v3108_v46 = vadd.f32 %v3107_v53, %v3106_v38  ;;  %v3145_v56 = vrot.slane %v3144_v55, 4 }
 0x36e   : > { %v3109_v4 = vrot.slane %v3108_v46, 2  ;;  %v3146_v0 = vadd.f32 %v3145_v56, %v3144_v55 }
 0x370   : > { %v3110_v50 = vadd.f32 %v3109_v4, %v3108_v46  ;;  %v3147_v21 = vrot.slane %v3146_v0, 2 }
 0x372   : > { %v3111_v13 = vrot.slane %v3110_v50, 1  ;;  %v3148_v61 = vadd.f32 %v3147_v21, %v3146_v0 }
 0x374   : > { %v3112_v33 = vadd.f32 %v3111_v13, %v3110_v50  ;;  %v3149_v63 = vrot.slane %v3148_v61, 1 }
 0x376   : > { %v9743_v34 = vmul.f32 0.0078125, %v3112_v33  ;;  %v3150_v29 = vadd.f32 %v3149_v63, %v3148_v61 }
 0x378   : > { %v3151_v47 = vmul.f32 0.0078125, %v3150_v29  ;;  %v3152_v30 = vmul.f32 %v9743_v34, %v9743_v34  ;;  %v3170_v58 = vsub.f32 %v3077_v22, %v9743_v34  ;;  %v3157_v48 = vsub.f32 %v9656_v44, %v9743_v34 }
 0x379   : > { %v3158_v8 = vsub.f32 %v9662_v39, %v9743_v34  ;;  %v3159_v36 = vsub.f32 %v9653_v25, %v9743_v34  ;;  %v3160_v37 = vsub.f32 %v9659_v57, %v9743_v34  ;;  %v3161_v1 = vsub.f32 %v9679_v14, %v9743_v34 }
 0x37a   : > { %v3153_v49 = vsub.f32 %v3151_v47, %v3152_v30  ;;  %v3162_v2 = vsub.f32 %v9689_v52, %v9743_v34  ;;  %v3163_v44 = vsub.f32 %v9674_v24, %v9743_v34  ;;  %v3164_v39 = vsub.f32 %v9683_v23, %v9743_v34 }
 0x37b   : > { %v3165_v25 = vsub.f32 %v9704_v51, %v9743_v34  ;;  %v3166_v57 = vsub.f32 %v9714_v11, %v9743_v34  ;;  %v3167_v14 = vsub.f32 %v9699_v18, %v9743_v34  ;;  %v3168_v12 = vsub.f32 %v9708_v3, %v9743_v34  ;;  %v3089_v11 = vld [vmem:[%s3088_s18] sm:$0x1] }
 0x37c   : > { %v3154_v52 = vadd.f32 1e-05, %v3153_v49  ;;  %v3169_v24 = vsub.f32 %v9727_v42, %v9743_v34  ;;  %v3171_v23 = vsub.f32 %v9722_v60, %v9743_v34  ;;  %v3172_v40 = vsub.f32 %v9731_v17, %v9743_v34 }
 0x37d   : > { %v3173_v51 = vlaneseq }
 0x37e   : > { %8352 = vrsqrt.f32 %v3154_v52 }
 0x37f   : > { %v9782_v18 = vshrl.u32 %v3173_v51, 7 }
 0x381   : > { %11228 = vst [vmem:[#allocation14_spill] sm:$0xff] %v9782_v18  ;;  %v11194_v3 = vsub.s32 0, %v9782_v18 }
 0x388   : > { %v8353_v59 = vpop.eup %8352 }
 0x389   : > { %v3156_v41 = vmul.f32 %v8353_v59, %v3089_v11 }
 0x38b   : > { %v9791_v43 = vrot.slane %v3156_v41, %v11194_v3  ;;  %v10066_v3 = vld [vmem:[#allocation2 + $0x91] sm:$0xff] }
 0x38d   : > { %v3190_v26 = vmul.f32 %v9791_v43, %v3170_v58  ;;  %v3177_v16 = vmul.f32 %v9791_v43, %v3157_v48  ;;  %v3178_v7 = vmul.f32 %v9791_v43, %v3158_v8  ;;  %v3179_v42 = vmul.f32 %v9791_v43, %v3159_v36 }
 0x38e   : > { %v3180_v31 = vmul.f32 %v9791_v43, %v3160_v37  ;;  %v3181_v54 = vmul.f32 %v9791_v43, %v3161_v1  ;;  %v3182_v5 = vmul.f32 %v9791_v43, %v3162_v2  ;;  %v3183_v20 = vmul.f32 %v9791_v43, %v3163_v44 }
 0x38f   : > { %v9804_v10 = vadd.f32 %v9793_v9, %v3190_v26  ;;  %v9807_v28 = vadd.f32 %v9793_v9, %v3177_v16  ;;  %v9810_v22 = vadd.f32 %v9793_v9, %v3178_v7  ;;  %v9813_v45 = vadd.f32 %v9793_v9, %v3179_v42 }
 0x390   : > { %v9816_v6 = vadd.f32 %v9793_v9, %v3180_v31  ;;  %v9819_v32 = vadd.f32 %v9793_v9, %v3181_v54  ;;  %v9824_v15 = vadd.f32 %v9793_v9, %v3182_v5  ;;  %v9829_v62 = vadd.f32 %v9793_v9, %v3183_v20 }
 0x391   : > { %v3228_v27 = vmin.f32 %v9804_v10, 0.0  ;;  %v3215_v35 = vmin.f32 %v9807_v28, 0.0  ;;  %v3216_v19 = vmin.f32 %v9810_v22, 0.0  ;;  %v3217_v38 = vmin.f32 %v9813_v45, 0.0 }
 0x392   : > { %v3218_v46 = vmin.f32 %v9816_v6, 0.0  ;;  %v3219_v0 = vmin.f32 %v9819_v32, 0.0  ;;  %v3220_v21 = vmin.f32 %v9824_v15, 0.0  ;;  %v3221_v61 = vmin.f32 %v9829_v62, 0.0 }
 0x393   : > { %v3257_v53 = vmul.f32 1.442695, %v3228_v27  ;;  %v3231_v55 = vmul.f32 1.442695, %v3215_v35  ;;  %v3233_v56 = vmul.f32 1.442695, %v3216_v19  ;;  %v3184_v63 = vmul.f32 %v9791_v43, %v3164_v39 }
 0x394   : > { %v3235_v4 = vmul.f32 1.442695, %v3217_v38  ;;  %v3237_v50 = vmul.f32 1.442695, %v3218_v46  ;;  %v3239_v13 = vmul.f32 1.442695, %v3219_v0  ;;  %v3185_v29 = vmul.f32 %v9791_v43, %v3165_v25 }
 0x395   : > { %8354 = vpow2.f32 %v3257_v53  ;;  %v3241_v33 = vmul.f32 1.442695, %v3220_v21  ;;  %v3243_v47 = vmul.f32 1.442695, %v3221_v61  ;;  %v3186_v30 = vmul.f32 %v9791_v43, %v3166_v57  ;;  %v9889_v38 = vld [vmem:[#allocation2 + $0x11] sm:$0xff]  ;;  %v9891_v46 = vld [vmem:[#allocation2 + $0x101] sm:$0xff] }
 0x396   : > { %8356 = vpow2.f32 %v3231_v55  ;;  %v3187_v58 = vmul.f32 %v9791_v43, %v3167_v14  ;;  %v9840_v48 = vadd.f32 %v9793_v9, %v3184_v63  ;;  %v9843_v8 = vadd.f32 %v9793_v9, %v3185_v29  ;;  %11229 = vst [vmem:[#allocation15_spill] sm:$0xff] %v9889_v38  ;;  %11230 = vst [vmem:[#allocation16_spill] sm:$0xff] %v9891_v46  ;;  %v8325_v46 = vld [vmem:[%s9577_s24 + $0x188] sm:$0xff]  }
 0x397   : > { %8358 = vpow2.f32 %v3233_v56  ;;  %v3188_v36 = vmul.f32 %v9791_v43, %v3168_v12  ;;  %v9847_v37 = vadd.f32 %v9793_v9, %v3186_v30  ;;  %v3189_v49 = vmul.f32 %v9791_v43, %v3169_v24 }
 0x398   : > { %8360 = vpow2.f32 %v3235_v4  ;;  %v9850_v1 = vadd.f32 %v9793_v9, %v3187_v58  ;;  %v3222_v2 = vmin.f32 %v9840_v48, 0.0  ;;  %v3223_v44 = vmin.f32 %v9843_v8, 0.0 }
 0x399   : > { %8362 = vpow2.f32 %v3237_v50  ;;  %vm3308_vm0 = vcmp.gt.f32.partialorder %v9804_v10, 0.0  ;;  %vm3295_vm1 = vcmp.gt.f32.partialorder %v9807_v28, 0.0  ;;  %v3224_v39 = vmin.f32 %v9847_v37, 0.0  ;;  %v3539_v50 = vld [vmem:[#allocation2 + $0x1] sm:$0xff] }
 0x39a   : > { %8364 = vpow2.f32 %v3239_v13  ;;  %vm3296_vm2 = vcmp.gt.f32.partialorder %v9810_v22, 0.0  ;;  %v3245_v25 = vmul.f32 1.442695, %v3222_v2  ;;  %v3247_v57 = vmul.f32 1.442695, %v3223_v44  ;;  %v9916_v44 = vld [vmem:[#allocation2 + $0x41] sm:$0xff] }
 0x39b   : > { %8366 = vpow2.f32 %v3241_v33  ;;  %v3225_v14 = vmin.f32 %v9850_v1, 0.0  ;;  %vm3297_vm3 = vcmp.gt.f32.partialorder %v9813_v45, 0.0  ;;  %v3249_v12 = vmul.f32 1.442695, %v3224_v39  ;;  %v9899_v33 = vld [vmem:[#allocation2 + $0x21] sm:$0xff]  ;;  %11234 = vst [vmem:[#allocation20_spill] sm:$0xff] %v9916_v44 }
 0x39c   : > { %8368 = vpow2.f32 %v3243_v47  ;;  %v9862_v52 = vadd.f32 %v9793_v9, %v3188_v36  ;;  %v9865_v24 = vadd.f32 %v9793_v9, %v3189_v49  ;;  %v3191_v51 = vmul.f32 %v9791_v43, %v3171_v23  ;;  %11232 = vst [vmem:[#allocation18_spill] sm:$0xff] %v9899_v33  ;;  %v8319_v33 = vld [vmem:[%s9577_s24 + $0x118] sm:$0xff]  }
 0x39d   : > { %vm3298_vm4 = vcmp.gt.f32.partialorder %v9816_v6, 0.0  ;;  %8370 = vpow2.f32 %v3245_v25  ;;  %v3251_v59 = vmul.f32 1.442695, %v3225_v14  ;;  %v9876_v41 = vmul.f32 %v9791_v43, %v3172_v40  ;;  %v9925_v14 = vld [vmem:[#allocation2 + $0x51] sm:$0xff] }
 0x39e   : > { %vm3299_vm5 = vcmp.gt.f32.partialorder %v9819_v32, 0.0  ;;  %8372 = vpow2.f32 %v3247_v57  ;;  %v3226_v60 = vmin.f32 %v9862_v52, 0.0  ;;  %vm3300_vm6 = vcmp.gt.f32.partialorder %v9824_v15, 0.0  ;;  %11235 = vst [vmem:[#allocation21_spill] sm:$0xff] %v9925_v14 }
 0x39f   : > { %v8355_v11 = vpop.eup %8354  ;;  %8374 = vpow2.f32 %v3249_v12  ;;  %v3227_v42 = vmin.f32 %v9865_v24, 0.0  ;;  %vm3301_vm7 = vcmp.gt.f32.partialorder %v9829_v62, 0.0  ;;  %v9884_v27 = vadd.f32 %v9793_v9, %v3191_v51 }
 0x3a0   : > { %v8357_v26 = vpop.eup %8356  ;;  %v6704_v16 = vadd.f32 -1.0, %v8355_v11  ;;  %8376 = vpow2.f32 %v3251_v59  ;;  %v3253_v34 = vmul.f32 1.442695, %v3226_v60  ;;  %vm3302_vm8 = vcmp.gt.f32.partialorder %v9840_v48, 0.0 }
 0x3a1   : > { %v8359_v7 = vpop.eup %8358  ;;  %v6691_v23 = vadd.f32 -1.0, %v8357_v26  ;;  %v3255_v20 = vmul.f32 1.442695, %v3227_v42  ;;  %vm3303_vm9 = vcmp.gt.f32.partialorder %v9843_v8, 0.0  ;;  %vm3304_vm10 = vcmp.gt.f32.partialorder %v9847_v37, 0.0  ;;  %v9937_v26 = vld [vmem:[#allocation2 + $0x61] sm:$0xff] }
 0x3a2   : > { %v8361_v31 = vpop.eup %8360  ;;  %v3292_v54 = vmul.f32 1.6732632, %v6704_v16  ;;  %v6692_v17 = vadd.f32 -1.0, %v8359_v7  ;;  %8378 = vpow2.f32 %v3253_v34  ;;  %vm3305_vm11 = vcmp.gt.f32.partialorder %v9850_v1, 0.0  ;;  %11236 = vst [vmem:[#allocation22_spill] sm:$0xff] %v9937_v26  ;;  %v3507_v7 = vld [vmem:[#allocation2] sm:$0xff] }
 0x3a3   : > { %v8363_v40 = vpop.eup %8362  ;;  %v3279_v43 = vmul.f32 1.6732632, %v6691_v23  ;;  %v6693_v5 = vadd.f32 -1.0, %v8361_v31  ;;  %8380 = vpow2.f32 %v3255_v20  ;;  %v9942_v23 = vld [vmem:[#allocation2 + $0x2] sm:$0xff]  ;;  %v9947_v31 = vld [vmem:[#allocation2 + $0x71] sm:$0xff]  ;;  %v3229_v34 = vmin.f32 %v9884_v27, 0.0 }
 0x3a4   : > { %v8365_v35 = vpop.eup %8364  ;;  %v3324_v19 = vsel %vm3308_vm0, %v9804_v10, %v3292_v54  ;;  %v3280_v53 = vmul.f32 1.6732632, %v6692_v17  ;;  %v6694_v55 = vadd.f32 -1.0, %v8363_v40  ;;  %11237 = vst [vmem:[#allocation23_spill] sm:$0xff] %v9947_v31  ;;  %vm3306_vm12 = vcmp.gt.f32.partialorder %v9862_v52, 0.0 }
 0x3a5   : > { %v8367_v56 = vpop.eup %8366  ;;  %v9893_v4 = vmul.f32 1.050701, %v3324_v19  ;;  %v3311_v0 = vsel %vm3295_vm1, %v9807_v28, %v3279_v43  ;;  %v3281_v21 = vmul.f32 1.6732632, %v6693_v5  ;;  %v6695_v13 = vadd.f32 -1.0, %v8365_v35  ;;  %v9907_v28 = vld [vmem:[#allocation2 + $0x31] sm:$0xff] }
 0x3a6   : > { %v8369_v10 = vpop.eup %8368  ;;  %v3327_v61 = vmul.f32 1.050701, %v3311_v0  ;;  %v3312_v63 = vsel %vm3296_vm2, %v9810_v22, %v3280_v53  ;;  %v3282_v29 = vmul.f32 1.6732632, %v6694_v55  ;;  %v6696_v47 = vadd.f32 -1.0, %v8367_v56  ;;  %11233 = vst [vmem:[#allocation19_spill] sm:$0xff] %v9907_v28 }
 0x3a7   : > { %11231 = vst [vmem:[#allocation17_spill] sm:$0xff] %v9893_v4  ;;  %v9905_v30 = vmul.f32 1.050701, %v3312_v63  ;;  %v3313_v58 = vsel %vm3297_vm3, %v9813_v45, %v3281_v21  ;;  %v3283_v36 = vmul.f32 1.6732632, %v6695_v13  ;;  %v6697_v49 = vadd.f32 -1.0, %v8369_v10  ;;  %v8371_v45 = vpop.eup %8370 }
 0x3a8   : > { %3356 = vst [vmem:[#allocation2 + $0x101] sm:$0xff] %v9893_v4  ;;  %3343 = vst [vmem:[#allocation2 + $0x11] sm:$0xff] %v3327_v61  ;;  %v3555_v22 = vpack.c.bf16 %v3327_v61, %v3539_v50  ;;  %v9914_v2 = vmul.f32 1.050701, %v3313_v58  ;;  %v3314_v39 = vsel %vm3298_vm4, %v9816_v6, %v3282_v29  ;;  %v3284_v25 = vmul.f32 1.6732632, %v6696_v47  ;;  %v8373_v11 = vpop.eup %8372 }
 0x3a9   : > { %3344 = vst [vmem:[#allocation2 + $0x21] sm:$0xff] %v9905_v30  ;;  %v9923_v57 = vmul.f32 1.050701, %v3314_v39  ;;  %v3315_v12 = vsel %vm3299_vm5, %v9819_v32, %v3283_v36  ;;  %v3285_v51 = vmul.f32 1.6732632, %v6697_v49  ;;  %v6698_v60 = vadd.f32 -1.0, %v8371_v45  ;;  %v8375_v32 = vpop.eup %8374 }
 0x3aa   : > { %4337 = vmatprep.mubr.bf16.mxu1 %v3555_v22  ;;  %3345 = vst [vmem:[#allocation2 + $0x31] sm:$0xff] %v9914_v2  ;;  %v9933_v6 = vpack.c.bf16 %v9914_v2, %v9905_v30  ;;  %v9935_v59 = vmul.f32 1.050701, %v3315_v12  ;;  %v3316_v16 = vsel %vm3300_vm6, %v9824_v15, %v3284_v25  ;;  %v6699_v17 = vadd.f32 -1.0, %v8373_v11  ;;  %v8377_v15 = vpop.eup %8376  ;;  %v9960_v5 = vld [vmem:[#allocation2 + $0x81] sm:$0xff]  ;;  %v9973_v21 = vld [vmem:[#allocation2 + $0xb1] sm:$0xff] }
 0x3ab   : > { %3346 = vst [vmem:[#allocation2 + $0x41] sm:$0xff] %v9923_v57  ;;  %v9945_v42 = vmul.f32 1.050701, %v3316_v16  ;;  %v3317_v54 = vsel %vm3301_vm7, %v9829_v62, %v3285_v51  ;;  %11239 = vst [vmem:[#allocation25_spill] sm:$0xff] %v9960_v5  ;;  %v3286_v20 = vmul.f32 1.6732632, %v6698_v60  ;;  %v9981_v63 = vadd.f32 %v9793_v9, %v9876_v41 }
 0x3ac   : > { %3347 = vst [vmem:[#allocation2 + $0x51] sm:$0xff] %v9935_v59  ;;  %v9956_v40 = vpack.c.bf16 %v9935_v59, %v9923_v57  ;;  %v9958_v43 = vmul.f32 1.050701, %v3317_v54  ;;  %v6700_v35 = vadd.f32 -1.0, %v8375_v32  ;;  %v3287_v62 = vmul.f32 1.6732632, %v6699_v17  ;;  %v8379_v55 = vpop.eup %8378 }
 0x3ad   : > { %3348 = vst [vmem:[#allocation2 + $0x61] sm:$0xff] %v9945_v42  ;;  %v6701_v19 = vadd.f32 -1.0, %v8377_v15  ;;  %v3259_v53 = vmul.f32 1.442695, %v3229_v34  ;;  %v8313_v56 = vld [vmem:[%s9577_s24 + $0x100] sm:$0xff]   ;;  %v3318_v50 = vsel %vm3302_vm8, %v9840_v48, %v3286_v20  ;;  %11240 = vst [vmem:[#allocation26_spill] sm:$0xff] %v9973_v21 }
 0x3ae   : > { %11238 = vst [vmem:[#allocation24_spill] sm:$0xff] %v9958_v43  ;;  %3349 = vst [vmem:[#allocation2 + $0x71] sm:$0xff] %v9958_v43  ;;  %v9968_v0 = vpack.c.bf16 %v9958_v43, %v9945_v42  ;;  %v9975_v13 = vld [vmem:[#allocation2 + $0xa1] sm:$0xff]  ;;  %v3288_v61 = vmul.f32 1.6732632, %v6700_v35  ;;  %v3319_v48 = vsel %vm3303_vm9, %v9843_v8, %v3287_v62  ;;  %v10000_v12 = vld [vmem:[#allocation2 + $0xd1] sm:$0xff]  ;;  %v8381_v35 = vpop.eup %8380 }
 0x3af   : > { %v9977_v10 = vld [vmem:[#allocation2 + $0xc1] sm:$0xff]  ;;  %v3603_v29 = vld [vmem:[#allocation2 + $0x10] sm:$0xff]  ;;  %v9986_v36 = vmul.f32 1.050701, %v3318_v50  ;;  %v3289_v49 = vmul.f32 1.6732632, %v6701_v19  ;;  %8382 = vpow2.f32 %v3259_v53 }
 0x3b0   : > { %11241 = vst [vmem:[#allocation27_spill] sm:$0xff] %v9977_v10  ;;  %v9983_v47 = vld [vmem:[#allocation2 + $0x12] sm:$0xff]  ;;  %v8314_v58 = vld [vmem:[%s9577_s24 + $0x148] sm:$0xff]   ;;  %v3604_v22 = vld [vmem:[#allocation2 + $0x20] sm:$0xff]  ;;  %v3523_v39 = vpack.c.bf16 %v3603_v29, %v3507_v7  ;;  %v9995_v41 = vmul.f32 1.050701, %v3319_v48  ;;  %v3320_v45 = vsel %vm3304_vm10, %v9847_v37, %v3288_v61 }
 0x3b1   : > { %v3587_v25 = vpack.c.bf16 %v9983_v47, %v9942_v23  ;;  %v9993_v9 = vld [vmem:[#allocation2 + $0x22] sm:$0xff]  ;;  %11242 = vst [vmem:[#allocation28_spill] sm:$0xff] %v10000_v12  ;;  %v3619_v8 = vpack.c.bf16 %v3604_v22, %v3603_v29  ;;  %v3605_v51 = vld [vmem:[#allocation2 + $0x30] sm:$0xff]  ;;  %3350 = vst [vmem:[#allocation2 + $0x81] sm:$0xff] %v9986_v36  ;;  %v10005_v16 = vmul.f32 1.050701, %v3320_v45  ;;  %v3321_v60 = vsel %vm3305_vm11, %v9850_v1, %v3289_v49 }
 0x3b2   : > { %v10002_v11 = vld [vmem:[#allocation2 + $0x32] sm:$0xff]  ;;  %v6702_v32 = vadd.f32 -1.0, %v8379_v55  ;;  %v8323_v7 = vld [vmem:[%s9577_s24 + $0x180] sm:$0xff]   ;;  %4338 = vmatmul.mubr.bf16.vlgmr.msra.gmra.mrb[64].mxu1 %v3523_v39  ;;  %v10011_v23 = vpack.c.bf16 %v3605_v51, %v3604_v22  ;;  %v8315_v17 = vld [vmem:[%s9577_s24 + $0x108] sm:$0xff]   ;;  %3351 = vst [vmem:[#allocation2 + $0xb1] sm:$0xff] %v9995_v41  ;;  %vm3307_vm13 = vcmp.gt.f32.partialorder %v9865_v24, 0.0 }
 0x3b3   : > { %11243 = vst [vmem:[#allocation29_spill] sm:$0xff] %v10005_v16  ;;  %v3606_v37 = vld [vmem:[#allocation2 + $0x40] sm:$0xff]  ;;  %v10021_v20 = vmul.f32 1.050701, %v3321_v60  ;;  %v8324_v1 = vld [vmem:[%s9577_s24 + $0x1c8] sm:$0xff]   ;;  %4434 = vmatprep.mubr.bf16.mxu0 %v3619_v8  ;;  %4345 = vmatprep.mubr.bf16.mxu1 %v9933_v6  ;;  %v10025_v19 = vld [vmem:[#allocation2 + $0x50] sm:$0xff]  ;;  %v11256_v14 = vpack.c.bf16 %v10002_v11, %v9993_v9 }
 0x3b4   : > { %v10016_v34 = vld [vmem:[#allocation2 + $0x42] sm:$0xff]  ;;  %v3620_v62 = vpack.c.bf16 %v3606_v37, %v3605_v51  ;;  %v10027_v53 = vld [vmem:[#allocation2 + $0x52] sm:$0xff]  ;;  %3352 = vst [vmem:[#allocation2 + $0xc1] sm:$0xff] %v10005_v16  ;;  %v3290_v61 = vmul.f32 1.6732632, %v6702_v32  ;;  %v3230_v29 = vmin.f32 %v9981_v63, 0.0  ;;  %4435 = vmatmul.mubr.bf16.vlgmr.msra.gmra.mrb[80].mxu0 %v3587_v25  ;;  %7546 = vmatpush3.bf16.msra.mxu1 %v8313_v56  ;;  %v10038_v49 = vpack.c.bf16 %v10025_v19, %v3606_v37 }
 0x3b5   : > { %v8316_v55 = vld [vmem:[%s9577_s24 + $0x150] sm:$0xff]   ;;  %v10031_v50 = vld [vmem:[#allocation2 + $0xe1] sm:$0xff]  ;;  %3353 = vst [vmem:[#allocation2 + $0xd1] sm:$0xff] %v10021_v20  ;;  %v10047_v45 = vpack.c.bf16 %v10021_v20, %v10005_v16  ;;  %v6703_v8 = vadd.f32 -1.0, %v8381_v35  ;;  %7547 = vmatprep.subr.bf16.mxu1 %v8314_v58  ;;  %7610 = vmatpush3.bf16.msra.mxu0 %v8323_v7  ;;  %v8330_v12 = vld [vmem:[%s9577_s24 + $0x1d8] sm:$0xff]   ;;  %vm3309_vm14 = vcmp.gt.f32.partialorder %v9884_v27, 0.0 }
 0x3b6   : > { %11244 = vst [vmem:[#allocation30_spill] sm:$0xff] %v10031_v50  ;;  %v10035_v48 = vld [vmem:[#allocation2 + $0x60] sm:$0xff]  ;;  %v10049_v25 = vld [vmem:[#allocation2 + $0x11] sm:$0xff]  ;;  %4442 = vmatprep.mubr.bf16.mxu0 %v3620_v62  ;;  %v3322_v35 = vsel %vm3306_vm12, %v9862_v52, %v3290_v61  ;;  %v3261_v62 = vmul.f32 1.442695, %v3230_v29  ;;  %7611 = vmatprep.subr.bf16.mxu0 %v8324_v1  ;;  %vm3310_vm15 = vcmp.gt.f32.partialorder %v9981_v63, 0.0 }
 0x3b7   : > { %v10042_v39 = vld [vmem:[#allocation2 + $0x62] sm:$0xff]  ;;  %v10053_v51 = vld [vmem:[#allocation2 + $0x70] sm:$0xff]  ;;  %v10075_v54 = vmul.f32 1.050701, %v3322_v35  ;;  %v3291_v61 = vmul.f32 1.6732632, %v6703_v8  ;;  %v11257_v43 = vpack.c.bf16 %v10035_v48, %v10025_v19 }
 0x3b8   : > { %v10055_v60 = vld [vmem:[#allocation2 + $0x72] sm:$0xff]  ;;  %v10057_v32 = vld [vmem:[#allocation2 + $0xa0] sm:$0xff]  ;;  %v10071_v22 = vpack.c.bf16 %v10053_v51, %v10035_v48  ;;  %8384 = vpow2.f32 %v3261_v62  ;;  %7548 = vmatpush3.bf16.msra.mxu1 %v8315_v17 }
 0x3b9   : > { %v10059_v37 = vld [vmem:[#allocation2 + $0xa2] sm:$0xff]  ;;  %v8317_v15 = vld [vmem:[%s9577_s24 + $0x110] sm:$0xff]   ;;  %v8318_v29 = vld [vmem:[%s9577_s24 + $0x158] sm:$0xff]   ;;  %3354 = vst [vmem:[#allocation2 + $0xe1] sm:$0xff] %v10075_v54  ;;  %v3323_v1 = vsel %vm3307_vm13, %v9865_v24, %v3291_v61  ;;  %v8383_v10 = vpop.eup %8382  ;;  %7549 = vmatprep.subr.bf16.mxu1 %v8316_v55  ;;  %7612 = vmatpush3.bf16.msra.mxu0 %v8325_v46 }
 0x3ba   : > { %v10078_v52 = vld [vmem:[#allocation2 + $0xf1] sm:$0xff]  ;;  %v10090_v7 = vld [vmem:[#allocation2 + $0x80] sm:$0xff]  ;;  %v10115_v21 = vmul.f32 1.050701, %v3323_v1  ;;  %4346 = vmatmul.mubr.bf16.gmra.mrb[68].mxu1 %v10011_v23  ;;  %v6705_v17 = vadd.f32 -1.0, %v8383_v10 }
 0x3bb   : > { %11245 = vst [vmem:[#allocation31_spill] sm:$0xff] %v10078_v52  ;;  %v8327_v58 = vld [vmem:[%s9577_s24 + $0x1d0] sm:$0xff]   ;;  %v10101_v35 = vld [vmem:[#allocation2 + $0x82] sm:$0xff]  ;;  %4353 = vmatprep.mubr.bf16.mxu1 %v9956_v40  ;;  %v8331_v10 = vld [vmem:[%s9577_s24 + $0x198] sm:$0xff]  }
 0x3bc   : > { %v10088_v56 = vld [vmem:[#allocation2 + $0x90] sm:$0xff]  ;;  %v10105_v50 = vld [vmem:[#allocation2 + $0x22] sm:$0xff]  ;;  %11249 = vst [vmem:[#allocation35_spill] sm:$0xff] %v10115_v21  ;;  %7613 = vmatprep.subr.bf16.mxu0 %v8327_v58  ;;  %3355 = vst [vmem:[#allocation2 + $0xf1] sm:$0xff] %v10115_v21  ;;  %v10151_v46 = vpack.c.bf16 %v10115_v21, %v10075_v54  ;;  %4443 = vmatmul.mubr.bf16.gmra.mrb[84].mxu0 %v11256_v14 }
 0x3bd   : > { %11246 = vst [vmem:[#allocation32_spill] sm:$0xff] %v10088_v56  ;;  %v8329_v8 = vld [vmem:[%s9577_s24 + $0x190] sm:$0xff]   ;;  %11247 = vst [vmem:[#allocation33_spill] sm:$0xff] %v10105_v50  ;;  %v10122_v31 = vld [vmem:[#allocation2 + $0x42] sm:$0xff]  ;;  %7550 = vmatpush3.bf16.msra.mxu1 %v8317_v15  ;;  %v3293_v56 = vmul.f32 1.6732632, %v6705_v17  ;;  %4450 = vmatprep.mubr.bf16.mxu0 %v11257_v43  ;;  %v11262_v50 = vpack.c.bf16 %v10090_v7, %v10053_v51 }
 0x3be   : > { %v10107_v52 = vld [vmem:[#allocation2 + $0x32] sm:$0xff]  ;;  %11250 = vst [vmem:[#allocation36_spill] sm:$0xff] %v10122_v31  ;;  %v10129_v24 = vld [vmem:[#allocation2 + $0xc0] sm:$0xff]  ;;  %7551 = vmatprep.subr.bf16.mxu1 %v8318_v29  ;;  %7614 = vmatpush3.bf16.msra.mxu0 %v8329_v8  ;;  %v8328_v31 = vld [vmem:[%s9577_s24 + $0x128] sm:$0xff]  }
 0x3bf   : > { %11248 = vst [vmem:[#allocation34_spill] sm:$0xff] %v10107_v52  ;;  %v10111_v61 = vld [vmem:[#allocation2 + $0xb0] sm:$0xff]  ;;  %v10135_v5 = vld [vmem:[#allocation2 + $0xc2] sm:$0xff]  ;;  %v3325_v43 = vsel %vm3309_vm14, %v9884_v27, %v3293_v56  ;;  %7615 = vmatprep.subr.bf16.mxu0 %v8330_v12 }
 0x3c0   : > { %v10113_v62 = vld [vmem:[#allocation2 + $0xb2] sm:$0xff]  ;;  %11253 = vst [vmem:[#allocation39_spill] sm:$0xff] %v10135_v5  ;;  %v10139_v28 = vld [vmem:[#allocation2 + $0x62] sm:$0xff]  ;;  %v10197_v15 = vmul.f32 1.050701, %v3325_v43 }
 0x3c1   : > { %v10124_v26 = vld [vmem:[#allocation2 + $0x52] sm:$0xff]  ;;  %11254 = vst [vmem:[#allocation40_spill] sm:$0xff] %v10139_v28  ;;  %v8320_v14 = vld [vmem:[%s9577_s24 + $0x160] sm:$0xff]   ;;  %7552 = vmatpush3.bf16.msra.mxu1 %v8319_v33  ;;  %v8326_v12 = vld [vmem:[%s9577_s24 + $0x168] sm:$0xff]  }
 0x3c2   : > { %11251 = vst [vmem:[#allocation37_spill] sm:$0xff] %v10124_v26  ;;  %v10126_v55 = vld [vmem:[#allocation2 + $0x92] sm:$0xff]  ;;  %v10194_v17 = vld [vmem:[#allocation2 + $0xe2] sm:$0xff]  ;;  %11259 = vst [vmem:[#allocation43_spill] sm:$0xff] %v10197_v15  ;;  %v8385_v29 = vpop.eup %8384  ;;  %7553 = vmatprep.subr.bf16.mxu1 %v8320_v14  ;;  %v10210_v43 = vpack.c.bf16 %v10197_v15, %v9893_v4  ;;  %4354 = vmatmul.mubr.bf16.gmra.mrb[72].mxu1 %v10038_v49  ;;  %v11265_v4 = vpack.c.bf16 %v10055_v60, %v10042_v39 }
 0x3c3   : > { %11252 = vst [vmem:[#allocation38_spill] sm:$0xff] %v10126_v55  ;;  %v10144_v38 = vld [vmem:[#allocation2 + $0xd0] sm:$0xff]  ;;  %v8333_v8 = vld [vmem:[%s9577_s24 + $0x1e0] sm:$0xff]   ;;  %7616 = vmatpush3.bf16.msra.mxu0 %v8331_v10  ;;  %v6706_v14 = vadd.f32 -1.0, %v8385_v29  ;;  %4361 = vmatprep.mubr.bf16.mxu1 %v9968_v0  ;;  %v8336_v10 = vld [vmem:[%s9577_s24 + $0x1e8] sm:$0xff]   ;;  %v11261_v29 = vpack.c.bf16 %v10027_v53, %v10016_v34 }
 0x3c4   : > { %v10146_v1 = vld [vmem:[#allocation2 + $0xd2] sm:$0xff]  ;;  %v10163_v58 = vpack.c.bf16 %v10144_v38, %v10129_v24  ;;  %v8322_v56 = vld [vmem:[%s9577_s24 + $0x120] sm:$0xff]   ;;  %7617 = vmatprep.subr.bf16.mxu0 %v8333_v8 }
 0x3c5   : > { %v10155_v44 = vld [vmem:[#allocation2 + $0x72] sm:$0xff]  ;;  %v10167_v18 = vpack.c.bf16 %v10146_v1, %v10135_v5  ;;  %v10192_v5 = vld [vmem:[#allocation2 + $0xe0] sm:$0xff]  ;;  %4451 = vmatmul.mubr.bf16.gmra.mrb[88].mxu0 %v11261_v29  ;;  %7554 = vmatpush3.bf16.msra.mxu1 %v8322_v56  ;;  %v3294_v26 = vmul.f32 1.6732632, %v6706_v14  ;;  %v8337_v56 = vld [vmem:[%s9577_s24 + $0x1a8] sm:$0xff]  }
 0x3c6   : > { %11255 = vst [vmem:[#allocation41_spill] sm:$0xff] %v10155_v44  ;;  %v10183_v16 = vld [vmem:[#allocation2 + $0x111] sm:$0xff]  ;;  %v10202_v19 = vld [vmem:[#allocation2 + $0x100] sm:$0xff]  ;;  %4458 = vmatprep.mubr.bf16.mxu0 %v11262_v50  ;;  %7555 = vmatprep.subr.bf16.mxu1 %v8326_v12 }
 0x3c7   : > { %11258 = vst [vmem:[#allocation42_spill] sm:$0xff] %v10183_v16  ;;  %3357 = vst [vmem:[#allocation2 + $0x111] sm:$0xff] %v10197_v15  ;;  %v10212_v33 = vld [vmem:[#allocation2 + $0x102] sm:$0xff]  ;;  %v10215_v27 = vld [vmem:[#allocation2 + $0xf0] sm:$0xff]  ;;  %v3326_v29 = vsel %vm3310_vm15, %v9981_v63, %v3294_v26 }
 0x3c8   : > { %v10217_v16 = vld [vmem:[#allocation2 + $0xf2] sm:$0xff]  ;;  %v8335_v48 = vld [vmem:[%s9577_s24 + $0x1a0] sm:$0xff]   ;;  %v10225_v28 = vpack.c.bf16 %v10215_v27, %v10192_v5  ;;  %v10249_v21 = vmul.f32 1.050701, %v3326_v29  ;;  %v11264_v29 = vpack.c.bf16 %v9995_v41, %v9975_v13 }
 0x3c9   : > { %11260 = vst [vmem:[#allocation44_spill] sm:$0xff] %v10217_v16  ;;  %v10229_v44 = vpack.c.bf16 %v10217_v16, %v10194_v17  ;;  %v8332_v52 = vld [vmem:[%s9577_s24 + $0x170] sm:$0xff]   ;;  %v10243_v8 = vld [vmem:[#allocation2 + $0x121] sm:$0xff]  ;;  %7618 = vmatpush3.bf16.msra.mxu0 %v8335_v48  ;;  %7556 = vmatpush3.bf16.msra.mxu1 %v8328_v31  ;;  %v8338_v48 = vld [vmem:[%s9577_s24 + $0x178] sm:$0xff]   ;;  %v11266_v31 = vpack.c.bf16 %v10129_v24, %v10111_v61 }
 0x3ca   : > { %11263 = vst [vmem:[#allocation45_spill] sm:$0xff] %v10243_v8  ;;  %v10247_v14 = vld [vmem:[#allocation2 + $0x131] sm:$0xff]  ;;  %7619 = vmatprep.subr.bf16.mxu0 %v8336_v10  ;;  %7557 = vmatprep.subr.bf16.mxu1 %v8332_v52  ;;  %3358 = vst [vmem:[#allocation2 + $0x121] sm:$0xff] %v10249_v21  ;;  %v8344_v10 = vld [vmem:[%s9577_s24 + $0x200] sm:$0xff]  }
 0x3cb   : > { %v8339_v55 = vld [vmem:[%s9577_s24 + $0x1f0] sm:$0xff]   ;;  %4362 = vmatmul.mubr.bf16.gmra.mrb[76].mxu1 %v10071_v22  ;;  %v8342_v8 = vld [vmem:[%s9577_s24 + $0x1f8] sm:$0xff]  }
 0x3cc   : > { %v8334_v51 = vld [vmem:[%s9577_s24 + $0x130] sm:$0xff]   ;;  %4369 = vmatprep.mubr.bf16.mxu1 %v11264_v29  ;;  %v8340_v16 = vld [vmem:[%s9577_s24 + $0x138] sm:$0xff]  }
 0x3cd   : > { %7620 = vmatpush3.bf16.msra.mxu0 %v8337_v56  ;;  %v8341_v52 = vld [vmem:[%s9577_s24 + $0x1b0] sm:$0xff]   ;;  %7558 = vmatpush3.bf16.msra.mxu1 %v8334_v51  ;;  %v8343_v56 = vld [vmem:[%s9577_s24 + $0x1b8] sm:$0xff]  }
 0x3ce   : > { %v3617_v50 = vld [vmem:[#allocation2 + $0x110] sm:$0xff]  ;;  %7621 = vmatprep.subr.bf16.mxu0 %v8339_v55  ;;  %4459 = vmatmul.mubr.bf16.gmra.mrb[92].mxu0 %v11265_v4 }
 0x3cf   : > { %v10253_v12 = vld [vmem:[#allocation2 + $0x112] sm:$0xff]  ;;  %v10257_v26 = vpack.c.bf16 %v3617_v50, %v10202_v19  ;;  %4466 = vmatprep.mubr.bf16.mxu0 %v11266_v31  ;;  %7559 = vmatprep.subr.bf16.mxu1 %v8338_v48  ;;  %v10420_v31 = vld [vmem:[%s3505_s29] ss:$0 sm:$0xff] }
 0x3d0   : > { %v10261_v63 = vpack.c.bf16 %v10253_v12, %v10212_v33  ;;  %v10283_v15 = vld [vmem:[#allocation2 + $0x130] sm:$0xff] }
 0x3d1   : > { %7622 = vmatpush3.bf16.msra.mxu0 %v8341_v52  ;;  %v10285_v13 = vld [vmem:[#allocation2 + $0x132] sm:$0xff]  ;;  %v10287_v55 = vld [vmem:[#allocation2 + $0x120] sm:$0xff]  ;;  %7560 = vmatpush3.bf16.msra.mxu1 %v8340_v16  ;;  %v11268_v16 = vpack.c.bf16 %v10113_v62, %v10059_v37  ;;  %v11272_v37 = vpack.c.bf16 %v9905_v30, %v10049_v25  ;;  %v11274_v30 = vpack.c.bf16 %v9923_v57, %v9914_v2 }
 0x3d2   : > { %7623 = vmatprep.subr.bf16.mxu0 %v8342_v8  ;;  %v10289_v29 = vld [vmem:[#allocation2 + $0x122] sm:$0xff]  ;;  %v3626_v4 = vpack.c.bf16 %v10287_v55, %v3617_v50  ;;  %8025 = vmatprep.subr.bf16.mxu1 %v8344_v10  ;;  %v3722_v51 = vpack.c.bf16 %v10283_v15, %v10287_v55  ;;  %v11267_v8 = vpack.c.bf16 %v10111_v61, %v10057_v32 }
 0x3d3   : > { %v3690_v24 = vpack.c.bf16 %v10289_v29, %v10253_v12  ;;  %v3786_v48 = vpack.c.bf16 %v10285_v13, %v10289_v29  ;;  %v11269_v50 = vpack.c.bf16 %v10192_v5, %v10144_v38  ;;  %v11270_v32 = vpack.c.bf16 %v10202_v19, %v10215_v27  ;;  %v8345_v5 = vld [vmem:[%s9577_s24 + $0x208] sm:$0xff]   ;;  %v11300_v19 = vld [vmem:[#allocation37_spill] sm:$0xff]  ;;  %v11301_v27 = vld [vmem:[#allocation36_spill] sm:$0xff] }
 0x3d4   : > { %4370 = vmatmul.mubr.bf16.gmra.mrb[80].mxu1 %v11267_v8  ;;  %v11271_v38 = vpack.c.bf16 %v9993_v9, %v9983_v47  ;;  %v11273_v61 = vpack.c.bf16 %v10016_v34, %v10002_v11  ;;  %v8346_v47 = vld [vmem:[%s9577_s24 + $0x210] sm:$0xff]   ;;  %v11275_v9 = vpack.c.bf16 %v10042_v39, %v10027_v53  ;;  %v8348_v11 = vld [vmem:[%s9577_s24 + $0x220] sm:$0xff]   ;;  %v11276_v2 = vpack.c.bf16 %v9945_v42, %v9935_v59  ;;  %v11281_v42 = vld [vmem:[#allocation39_spill] sm:$0xff] }
 0x3d5   : > { %7624 = vmatpush3.bf16.msra.mxu0 %v8343_v56  ;;  %4377 = vmatprep.mubr.bf16.mxu1 %v10047_v45  ;;  %v11277_v57 = vpack.c.bf16 %v10101_v35, %v10055_v60  ;;  %v11278_v34 = vpack.c.bf16 %v10066_v3, %v9986_v36  ;;  %v11279_v53 = vld [vmem:[#allocation24_spill] sm:$0xff]  ;;  %v11285_v3 = vld [vmem:[#allocation29_spill] sm:$0xff]  ;;  %v11288_v60 = vpack.c.bf16 %v10075_v54, %v10021_v20  ;;  %v11295_v20 = vld [vmem:[#allocation43_spill] sm:$0xff] }
 0x3d6   : > { %4467 = vmatmul.mubr.bf16.gmra.mrb[96].mxu0 %v11268_v16  ;;  %v11280_v59 = vpack.c.bf16 %v9986_v36, %v11279_v53  ;;  %v11283_v39 = vld [vmem:[#allocation32_spill] sm:$0xff]  ;;  %v11286_v25 = vpack.c.bf16 %v11285_v3, %v9995_v41  ;;  %v11287_v36 = vpack.c.bf16 %v10194_v17, %v10146_v1  ;;  %v11291_v41 = vld [vmem:[#allocation17_spill] sm:$0xff]  ;;  %v11294_v54 = vpack.c.bf16 %v10247_v14, %v10249_v21 }
 0x3d7   : > { %4474 = vmatprep.mubr.bf16.mxu0 %v11269_v50  ;;  %v11304_v12 = vld [vmem:[#allocation40_spill] sm:$0xff] }
 0x3dc   : > { %4378 = vmatmul.mubr.bf16.gmra.mrb[84].mxu1 %v10163_v58 }
 0x3dd   : > { %4385 = vmatprep.mubr.bf16.mxu1 %v10151_v46 }
 0x3de   : > { %4475 = vmatmul.mubr.bf16.gmra.mrb[100].mxu0 %v10167_v18 }
 0x3df   : > { %4482 = vmatprep.mubr.bf16.mxu0 %v11270_v32 }
 0x3e4   : > { %4386 = vmatmul.mubr.bf16.gmra.mrb[88].mxu1 %v10225_v28 }
 0x3e5   : > { %4393 = vmatprep.mubr.bf16.mxu1 %v10210_v43 }
 0x3e6   : > { %4483 = vmatmul.mubr.bf16.gmra.mrb[104].mxu0 %v10229_v44 }
 0x3e7   : > { %4490 = vmatprep.mubr.bf16.mxu0 %v3626_v4 }
 0x3ec   : > { %4394 = vmatmul.mubr.bf16.gmra.mrb[92].mxu1 %v10257_v26 }
 0x3ed   : > { %4531 = vmatprep.mubr.bf16.mxu1 %v11271_v38 }
 0x3ee   : > { %4491 = vmatmul.mubr.bf16.gmra.mrb[108].mxu0 %v10261_v63 }
 0x3ef   : > { %4628 = vmatprep.mubr.bf16.mxu0 %v9933_v6  ;;  %v8347_v6 = vld [vmem:[%s9577_s24 + $0x218] sm:$0xff]  }
 0x3f4   : > { %4532 = vmatmul.mubr.bf16.vlgmr.msra.gmra.mrb[96].mxu1 %v11272_v37 }
 0x3f5   : > { %4539 = vmatprep.mubr.bf16.mxu1 %v11273_v61  ;;  %8026 = vmatpush3.bf16.msra.mxu1 %v8344_v10 }
 0x3f6   : > { %4629 = vmatmul.mubr.bf16.vlgmr.msra.gmra.mrb[112].mxu0 %v10011_v23  ;;  %8027 = vmatprep.subr.bf16.mxu1 %v8345_v5  ;;  %v8350_v23 = vld [vmem:[%s9577_s24 + $0x230] sm:$0xff]  }
 0x3f7   : > { %4636 = vmatprep.mubr.bf16.mxu0 %v9956_v40  ;;  %v8349_v40 = vld [vmem:[%s9577_s24 + $0x228] sm:$0xff]  }
 0x3f9   : > { %8028 = vmatpush3.bf16.msra.mxu1 %v8345_v5 }
 0x3fa   : > { %8029 = vmatprep.subr.bf16.mxu1 %v8346_v47 }
 0x3fc   : > { %4540 = vmatmul.mubr.bf16.gmra.mrb[100].mxu1 %v11274_v30 }
 0x3fd   : > { %4547 = vmatprep.mubr.bf16.mxu1 %v11275_v9  ;;  %8030 = vmatpush3.bf16.msra.mxu1 %v8346_v47 }
 0x3fe   : > { %4637 = vmatmul.mubr.bf16.gmra.mrb[116].mxu0 %v10038_v49  ;;  %8031 = vmatprep.subr.bf16.mxu1 %v8347_v6  ;;  %v11282_v49 = vpack.c.bf16 %v11281_v42, %v10113_v62  ;;  %v11292_v62 = vld [vmem:[#allocation35_spill] sm:$0xff] }
 0x3ff   : > { %4644 = vmatprep.mubr.bf16.mxu0 %v9968_v0  ;;  %v8351_v0 = vld [vmem:[%s9577_s24 + $0x238] sm:$0xff]   ;;  %v11293_v1 = vpack.c.bf16 %v11291_v41, %v11292_v62 }
 0x401   : > { %8032 = vmatpush3.bf16.msra.mxu1 %v8347_v6 }
 0x402   : > { %8033 = vmatprep.subr.bf16.mxu1 %v8348_v11 }
 0x404   : > { %4548 = vmatmul.mubr.bf16.gmra.mrb[104].mxu1 %v11276_v2 }
 0x405   : > { %4555 = vmatprep.mubr.bf16.mxu1 %v11277_v57  ;;  %8034 = vmatpush3.bf16.msra.mxu1 %v8348_v11 }
 0x406   : > { %4645 = vmatmul.mubr.bf16.gmra.mrb[120].mxu0 %v10071_v22  ;;  %8035 = vmatprep.subr.bf16.mxu1 %v8349_v40  ;;  %v11284_v22 = vpack.c.bf16 %v11283_v39, %v10090_v7  ;;  %v11289_v7 = vld [vmem:[#allocation44_spill] sm:$0xff] }
 0x407   : > { %4652 = vmatprep.mubr.bf16.mxu0 %v11278_v34 }
 0x409   : > { %8036 = vmatpush3.bf16.msra.mxu1 %v8349_v40 }
 0x40a   : > { %8037 = vmatprep.subr.bf16.mxu1 %v8350_v23 }
 0x40c   : > { %4556 = vmatmul.mubr.bf16.gmra.mrb[108].mxu1 %v11280_v59 }
 0x40d   : > { %4563 = vmatprep.mubr.bf16.mxu1 %v11282_v49  ;;  %8038 = vmatpush3.bf16.msra.mxu1 %v8350_v23 }
 0x40e   : > { %4653 = vmatmul.mubr.bf16.gmra.mrb[124].mxu0 %v11284_v22  ;;  %8039 = vmatprep.subr.bf16.mxu1 %v8351_v0 }
 0x40f   : > { %4660 = vmatprep.mubr.bf16.mxu0 %v10047_v45  ;;  %v11290_v45 = vpack.c.bf16 %v10212_v33, %v11289_v7  ;;  %v11303_v33 = vld [vmem:[#allocation41_spill] sm:$0xff] }
 0x410   : > { %v11305_v14 = vpack.c.bf16 %v11303_v33, %v11304_v12 }
 0x411   : > { %8040 = vmatpush3.bf16.msra.mxu1 %v8351_v0 }
 0x414   : > { %4564 = vmatmul.mubr.bf16.gmra.mrb[112].mxu1 %v11286_v25 }
 0x415   : > { %4571 = vmatprep.mubr.bf16.mxu1 %v11287_v36 }
 0x416   : > { %4661 = vmatmul.mubr.bf16.gmra.mrb[128].mxu0 %v10163_v58  ;;  %v11298_v58 = vld [vmem:[#allocation33_spill] sm:$0xff] }
 0x417   : > { %4668 = vmatprep.mubr.bf16.mxu0 %v10151_v46  ;;  %v11297_v46 = vld [vmem:[#allocation34_spill] sm:$0xff] }
 0x418   : > { %v11299_v17 = vpack.c.bf16 %v11297_v46, %v11298_v58 }
 0x41c   : > { %4572 = vmatmul.mubr.bf16.gmra.mrb[116].mxu1 %v11288_v60 }
 0x41d   : > { %4579 = vmatprep.mubr.bf16.mxu1 %v11290_v45 }
 0x41e   : > { %4669 = vmatmul.mubr.bf16.gmra.mrb[132].mxu0 %v10225_v28  ;;  %v11296_v28 = vpack.c.bf16 %v10249_v21, %v11295_v20 }
 0x41f   : > { %4676 = vmatprep.mubr.bf16.mxu0 %v10210_v43  ;;  %v11302_v43 = vpack.c.bf16 %v11300_v19, %v11301_v27 }
 0x424   : > { %4580 = vmatmul.mubr.bf16.gmra.mrb[120].mxu1 %v11293_v1 }
 0x425   : > { %4587 = vmatprep.mubr.bf16.mxu1 %v3690_v24 }
 0x426   : > { %4677 = vmatmul.mubr.bf16.gmra.mrb[136].mxu0 %v10257_v26  ;;  %v11306_v26 = vld [vmem:[#allocation38_spill] sm:$0xff] }
 0x427   : > { %4684 = vmatprep.mubr.bf16.mxu0 %v11294_v54  ;;  %v11307_v21 = vpack.c.bf16 %v11306_v26, %v10101_v35 }
 0x42c   : > { %4588 = vmatmul.mubr.bf16.gmra.mrb[124].mxu1 %v11296_v28 }
 0x42d   : > { %8041 = vmatprep.mubr.bf16.mxu1 %v11299_v17 }
 0x42e   : > { %4685 = vmatmul.mubr.bf16.gmra.mrb[140].mxu0 %v3722_v51 }
 0x434   : > { %8042 = vmatmul.mubr.bf16.vlgmr.msra.gmra.mrb[128].mxu1 %v11302_v43 }
 0x435   : > { %8045 = vmatprep.mubr.bf16.mxu1 %v11305_v14 }
 0x43c   : > { %8046 = vmatmul.mubr.bf16.gmra.mrb[132].mxu1 %v11307_v21 }
 0x43d   : > { %8049 = vmatprep.mubr.bf16.mxu1 %v10167_v18 }
 0x444   : > { %8050 = vmatmul.mubr.bf16.gmra.mrb[136].mxu1 %v10229_v44 }
 0x445   : > { %8053 = vmatprep.mubr.bf16.mxu1 %v10261_v63 }
 0x44c   : > { %8054 = vmatmul.mubr.bf16.gmra.mrb[140].mxu1 %v3786_v48 }
 0x485   : > { %v7433_v15 = vpop.f32.mrb[64].mxu1 }
 0x486   : > { %v7434_v10 = vpop.f32.mrb[65].mxu1 }
 0x487   : > { %v7497_v35 = vpop.f32.mrb[80].mxu0  ;;  %v7435_v52 = vadd.f32 %v7434_v10, %v7433_v15  ;;  %v7436_v56 = vpop.f32.mrb[66].mxu1 }
 0x488   : > { %v7498_v18 = vpop.f32.mrb[81].mxu0  ;;  %v7437_v55 = vpop.f32.mrb[67].mxu1 }
 0x489   : > { %v4340_v44 = vadd.f32 %v7435_v52, %v10420_v31  ;;  %v7499_v63 = vadd.f32 %v7498_v18, %v7497_v35  ;;  %v7500_v4 = vpop.f32.mrb[82].mxu0  ;;  %v7438_v24 = vadd.f32 %v7437_v55, %v7436_v56 }
 0x48a   : > { %v7501_v13 = vpop.f32.mrb[83].mxu0 }
 0x48b   : > { %v10423_v29 = vadd.f32 %v7499_v63, %v4340_v44  ;;  %v4343_v51 = vadd.f32 %v7438_v24, %v10420_v31  ;;  %v7502_v48 = vadd.f32 %v7501_v13, %v7500_v4 }
 0x48d   : > { %v10426_v8 = vadd.f32 %v7502_v48, %v4343_v51  ;;  %v7439_v16 = vpop.f32.mrb[68].mxu1 }
 0x48e   : > { %v7440_v50 = vpop.f32.mrb[69].mxu1 }
 0x48f   : > { %v7503_v32 = vpop.f32.mrb[84].mxu0  ;;  %v7441_v38 = vadd.f32 %v7440_v50, %v7439_v16  ;;  %v7442_v5 = vpop.f32.mrb[70].mxu1 }
 0x490   : > { %v7504_v37 = vpop.f32.mrb[85].mxu0  ;;  %v7443_v61 = vpop.f32.mrb[71].mxu1 }
 0x491   : > { %v4348_v47 = vadd.f32 %v7441_v38, %v10420_v31  ;;  %v7505_v6 = vadd.f32 %v7504_v37, %v7503_v32  ;;  %v7506_v30 = vpop.f32.mrb[86].mxu0  ;;  %v7444_v9 = vadd.f32 %v7443_v61, %v7442_v5 }
 0x492   : > { %v7507_v11 = vpop.f32.mrb[87].mxu0 }
 0x493   : > { %v10429_v40 = vadd.f32 %v7505_v6, %v4348_v47  ;;  %v4351_v2 = vadd.f32 %v7444_v9, %v10420_v31  ;;  %v7508_v57 = vadd.f32 %v7507_v11, %v7506_v30 }
 0x495   : > { %v10432_v23 = vadd.f32 %v7508_v57, %v4351_v2  ;;  %v7445_v34 = vpop.f32.mrb[72].mxu1 }
 0x496   : > { %v7446_v0 = vpop.f32.mrb[73].mxu1 }
 0x497   : > { %v7447_v59 = vadd.f32 %v7446_v0, %v7445_v34  ;;  %v7448_v42 = vpop.f32.mrb[74].mxu1 }
 0x498   : > { %v7509_v53 = vpop.f32.mrb[88].mxu0  ;;  %v7449_v39 = vpop.f32.mrb[75].mxu1 }
 0x499   : > { %v7510_v49 = vpop.f32.mrb[89].mxu0  ;;  %v4356_v22 = vadd.f32 %v7447_v59, %v10420_v31  ;;  %v7450_v36 = vadd.f32 %v7449_v39, %v7448_v42 }
 0x49a   : > { %v7511_v3 = vadd.f32 %v7510_v49, %v7509_v53  ;;  %v7512_v25 = vpop.f32.mrb[90].mxu0 }
 0x49b   : > { %v7513_v60 = vpop.f32.mrb[91].mxu0  ;;  %v4359_v45 = vadd.f32 %v7450_v36, %v10420_v31 }
 0x49c   : > { %v10435_v7 = vadd.f32 %v7511_v3, %v4356_v22  ;;  %v7514_v41 = vadd.f32 %v7513_v60, %v7512_v25 }
 0x49e   : > { %v10438_v62 = vadd.f32 %v7514_v41, %v4359_v45  ;;  %v7451_v1 = vpop.f32.mrb[76].mxu1 }
 0x49f   : > { %v7452_v54 = vpop.f32.mrb[77].mxu1 }
 0x4a0   : > { %v7453_v28 = vadd.f32 %v7452_v54, %v7451_v1  ;;  %v7454_v46 = vpop.f32.mrb[78].mxu1 }
 0x4a1   : > { %v7515_v20 = vpop.f32.mrb[92].mxu0  ;;  %v7455_v17 = vpop.f32.mrb[79].mxu1 }
 0x4a2   : > { %v7516_v58 = vpop.f32.mrb[93].mxu0  ;;  %v4364_v19 = vadd.f32 %v7453_v28, %v10420_v31  ;;  %v7456_v33 = vadd.f32 %v7455_v17, %v7454_v46 }
 0x4a3   : > { %v7517_v27 = vadd.f32 %v7516_v58, %v7515_v20  ;;  %v7518_v43 = vpop.f32.mrb[94].mxu0 }
 0x4a4   : > { %v7519_v12 = vpop.f32.mrb[95].mxu0  ;;  %v4367_v26 = vadd.f32 %v7456_v33, %v10420_v31 }
 0x4a5   : > { %v10441_v14 = vadd.f32 %v7517_v27, %v4364_v19  ;;  %v7520_v21 = vadd.f32 %v7519_v12, %v7518_v43 }
 0x4a7   : > { %v10444_v15 = vadd.f32 %v7520_v21, %v4367_v26  ;;  %v7457_v10 = vpop.f32.mrb[80].mxu1 }
 0x4a8   : > { %v7458_v35 = vpop.f32.mrb[81].mxu1 }
 0x4a9   : > { %v7521_v52 = vpop.f32.mrb[96].mxu0  ;;  %v7459_v56 = vadd.f32 %v7458_v35, %v7457_v10  ;;  %v7460_v18 = vpop.f32.mrb[82].mxu1 }
 0x4aa   : > { %v7522_v55 = vpop.f32.mrb[97].mxu0  ;;  %v7461_v44 = vpop.f32.mrb[83].mxu1 }
 0x4ab   : > { %v4372_v63 = vadd.f32 %v7459_v56, %v10420_v31  ;;  %v7523_v4 = vadd.f32 %v7522_v55, %v7521_v52  ;;  %v7524_v24 = vpop.f32.mrb[98].mxu0  ;;  %v7462_v13 = vadd.f32 %v7461_v44, %v7460_v18 }
 0x4ac   : > { %v7525_v51 = vpop.f32.mrb[99].mxu0 }
 0x4ad   : > { %v10447_v48 = vadd.f32 %v7523_v4, %v4372_v63  ;;  %v4375_v16 = vadd.f32 %v7462_v13, %v10420_v31  ;;  %v7526_v50 = vadd.f32 %v7525_v51, %v7524_v24 }
 0x4af   : > { %v10450_v32 = vadd.f32 %v7526_v50, %v4375_v16  ;;  %v7463_v38 = vpop.f32.mrb[84].mxu1 }
 0x4b0   : > { %v7464_v5 = vpop.f32.mrb[85].mxu1 }
 0x4b1   : > { %v7527_v37 = vpop.f32.mrb[100].mxu0  ;;  %v7465_v61 = vadd.f32 %v7464_v5, %v7463_v38  ;;  %v7466_v47 = vpop.f32.mrb[86].mxu1 }
 0x4b2   : > { %v7528_v6 = vpop.f32.mrb[101].mxu0  ;;  %v7467_v30 = vpop.f32.mrb[87].mxu1 }
 0x4b3   : > { %v4380_v9 = vadd.f32 %v7465_v61, %v10420_v31  ;;  %v7529_v11 = vadd.f32 %v7528_v6, %v7527_v37  ;;  %v7530_v2 = vpop.f32.mrb[102].mxu0  ;;  %v7468_v57 = vadd.f32 %v7467_v30, %v7466_v47 }
 0x4b4   : > { %v7531_v34 = vpop.f32.mrb[103].mxu0 }
 0x4b5   : > { %v10453_v0 = vadd.f32 %v7529_v11, %v4380_v9  ;;  %v4383_v53 = vadd.f32 %v7468_v57, %v10420_v31  ;;  %v7532_v59 = vadd.f32 %v7531_v34, %v7530_v2 }
 0x4b7   : > { %v10456_v42 = vadd.f32 %v7532_v59, %v4383_v53  ;;  %v7469_v49 = vpop.f32.mrb[88].mxu1 }
 0x4b8   : > { %v7470_v39 = vpop.f32.mrb[89].mxu1 }
 0x4b9   : > { %v7533_v22 = vpop.f32.mrb[104].mxu0  ;;  %v7471_v3 = vadd.f32 %v7470_v39, %v7469_v49  ;;  %v7472_v25 = vpop.f32.mrb[90].mxu1 }
 0x4ba   : > { %v7534_v36 = vpop.f32.mrb[105].mxu0  ;;  %v7473_v60 = vpop.f32.mrb[91].mxu1 }
 0x4bb   : > { %v4388_v45 = vadd.f32 %v7471_v3, %v10420_v31  ;;  %v7535_v41 = vadd.f32 %v7534_v36, %v7533_v22  ;;  %v7536_v1 = vpop.f32.mrb[106].mxu0  ;;  %v7474_v54 = vadd.f32 %v7473_v60, %v7472_v25 }
 0x4bc   : > { %v7537_v20 = vpop.f32.mrb[107].mxu0 }
 0x4bd   : > { %v10459_v28 = vadd.f32 %v7535_v41, %v4388_v45  ;;  %v4391_v46 = vadd.f32 %v7474_v54, %v10420_v31  ;;  %v7538_v58 = vadd.f32 %v7537_v20, %v7536_v1 }
 0x4bf   : > { %v10462_v17 = vadd.f32 %v7538_v58, %v4391_v46  ;;  %v7475_v19 = vpop.f32.mrb[92].mxu1 }
 0x4c0   : > { %v7476_v27 = vpop.f32.mrb[93].mxu1 }
 0x4c1   : > { %v7539_v43 = vpop.f32.mrb[108].mxu0  ;;  %v7477_v33 = vadd.f32 %v7476_v27, %v7475_v19  ;;  %v7478_v12 = vpop.f32.mrb[94].mxu1 }
 0x4c2   : > { %v7540_v26 = vpop.f32.mrb[109].mxu0  ;;  %v7479_v21 = vpop.f32.mrb[95].mxu1 }
 0x4c3   : > { %v4396_v10 = vadd.f32 %v7477_v33, %v10420_v31  ;;  %v7541_v35 = vadd.f32 %v7540_v26, %v7539_v43  ;;  %v7542_v52 = vpop.f32.mrb[110].mxu0  ;;  %v7480_v56 = vadd.f32 %v7479_v21, %v7478_v12 }
 0x4c4   : > { %v7543_v18 = vpop.f32.mrb[111].mxu0 }
 0x4c5   : > { %v10465_v55 = vadd.f32 %v7541_v35, %v4396_v10  ;;  %v4399_v44 = vadd.f32 %v7480_v56, %v10420_v31  ;;  %v7544_v63 = vadd.f32 %v7543_v18, %v7542_v52 }
 0x4c7   : > { %v10468_v4 = vadd.f32 %v7544_v63, %v4399_v44  ;;  %v7561_v24 = vpop.f32.mrb[96].mxu1 }
 0x4c8   : > { %v7562_v13 = vpop.f32.mrb[97].mxu1 }
 0x4c9   : > { %v7625_v51 = vpop.f32.mrb[112].mxu0  ;;  %v7563_v16 = vadd.f32 %v7562_v13, %v7561_v24  ;;  %v7564_v50 = vpop.f32.mrb[98].mxu1 }
 0x4ca   : > { %v7626_v38 = vpop.f32.mrb[113].mxu0  ;;  %v7565_v5 = vpop.f32.mrb[99].mxu1 }
 0x4cb   : > { %v4534_v37 = vadd.f32 %v7563_v16, %v10423_v29  ;;  %v7627_v61 = vadd.f32 %v7626_v38, %v7625_v51  ;;  %v7628_v47 = vpop.f32.mrb[114].mxu0  ;;  %v7566_v6 = vadd.f32 %v7565_v5, %v7564_v50 }
 0x4cc   : > { %v7629_v30 = vpop.f32.mrb[115].mxu0 }
 0x4cd   : > { %v4537_v9 = vadd.f32 %v7566_v6, %v10426_v8  ;;  %v7630_v11 = vadd.f32 %v7629_v30, %v7628_v47  ;;  %v10472_v31 = vadd.f32 %v7627_v61, %v4534_v37 }
 0x4cf   : > { %v7567_v2 = vpop.f32.mrb[100].mxu1  ;;  %v10474_v57 = vadd.f32 %v7630_v11, %v4537_v9 }
 0x4d0   : > { %v7568_v34 = vpop.f32.mrb[101].mxu1 }
 0x4d1   : > { %v7631_v53 = vpop.f32.mrb[116].mxu0  ;;  %v7569_v59 = vadd.f32 %v7568_v34, %v7567_v2  ;;  %v7570_v49 = vpop.f32.mrb[102].mxu1 }
 0x4d2   : > { %v7632_v39 = vpop.f32.mrb[117].mxu0  ;;  %v7571_v22 = vpop.f32.mrb[103].mxu1 }
 0x4d3   : > { %v4542_v29 = vadd.f32 %v7569_v59, %v10429_v40  ;;  %v7633_v3 = vadd.f32 %v7632_v39, %v7631_v53  ;;  %v7634_v25 = vpop.f32.mrb[118].mxu0  ;;  %v7572_v36 = vadd.f32 %v7571_v22, %v7570_v49 }
 0x4d4   : > { %v7635_v60 = vpop.f32.mrb[119].mxu0 }
 0x4d5   : > { %v4545_v8 = vadd.f32 %v7572_v36, %v10432_v23  ;;  %v7636_v45 = vadd.f32 %v7635_v60, %v7634_v25  ;;  %v10478_v41 = vadd.f32 %v7633_v3, %v4542_v29 }
 0x4d7   : > { %v7573_v1 = vpop.f32.mrb[104].mxu1  ;;  %v10480_v54 = vadd.f32 %v7636_v45, %v4545_v8 }
 0x4d8   : > { %v7574_v20 = vpop.f32.mrb[105].mxu1 }
 0x4d9   : > { %v7637_v46 = vpop.f32.mrb[120].mxu0  ;;  %v7575_v58 = vadd.f32 %v7574_v20, %v7573_v1  ;;  %v7576_v19 = vpop.f32.mrb[106].mxu1 }
 0x4da   : > { %v7638_v27 = vpop.f32.mrb[121].mxu0  ;;  %v7577_v43 = vpop.f32.mrb[107].mxu1 }
 0x4db   : > { %v4550_v40 = vadd.f32 %v7575_v58, %v10435_v7  ;;  %v7639_v33 = vadd.f32 %v7638_v27, %v7637_v46  ;;  %v7640_v12 = vpop.f32.mrb[122].mxu0  ;;  %v7578_v26 = vadd.f32 %v7577_v43, %v7576_v19 }
 0x4dc   : > { %v7641_v21 = vpop.f32.mrb[123].mxu0 }
 0x4dd   : > { %v4553_v23 = vadd.f32 %v7578_v26, %v10438_v62  ;;  %v7642_v10 = vadd.f32 %v7641_v21, %v7640_v12  ;;  %v10484_v35 = vadd.f32 %v7639_v33, %v4550_v40 }
 0x4df   : > { %v7579_v52 = vpop.f32.mrb[108].mxu1  ;;  %v10486_v56 = vadd.f32 %v7642_v10, %v4553_v23 }
 0x4e0   : > { %v7580_v18 = vpop.f32.mrb[109].mxu1 }
 0x4e1   : > { %v7643_v44 = vpop.f32.mrb[124].mxu0  ;;  %v7581_v63 = vadd.f32 %v7580_v18, %v7579_v52  ;;  %v7582_v24 = vpop.f32.mrb[110].mxu1 }
 0x4e2   : > { %v7644_v13 = vpop.f32.mrb[125].mxu0  ;;  %v7583_v51 = vpop.f32.mrb[111].mxu1 }
 0x4e3   : > { %v4558_v7 = vadd.f32 %v7581_v63, %v10441_v14  ;;  %v7645_v16 = vadd.f32 %v7644_v13, %v7643_v44  ;;  %v7646_v50 = vpop.f32.mrb[126].mxu0  ;;  %v7584_v38 = vadd.f32 %v7583_v51, %v7582_v24 }
 0x4e4   : > { %v7647_v5 = vpop.f32.mrb[127].mxu0 }
 0x4e5   : > { %v4561_v62 = vadd.f32 %v7584_v38, %v10444_v15  ;;  %v7648_v37 = vadd.f32 %v7647_v5, %v7646_v50  ;;  %v10490_v61 = vadd.f32 %v7645_v16, %v4558_v7 }
 0x4e7   : > { %v7585_v47 = vpop.f32.mrb[112].mxu1  ;;  %v10492_v6 = vadd.f32 %v7648_v37, %v4561_v62 }
 0x4e8   : > { %v7586_v30 = vpop.f32.mrb[113].mxu1 }
 0x4e9   : > { %v7649_v9 = vpop.f32.mrb[128].mxu0  ;;  %v7587_v11 = vadd.f32 %v7586_v30, %v7585_v47  ;;  %v7588_v2 = vpop.f32.mrb[114].mxu1 }
 0x4ea   : > { %v7650_v34 = vpop.f32.mrb[129].mxu0  ;;  %v7589_v53 = vpop.f32.mrb[115].mxu1 }
 0x4eb   : > { %v4566_v14 = vadd.f32 %v7587_v11, %v10447_v48  ;;  %v7651_v59 = vadd.f32 %v7650_v34, %v7649_v9  ;;  %v7652_v49 = vpop.f32.mrb[130].mxu0  ;;  %v7590_v39 = vadd.f32 %v7589_v53, %v7588_v2 }
 0x4ec   : > { %v7653_v22 = vpop.f32.mrb[131].mxu0 }
 0x4ed   : > { %v4569_v15 = vadd.f32 %v7590_v39, %v10450_v32  ;;  %v7654_v29 = vadd.f32 %v7653_v22, %v7652_v49  ;;  %v10496_v3 = vadd.f32 %v7651_v59, %v4566_v14 }
 0x4ef   : > { %v7591_v25 = vpop.f32.mrb[116].mxu1  ;;  %v10498_v36 = vadd.f32 %v7654_v29, %v4569_v15 }
 0x4f0   : > { %v7592_v60 = vpop.f32.mrb[117].mxu1 }
 0x4f1   : > { %v7655_v8 = vpop.f32.mrb[132].mxu0  ;;  %v7593_v45 = vadd.f32 %v7592_v60, %v7591_v25  ;;  %v7594_v1 = vpop.f32.mrb[118].mxu1 }
 0x4f2   : > { %v7656_v20 = vpop.f32.mrb[133].mxu0  ;;  %v7595_v46 = vpop.f32.mrb[119].mxu1 }
 0x4f3   : > { %v4574_v48 = vadd.f32 %v7593_v45, %v10453_v0  ;;  %v7657_v58 = vadd.f32 %v7656_v20, %v7655_v8  ;;  %v7658_v19 = vpop.f32.mrb[134].mxu0  ;;  %v7596_v27 = vadd.f32 %v7595_v46, %v7594_v1 }
 0x4f4   : > { %v7659_v43 = vpop.f32.mrb[135].mxu0 }
 0x4f5   : > { %v4577_v32 = vadd.f32 %v7596_v27, %v10456_v42  ;;  %v7660_v40 = vadd.f32 %v7659_v43, %v7658_v19  ;;  %v10502_v33 = vadd.f32 %v7657_v58, %v4574_v48 }
 0x4f7   : > { %v7597_v12 = vpop.f32.mrb[120].mxu1  ;;  %v10504_v26 = vadd.f32 %v7660_v40, %v4577_v32 }
 0x4f8   : > { %v7598_v21 = vpop.f32.mrb[121].mxu1 }
 0x4f9   : > { %v7661_v23 = vpop.f32.mrb[136].mxu0  ;;  %v7599_v10 = vadd.f32 %v7598_v21, %v7597_v12  ;;  %v7600_v52 = vpop.f32.mrb[122].mxu1 }
 0x4fa   : > { %v7662_v18 = vpop.f32.mrb[137].mxu0  ;;  %v7601_v44 = vpop.f32.mrb[123].mxu1 }
 0x4fb   : > { %v4582_v0 = vadd.f32 %v7599_v10, %v10459_v28  ;;  %v7663_v63 = vadd.f32 %v7662_v18, %v7661_v23  ;;  %v7664_v24 = vpop.f32.mrb[138].mxu0  ;;  %v7602_v13 = vadd.f32 %v7601_v44, %v7600_v52 }
 0x4fc   : > { %v7665_v51 = vpop.f32.mrb[139].mxu0 }
 0x4fd   : > { %v4585_v42 = vadd.f32 %v7602_v13, %v10462_v17  ;;  %v7666_v7 = vadd.f32 %v7665_v51, %v7664_v24  ;;  %v10508_v16 = vadd.f32 %v7663_v63, %v4582_v0 }
 0x4ff   : > { %v7603_v50 = vpop.f32.mrb[124].mxu1  ;;  %v10510_v38 = vadd.f32 %v7666_v7, %v4585_v42 }
 0x500   : > { %v7604_v5 = vpop.f32.mrb[125].mxu1 }
 0x501   : > { %v7667_v62 = vpop.f32.mrb[140].mxu0  ;;  %v7605_v37 = vadd.f32 %v7604_v5, %v7603_v50  ;;  %v7606_v47 = vpop.f32.mrb[126].mxu1 }
 0x502   : > { %v7668_v30 = vpop.f32.mrb[141].mxu0  ;;  %v7607_v9 = vpop.f32.mrb[127].mxu1 }
 0x503   : > { %v4590_v28 = vadd.f32 %v7605_v37, %v10465_v55  ;;  %v7669_v11 = vadd.f32 %v7668_v30, %v7667_v62  ;;  %v7670_v2 = vpop.f32.mrb[142].mxu0  ;;  %v7608_v34 = vadd.f32 %v7607_v9, %v7606_v47 }
 0x504   : > { %v7671_v53 = vpop.f32.mrb[143].mxu0 }
 0x505   : > { %v4593_v17 = vadd.f32 %v7608_v34, %v10468_v4  ;;  %v7672_v14 = vadd.f32 %v7671_v53, %v7670_v2  ;;  %v4687_v59 = vadd.f32 %v7669_v11, %v4590_v28 }
 0x507   : > { %v8043_v49 = vpop.f32.mrb[128].mxu1  ;;  %v4690_v39 = vadd.f32 %v7672_v14, %v4593_v17 }
 0x508   : > { %v10515_v22 = vadd.f32 %v8043_v49, %v10478_v41  ;;  %v4727_v15 = vpop.f32.mrb[129].mxu1 }
 0x509   : > { %v10518_v29 = vadd.f32 %v4727_v15, %v10472_v31  ;;  %v8044_v25 = vpop.f32.mrb[130].mxu1 }
 0x50a   : > { %v10521_v55 = vadd.f32 %v8044_v25, %v10480_v54  ;;  %v4730_v60 = vpop.f32.mrb[131].mxu1  ;;  %v4818_v31 = vmul.f32 %v10515_v22, %v10515_v22 }
 0x50b   : > { %v10524_v8 = vadd.f32 %v4730_v60, %v10474_v57  ;;  %v4816_v4 = vmul.f32 %v10518_v29, %v10518_v29 }
 0x50c   : > { %v4819_v48 = vmul.f32 %v10521_v55, %v10521_v55 }
 0x50d   : > { %v4794_v45 = vadd.f32 %v10524_v8, %v10518_v29  ;;  %v4817_v41 = vmul.f32 %v10524_v8, %v10524_v8 }
 0x50f   : > { %v4795_v1 = vadd.f32 %v4794_v45, %v10515_v22  ;;  %v4832_v54 = vadd.f32 %v4817_v41, %v4816_v4  ;;  %v8047_v20 = vpop.f32.mrb[132].mxu1 }
 0x510   : > { %v10536_v46 = vadd.f32 %v8047_v20, %v10490_v61  ;;  %v4743_v57 = vpop.f32.mrb[133].mxu1 }
 0x511   : > { %v4833_v58 = vadd.f32 %v4832_v54, %v4818_v31  ;;  %v10541_v19 = vadd.f32 %v4743_v57, %v10484_v35  ;;  %v4796_v27 = vadd.f32 %v4795_v1, %v10521_v55  ;;  %v8048_v43 = vpop.f32.mrb[134].mxu1 }
 0x512   : > { %v10545_v32 = vadd.f32 %v8048_v43, %v10492_v6  ;;  %v4746_v40 = vpop.f32.mrb[135].mxu1  ;;  %v4822_v6 = vmul.f32 %v10536_v46, %v10536_v46 }
 0x513   : > { %v4797_v12 = vadd.f32 %v4796_v27, %v10541_v19  ;;  %v4820_v61 = vmul.f32 %v10541_v19, %v10541_v19  ;;  %v4834_v21 = vadd.f32 %v4833_v58, %v4819_v48  ;;  %v10551_v23 = vadd.f32 %v4746_v40, %v10486_v56 }
 0x514   : > { %v4823_v56 = vmul.f32 %v10545_v32, %v10545_v32 }
 0x515   : > { %v4835_v10 = vadd.f32 %v4834_v21, %v4820_v61  ;;  %v4798_v35 = vadd.f32 %v4797_v12, %v10551_v23  ;;  %v4821_v52 = vmul.f32 %v10551_v23, %v10551_v23 }
 0x517   : > { %v4799_v18 = vadd.f32 %v4798_v35, %v10536_v46  ;;  %v4836_v44 = vadd.f32 %v4835_v10, %v4821_v52  ;;  %v8051_v0 = vpop.f32.mrb[136].mxu1 }
 0x518   : > { %v10560_v63 = vadd.f32 %v8051_v0, %v10502_v33  ;;  %v4759_v24 = vpop.f32.mrb[137].mxu1 }
 0x519   : > { %v4837_v13 = vadd.f32 %v4836_v44, %v4822_v6  ;;  %v10565_v51 = vadd.f32 %v4759_v24, %v10496_v3  ;;  %v4800_v42 = vadd.f32 %v4799_v18, %v10545_v32  ;;  %v8052_v7 = vpop.f32.mrb[138].mxu1 }
 0x51a   : > { %v10569_v50 = vadd.f32 %v8052_v7, %v10504_v26  ;;  %v4762_v5 = vpop.f32.mrb[139].mxu1  ;;  %v4826_v26 = vmul.f32 %v10560_v63, %v10560_v63 }
 0x51b   : > { %v4801_v62 = vadd.f32 %v4800_v42, %v10565_v51  ;;  %v4824_v33 = vmul.f32 %v10565_v51, %v10565_v51  ;;  %v4838_v37 = vadd.f32 %v4837_v13, %v4823_v56  ;;  %v10575_v47 = vadd.f32 %v4762_v5, %v10498_v36 }
 0x51c   : > { %v4827_v36 = vmul.f32 %v10569_v50, %v10569_v50 }
 0x51d   : > { %v4839_v30 = vadd.f32 %v4838_v37, %v4824_v33  ;;  %v4802_v3 = vadd.f32 %v4801_v62, %v10575_v47  ;;  %v4825_v9 = vmul.f32 %v10575_v47, %v10575_v47 }
 0x51f   : > { %v4803_v28 = vadd.f32 %v4802_v3, %v10560_v63  ;;  %v4840_v11 = vadd.f32 %v4839_v30, %v4825_v9  ;;  %v8055_v2 = vpop.f32.mrb[140].mxu1 }
 0x520   : > { %v10583_v34 = vadd.f32 %v8055_v2, %v4687_v59  ;;  %v4775_v53 = vpop.f32.mrb[141].mxu1 }
 0x521   : > { %v4841_v17 = vadd.f32 %v4840_v11, %v4826_v26  ;;  %v10588_v14 = vadd.f32 %v4775_v53, %v10508_v16  ;;  %v4804_v49 = vadd.f32 %v4803_v28, %v10569_v50  ;;  %v8056_v15 = vpop.f32.mrb[142].mxu1 }
 0x522   : > { %v10591_v25 = vadd.f32 %v8056_v15, %v4690_v39  ;;  %v4778_v60 = vpop.f32.mrb[143].mxu1  ;;  %v4830_v39 = vmul.f32 %v10583_v34, %v10583_v34 }
 0x523   : > { %v4805_v4 = vadd.f32 %v4804_v49, %v10588_v14  ;;  %v4828_v59 = vmul.f32 %v10588_v14, %v10588_v14  ;;  %v4842_v45 = vadd.f32 %v4841_v17, %v4827_v36  ;;  %v10597_v41 = vadd.f32 %v4778_v60, %v10510_v38  ;;  %v6781_v36 = vld [vmem:[%s4792_s0] ss:$0 sm:$0xff] }
 0x524   : > { %v4831_v57 = vmul.f32 %v10591_v25, %v10591_v25 }
 0x525   : > { %v4843_v31 = vadd.f32 %v4842_v45, %v4828_v59  ;;  %v4806_v1 = vadd.f32 %v4805_v4, %v10597_v41  ;;  %v4829_v16 = vmul.f32 %v10597_v41, %v10597_v41 }
 0x527   : > { %v4807_v54 = vadd.f32 %v4806_v1, %v10583_v34  ;;  %v4844_v20 = vadd.f32 %v4843_v31, %v4829_v16 }
 0x529   : > { %v4808_v48 = vadd.f32 %v4807_v54, %v10591_v25  ;;  %v4845_v58 = vadd.f32 %v4844_v20, %v4830_v39 }
 0x52b   : > { %v4809_v38 = vrot.slane %v4808_v48, 4  ;;  %v4846_v27 = vadd.f32 %v4845_v58, %v4831_v57 }
 0x52d   : > { %v4810_v43 = vadd.f32 %v4809_v38, %v4808_v48  ;;  %v4847_v40 = vrot.slane %v4846_v27, 4  ;;  %v11310_v38 = vld [vmem:[#allocation15_spill] sm:$0xff] }
 0x52f   : > { %v4811_v12 = vrot.slane %v4810_v43, 2  ;;  %v4848_v61 = vadd.f32 %v4847_v40, %v4846_v27 }
 0x531   : > { %v4812_v21 = vadd.f32 %v4811_v12, %v4810_v43  ;;  %v4849_v10 = vrot.slane %v4848_v61, 2  ;;  %v11311_v43 = vld [vmem:[#allocation18_spill] sm:$0xff]  ;;  %v11312_v12 = vld [vmem:[#allocation19_spill] sm:$0xff] }
 0x533   : > { %v4813_v35 = vrot.slane %v4812_v21, 1  ;;  %v4850_v52 = vadd.f32 %v4849_v10, %v4848_v61  ;;  %v11313_v10 = vld [vmem:[#allocation20_spill] sm:$0xff] }
 0x535   : > { %v4814_v6 = vadd.f32 %v4813_v35, %v4812_v21  ;;  %v4851_v18 = vrot.slane %v4850_v52, 1 }
 0x537   : > { %v4815_v44 = vmul.f32 0.0078125, %v4814_v6  ;;  %v4852_v0 = vadd.f32 %v4851_v18, %v4850_v52  ;;  %v11314_v6 = vld [vmem:[#allocation21_spill] sm:$0xff] }
 0x539   : > { %v4853_v24 = vmul.f32 0.0078125, %v4852_v0  ;;  %v4854_v56 = vmul.f32 %v4815_v44, %v4815_v44  ;;  %v4859_v13 = vsub.f32 %v10518_v29, %v4815_v44  ;;  %v4860_v42 = vsub.f32 %v10524_v8, %v4815_v44 }
 0x53a   : > { %v4861_v7 = vsub.f32 %v10515_v22, %v4815_v44  ;;  %v4862_v5 = vsub.f32 %v10521_v55, %v4815_v44  ;;  %v4863_v62 = vsub.f32 %v10541_v19, %v4815_v44  ;;  %v4864_v33 = vsub.f32 %v10551_v23, %v4815_v44 }
 0x53b   : > { %v4855_v37 = vsub.f32 %v4853_v24, %v4854_v56  ;;  %v4865_v30 = vsub.f32 %v10536_v46, %v4815_v44  ;;  %v4866_v3 = vsub.f32 %v10545_v32, %v4815_v44  ;;  %v4867_v9 = vsub.f32 %v10565_v51, %v4815_v44  ;;  %v4791_v32 = vld [vmem:[%s4790_s1] sm:$0x1] }
 0x53c   : > { %v4868_v29 = vsub.f32 %v10575_v47, %v4815_v44  ;;  %v4869_v8 = vsub.f32 %v10560_v63, %v4815_v44  ;;  %v4870_v22 = vsub.f32 %v10569_v50, %v4815_v44  ;;  %v4871_v55 = vsub.f32 %v10588_v14, %v4815_v44  ;;  %v11308_v63 = vld [vmem:[#allocation14_spill] sm:$0xff] }
 0x53d   : > { %v4856_v26 = vadd.f32 1e-05, %v4855_v37  ;;  %v4872_v19 = vsub.f32 %v10597_v41, %v4815_v44  ;;  %v4873_v23 = vsub.f32 %v10583_v34, %v4815_v44  ;;  %v4874_v46 = vsub.f32 %v10591_v25, %v4815_v44  ;;  %v11315_v24 = vld [vmem:[#allocation22_spill] sm:$0xff] }
 0x53e   : > { %v11309_v50 = vsub.s32 0, %v11308_v63 }
 0x53f   : > { %8386 = vrsqrt.f32 %v4856_v26 }
 0x549   : > { %v8387_v51 = vpop.eup %8386 }
 0x54a   : > { %v4858_v47 = vmul.f32 %v8387_v51, %v4791_v32  ;;  %v11320_v32 = vld [vmem:[#allocation28_spill] sm:$0xff] }
 0x54c   : > { %v4878_v28 = vrot.slane %v4858_v47, %v11309_v50  ;;  %v11321_v50 = vld [vmem:[#allocation30_spill] sm:$0xff] }
 0x54e   : > { %v4879_v11 = vmul.f32 %v4878_v28, %v4859_v13  ;;  %v4880_v2 = vmul.f32 %v4878_v28, %v4860_v42  ;;  %v4881_v34 = vmul.f32 %v4878_v28, %v4861_v7  ;;  %v4882_v53 = vmul.f32 %v4878_v28, %v4862_v5  ;;  %v11316_v13 = vld [vmem:[#allocation23_spill] sm:$0xff] }
 0x54f   : > { %v4883_v17 = vmul.f32 %v4878_v28, %v4863_v62  ;;  %v4884_v14 = vmul.f32 %v4878_v28, %v4864_v33  ;;  %v4885_v49 = vmul.f32 %v4878_v28, %v4865_v30  ;;  %v4886_v15 = vmul.f32 %v4878_v28, %v4866_v3  ;;  %v11317_v3 = vld [vmem:[#allocation25_spill] sm:$0xff] }
 0x550   : > { %v4887_v25 = vmul.f32 %v4878_v28, %v4867_v9  ;;  %v4888_v60 = vmul.f32 %v4878_v28, %v4868_v29  ;;  %v4889_v4 = vmul.f32 %v4878_v28, %v4869_v8  ;;  %v4890_v59 = vmul.f32 %v4878_v28, %v4870_v22 }
 0x551   : > { %v4891_v45 = vmul.f32 %v4878_v28, %v4871_v55  ;;  %v4892_v41 = vmul.f32 %v4878_v28, %v4872_v19  ;;  %v4893_v31 = vmul.f32 %v4878_v28, %v4873_v23  ;;  %v4894_v1 = vmul.f32 %v4878_v28, %v4874_v46  ;;  %v11318_v55 = vld [vmem:[#allocation26_spill] sm:$0xff]  ;;  %v11319_v23 = vld [vmem:[#allocation27_spill] sm:$0xff] }
 0x552   : > { %v4901_v16 = vadd.f32 %v6781_v36, %v4879_v11  ;;  %v4902_v39 = vadd.f32 %v6781_v36, %v4880_v2  ;;  %v4903_v54 = vadd.f32 %v6781_v36, %v4881_v34  ;;  %v4904_v20 = vadd.f32 %v6781_v36, %v4882_v53  ;;  %v11322_v53 = vld [vmem:[#allocation31_spill] sm:$0xff] }
 0x553   : > { %v4905_v57 = vadd.f32 %v6781_v36, %v4883_v17  ;;  %v4906_v48 = vadd.f32 %v6781_v36, %v4884_v14  ;;  %v4907_v58 = vadd.f32 %v6781_v36, %v4885_v49  ;;  %v4908_v21 = vadd.f32 %v6781_v36, %v4886_v15  ;;  %v11323_v17 = vld [vmem:[#allocation16_spill] sm:$0xff] }
 0x554   : > { %v10635_v27 = vadd.f32 %v4901_v16, %v11310_v38  ;;  %v10638_v40 = vadd.f32 %v4902_v39, %v11311_v43  ;;  %v10641_v61 = vadd.f32 %v4903_v54, %v11312_v12  ;;  %v10644_v35 = vadd.f32 %v4904_v20, %v11313_v10 }
 0x555   : > { %v4909_v52 = vadd.f32 %v6781_v36, %v4887_v25  ;;  %v10647_v18 = vadd.f32 %v4905_v57, %v11314_v6  ;;  %v4910_v44 = vadd.f32 %v6781_v36, %v4888_v60  ;;  %v4911_v0 = vadd.f32 %v6781_v36, %v4889_v4  ;;  %v11324_v25 = vld [vmem:[#allocation42_spill] sm:$0xff] }
 0x556   : > { %v10650_v56 = vadd.f32 %v4906_v48, %v11315_v24  ;;  %v10653_v42 = vadd.f32 %v4907_v58, %v11316_v13  ;;  %v4912_v7 = vadd.f32 %v6781_v36, %v4890_v59  ;;  %v4933_v5 = vmin.f32 %v10635_v27, 0.0 }
 0x557   : > { %v4934_v62 = vmin.f32 %v10638_v40, 0.0  ;;  %v4935_v33 = vmin.f32 %v10641_v61, 0.0  ;;  %v4913_v37 = vadd.f32 %v6781_v36, %v4891_v45  ;;  %v4914_v30 = vadd.f32 %v6781_v36, %v4892_v41  ;;  %v11325_v45 = vld [vmem:[#allocation45_spill] sm:$0xff] }
 0x558   : > { %v10659_v9 = vadd.f32 %v4908_v21, %v11317_v3  ;;  %v4936_v29 = vmin.f32 %v10644_v35, 0.0  ;;  %v4915_v8 = vadd.f32 %v6781_v36, %v4893_v31  ;;  %v4916_v22 = vadd.f32 %v6781_v36, %v4894_v1 }
 0x559   : > { %v10663_v26 = vadd.f32 %v4909_v52, %v11318_v55  ;;  %v4937_v19 = vmin.f32 %v10647_v18, 0.0  ;;  %v10667_v46 = vadd.f32 %v4910_v44, %v11319_v23  ;;  %v10670_v51 = vadd.f32 %v4911_v0, %v11320_v32 }
 0x55a   : > { %v4938_v47 = vmin.f32 %v10650_v56, 0.0  ;;  %v4939_v63 = vmin.f32 %v10653_v42, 0.0  ;;  %v10675_v28 = vadd.f32 %v4912_v7, %v11321_v50  ;;  %v4949_v11 = vmul.f32 1.442695, %v4933_v5 }
 0x55b   : > { %v4951_v2 = vmul.f32 1.442695, %v4934_v62  ;;  %v4953_v34 = vmul.f32 1.442695, %v4935_v33  ;;  %v10678_v36 = vadd.f32 %v4913_v37, %v11322_v53  ;;  %v10681_v14 = vadd.f32 %v4914_v30, %v11323_v17 }
 0x55c   : > { %v4940_v49 = vmin.f32 %v10659_v9, 0.0  ;;  %v4955_v15 = vmul.f32 1.442695, %v4936_v29  ;;  %v10685_v60 = vadd.f32 %v4915_v8, %v11324_v25  ;;  %v4941_v4 = vmin.f32 %v10663_v26, 0.0 }
 0x55d   : > { %8388 = vpow2.f32 %v4949_v11  ;;  %v4957_v59 = vmul.f32 1.442695, %v4937_v19  ;;  %v10689_v41 = vadd.f32 %v4916_v22, %v11325_v45  ;;  %v4942_v31 = vmin.f32 %v10667_v46, 0.0 }
 0x55e   : > { %8390 = vpow2.f32 %v4951_v2  ;;  %v4959_v1 = vmul.f32 1.442695, %v4938_v47  ;;  %v4943_v16 = vmin.f32 %v10670_v51, 0.0  ;;  %v4961_v39 = vmul.f32 1.442695, %v4939_v63 }
 0x55f   : > { %8392 = vpow2.f32 %v4953_v34  ;;  %v4944_v54 = vmin.f32 %v10675_v28, 0.0  ;;  %v4963_v20 = vmul.f32 1.442695, %v4940_v49  ;;  %v4945_v57 = vmin.f32 %v10678_v36, 0.0 }
 0x560   : > { %8394 = vpow2.f32 %v4955_v15  ;;  %v4946_v48 = vmin.f32 %v10681_v14, 0.0  ;;  %v4965_v58 = vmul.f32 1.442695, %v4941_v4  ;;  %v4947_v38 = vmin.f32 %v10685_v60, 0.0 }
 0x561   : > { %8396 = vpow2.f32 %v4957_v59  ;;  %v4948_v43 = vmin.f32 %v10689_v41, 0.0  ;;  %v4967_v12 = vmul.f32 1.442695, %v4942_v31  ;;  %v4969_v21 = vmul.f32 1.442695, %v4943_v16 }
 0x562   : > { %8398 = vpow2.f32 %v4959_v1  ;;  %v4971_v10 = vmul.f32 1.442695, %v4944_v54  ;;  %v4973_v52 = vmul.f32 1.442695, %v4945_v57  ;;  %v4975_v6 = vmul.f32 1.442695, %v4946_v48 }
 0x563   : > { %8400 = vpow2.f32 %v4961_v39  ;;  %v4977_v44 = vmul.f32 1.442695, %v4947_v38  ;;  %v4979_v0 = vmul.f32 1.442695, %v4948_v43  ;;  %vm5013_vm0 = vcmp.gt.f32.partialorder %v10635_v27, 0.0 }
 0x564   : > { %8402 = vpow2.f32 %v4963_v20  ;;  %vm5014_vm1 = vcmp.gt.f32.partialorder %v10638_v40, 0.0  ;;  %vm5015_vm2 = vcmp.gt.f32.partialorder %v10641_v61, 0.0  ;;  %vm5016_vm3 = vcmp.gt.f32.partialorder %v10644_v35, 0.0 }
 0x565   : > { %8404 = vpow2.f32 %v4965_v58  ;;  %vm5017_vm4 = vcmp.gt.f32.partialorder %v10647_v18, 0.0  ;;  %vm5018_vm5 = vcmp.gt.f32.partialorder %v10650_v56, 0.0  ;;  %vm5019_vm6 = vcmp.gt.f32.partialorder %v10653_v42, 0.0 }
 0x566   : > { %8406 = vpow2.f32 %v4967_v12  ;;  %vm5020_vm7 = vcmp.gt.f32.partialorder %v10659_v9, 0.0  ;;  %vm5021_vm8 = vcmp.gt.f32.partialorder %v10663_v26, 0.0  ;;  %vm5022_vm9 = vcmp.gt.f32.partialorder %v10667_v46, 0.0 }
 0x567   : > { %v8389_v24 = vpop.eup %8388  ;;  %8408 = vpow2.f32 %v4969_v21  ;;  %vm5023_vm10 = vcmp.gt.f32.partialorder %v10670_v51, 0.0  ;;  %vm5024_vm11 = vcmp.gt.f32.partialorder %v10675_v28, 0.0  ;;  %vm5025_vm12 = vcmp.gt.f32.partialorder %v10678_v36, 0.0 }
 0x568   : > { %v8391_v13 = vpop.eup %8390  ;;  %8410 = vpow2.f32 %v4971_v10  ;;  %v6782_v7 = vadd.f32 -1.0, %v8389_v24  ;;  %vm5026_vm13 = vcmp.gt.f32.partialorder %v10681_v14, 0.0  ;;  %vm5027_vm14 = vcmp.gt.f32.partialorder %v10685_v60, 0.0 }
 0x569   : > { %v8393_v5 = vpop.eup %8392  ;;  %8412 = vpow2.f32 %v4973_v52  ;;  %v6783_v62 = vadd.f32 -1.0, %v8391_v13  ;;  %vm5028_vm15 = vcmp.gt.f32.partialorder %v10689_v41, 0.0 }
 0x56a   : > { %v8395_v33 = vpop.eup %8394  ;;  %8414 = vpow2.f32 %v4975_v6  ;;  %v6784_v37 = vadd.f32 -1.0, %v8393_v5  ;;  %v4997_v30 = vmul.f32 1.6732632, %v6782_v7 }
 0x56b   : > { %v8397_v3 = vpop.eup %8396  ;;  %8416 = vpow2.f32 %v4977_v44  ;;  %v6785_v29 = vadd.f32 -1.0, %v8395_v33  ;;  %v4998_v8 = vmul.f32 1.6732632, %v6783_v62 }
 0x56c   : > { %v8399_v22 = vpop.eup %8398  ;;  %8418 = vpow2.f32 %v4979_v0  ;;  %v6786_v55 = vadd.f32 -1.0, %v8397_v3  ;;  %v4999_v19 = vmul.f32 1.6732632, %v6784_v37  ;;  %v5029_v23 = vsel %vm5013_vm0, %v10635_v27, %v4997_v30 }
 0x56d   : > { %v8401_v32 = vpop.eup %8400  ;;  %v6787_v47 = vadd.f32 -1.0, %v8399_v22  ;;  %v5000_v63 = vmul.f32 1.6732632, %v6785_v29  ;;  %v5030_v50 = vsel %vm5014_vm1, %v10638_v40, %v4998_v8  ;;  %v5045_v11 = vmul.f32 1.050701, %v5029_v23 }
 0x56e   : > { %v8403_v2 = vpop.eup %8402  ;;  %v6788_v34 = vadd.f32 -1.0, %v8401_v32  ;;  %v5001_v53 = vmul.f32 1.6732632, %v6786_v55  ;;  %v5031_v17 = vsel %vm5015_vm2, %v10641_v61, %v4999_v19  ;;  %v5046_v27 = vmul.f32 1.050701, %v5030_v50 }
 0x56f   : > { %v8405_v49 = vpop.eup %8404  ;;  %v6789_v15 = vadd.f32 -1.0, %v8403_v2  ;;  %v5002_v25 = vmul.f32 1.6732632, %v6787_v47  ;;  %v5032_v40 = vsel %vm5016_vm3, %v10644_v35, %v5000_v63  ;;  %v5047_v4 = vmul.f32 1.050701, %v5031_v17  ;;  %5061 = vst [vmem:[#allocation2 + $0x11] sm:$0xff] %v5045_v11 }
 0x570   : > { %v8407_v59 = vpop.eup %8406  ;;  %v6790_v45 = vadd.f32 -1.0, %v8405_v49  ;;  %v5003_v31 = vmul.f32 1.6732632, %v6788_v34  ;;  %v5033_v1 = vsel %vm5017_vm4, %v10647_v18, %v5001_v53  ;;  %v5048_v61 = vmul.f32 1.050701, %v5032_v40  ;;  %5062 = vst [vmem:[#allocation2 + $0x21] sm:$0xff] %v5046_v27 }
 0x571   : > { %v8409_v16 = vpop.eup %8408  ;;  %v6791_v39 = vadd.f32 -1.0, %v8407_v59  ;;  %v5004_v54 = vmul.f32 1.6732632, %v6789_v15  ;;  %v5034_v20 = vsel %vm5018_vm5, %v10650_v56, %v5002_v25  ;;  %v5049_v57 = vmul.f32 1.050701, %v5033_v1  ;;  %5063 = vst [vmem:[#allocation2 + $0x31] sm:$0xff] %v5047_v4 }
 0x572   : > { %v8411_v35 = vpop.eup %8410  ;;  %v6792_v48 = vadd.f32 -1.0, %v8409_v16  ;;  %v5005_v58 = vmul.f32 1.6732632, %v6790_v45  ;;  %v5035_v38 = vsel %vm5019_vm6, %v10653_v42, %v5003_v31  ;;  %v5050_v43 = vmul.f32 1.050701, %v5034_v20  ;;  %5064 = vst [vmem:[#allocation2 + $0x41] sm:$0xff] %v5048_v61 }
 0x573   : > { %v8413_v18 = vpop.eup %8412  ;;  %v6793_v12 = vadd.f32 -1.0, %v8411_v35  ;;  %v5006_v21 = vmul.f32 1.6732632, %v6791_v39  ;;  %v5036_v10 = vsel %vm5020_vm7, %v10659_v9, %v5004_v54  ;;  %v5051_v52 = vmul.f32 1.050701, %v5035_v38  ;;  %5065 = vst [vmem:[#allocation2 + $0x51] sm:$0xff] %v5049_v57 }
 0x574   : > { %v8415_v56 = vpop.eup %8414  ;;  %v6794_v6 = vadd.f32 -1.0, %v8413_v18  ;;  %v5007_v44 = vmul.f32 1.6732632, %v6792_v48  ;;  %v5037_v0 = vsel %vm5021_vm8, %v10663_v26, %v5005_v58  ;;  %v5052_v24 = vmul.f32 1.050701, %v5036_v10  ;;  %5066 = vst [vmem:[#allocation2 + $0x61] sm:$0xff] %v5050_v43 }
 0x575   : > { %v8417_v42 = vpop.eup %8416  ;;  %v6795_v13 = vadd.f32 -1.0, %v8415_v56  ;;  %v5008_v7 = vmul.f32 1.6732632, %v6793_v12  ;;  %v5038_v5 = vsel %vm5022_vm9, %v10667_v46, %v5006_v21  ;;  %v5053_v62 = vmul.f32 1.050701, %v5037_v0  ;;  %5067 = vst [vmem:[#allocation2 + $0x71] sm:$0xff] %v5051_v52 }
 0x576   : > { %v8419_v9 = vpop.eup %8418  ;;  %v6796_v33 = vadd.f32 -1.0, %v8417_v42  ;;  %v5009_v37 = vmul.f32 1.6732632, %v6794_v6  ;;  %v5039_v30 = vsel %vm5023_vm10, %v10670_v51, %v5007_v44  ;;  %v5054_v3 = vmul.f32 1.050701, %v5038_v5  ;;  %5068 = vst [vmem:[#allocation2 + $0x81] sm:$0xff] %v5052_v24 }
 0x577   : > { %v6797_v26 = vadd.f32 -1.0, %v8419_v9  ;;  %v5010_v29 = vmul.f32 1.6732632, %v6795_v13  ;;  %v5040_v8 = vsel %vm5024_vm11, %v10675_v28, %v5008_v7  ;;  %v5055_v22 = vmul.f32 1.050701, %v5039_v30  ;;  %5069 = vst [vmem:[#allocation2 + $0xb1] sm:$0xff] %v5053_v62 }
 0x578   : > { %v5011_v46 = vmul.f32 1.6732632, %v6796_v33  ;;  %v5041_v55 = vsel %vm5025_vm12, %v10678_v36, %v5009_v37  ;;  %v5056_v19 = vmul.f32 1.050701, %v5040_v8  ;;  %5070 = vst [vmem:[#allocation2 + $0xc1] sm:$0xff] %v5054_v3  ;;  %1638 = sbr.rel (!%p1636_p4) target bundleno = 463 (0x1cf), region = 105 }
 0x579   : > { %v5012_v51 = vmul.f32 1.6732632, %v6797_v26  ;;  %v5042_v23 = vsel %vm5026_vm13, %v10681_v14, %v5010_v29  ;;  %v5057_v32 = vmul.f32 1.050701, %v5041_v55  ;;  %5071 = vst [vmem:[#allocation2 + $0xd1] sm:$0xff] %v5055_v22  ;;  %v8420_v14 = vld [vmem:[#allocation9 + $0x40] sm:$0xff] (%p1636_p4)  }
 0x57a   : > { %v5043_v28 = vsel %vm5027_vm14, %v10685_v60, %v5011_v46  ;;  %v5058_v47 = vmul.f32 1.050701, %v5042_v23  ;;  %5072 = vst [vmem:[#allocation2 + $0xe1] sm:$0xff] %v5056_v19  ;;  %v8421_v11 = vld [vmem:[#allocation9 + $0xc0] sm:$0xff] (%p1636_p4)   ;;  %7689 = vmatprep.subr.bf16.mxu0 (%p1636_p4), %v8420_v14  ;;  %v8425_v34 = vld [vmem:[#allocation9 + $0xc8] sm:$0xff] (%p1636_p4)   ;;  %v8428_v27 = vld [vmem:[#allocation9 + $0x50] sm:$0xff] (%p1636_p4)  }
 0x57b   : > { %v5044_v63 = vsel %vm5028_vm15, %v10689_v41, %v5012_v51  ;;  %v5059_v50 = vmul.f32 1.050701, %v5043_v28  ;;  %5073 = vst [vmem:[#allocation2 + $0xf1] sm:$0xff] %v5057_v32  ;;  %v8422_v60 = vld [vmem:[#allocation9] sm:$0xff] (%p1636_p4)   ;;  %7753 = vmatprep.subr.bf16.mxu1 (%p1636_p4), %v8421_v11  ;;  %v8424_v41 = vld [vmem:[#allocation9 + $0x48] sm:$0xff] (%p1636_p4)   ;;  %v8429_v49 = vld [vmem:[#allocation9 + $0xd0] sm:$0xff] (%p1636_p4)  }
 0x57c   : > { %v5060_v36 = vmul.f32 1.050701, %v5044_v63  ;;  %5074 = vst [vmem:[#allocation2 + $0x101] sm:$0xff] %v5058_v47  ;;  %v8423_v2 = vld [vmem:[#allocation9 + $0x80] sm:$0xff] (%p1636_p4)   ;;  %7690 = vmatpush3.bf16.msra.mxu0 (%p1636_p4), %v8422_v60  ;;  %v8426_v53 = vld [vmem:[#allocation9 + $0x8] sm:$0xff] (%p1636_p4)   ;;  %v8430_v15 = vld [vmem:[#allocation9 + $0x10] sm:$0xff] (%p1636_p4)  }
 0x57d   : > { %5075 = vst [vmem:[#allocation2 + $0x111] sm:$0xff] %v5059_v50  ;;  %7754 = vmatpush3.bf16.msra.mxu1 (%p1636_p4), %v8423_v2  ;;  %7691 = vmatprep.subr.bf16.mxu0 (%p1636_p4), %v8424_v41  ;;  %v8427_v17 = vld [vmem:[#allocation9 + $0x88] sm:$0xff] (%p1636_p4)   ;;  %v8431_v25 = vld [vmem:[#allocation9 + $0x90] sm:$0xff] (%p1636_p4)   ;;  %v8432_v40 = vld [vmem:[#allocation9 + $0x58] sm:$0xff] (%p1636_p4)  }
 0x57e   : > { %5076 = vst [vmem:[#allocation2 + $0x121] sm:$0xff] %v5060_v36  ;;  %7755 = vmatprep.subr.bf16.mxu1 (%p1636_p4), %v8425_v34  ;;  %v8433_v4 = vld [vmem:[#allocation9 + $0xd8] sm:$0xff] (%p1636_p4)   ;;  %v8436_v31 = vld [vmem:[#allocation9 + $0x60] sm:$0xff] (%p1636_p4)   ;;  %v8440_v39 = vld [vmem:[#allocation9 + $0x68] sm:$0xff] (%p1636_p4)  }
 0x57f   :  { %v8434_v59 = vld [vmem:[#allocation9 + $0x18] sm:$0xff]   ;;  %v8437_v1 = vld [vmem:[#allocation9 + $0xe0] sm:$0xff]   ;;  %v8441_v54 = vld [vmem:[#allocation9 + $0xe8] sm:$0xff]  }
 0x580   :  { %7692 = vmatpush3.bf16.msra.mxu0 %v8426_v53  ;;  %v8435_v45 = vld [vmem:[#allocation9 + $0x98] sm:$0xff]   ;;  %v8438_v61 = vld [vmem:[#allocation9 + $0x20] sm:$0xff]   ;;  %v8442_v20 = vld [vmem:[#allocation9 + $0x28] sm:$0xff]  }
 0x581   :  { %7756 = vmatpush3.bf16.msra.mxu1 %v8427_v17  ;;  %7693 = vmatprep.subr.bf16.mxu0 %v8428_v27  ;;  %v8439_v16 = vld [vmem:[#allocation9 + $0xa0] sm:$0xff]   ;;  %v8443_v57 = vld [vmem:[#allocation9 + $0xa8] sm:$0xff]   ;;  %v8444_v35 = vld [vmem:[#allocation9 + $0x70] sm:$0xff]  }
 0x582   :  { %7757 = vmatprep.subr.bf16.mxu1 %v8429_v49  ;;  %v8445_v48 = vld [vmem:[#allocation9 + $0xf0] sm:$0xff]   ;;  %v8448_v43 = vld [vmem:[#allocation9 + $0x78] sm:$0xff]   ;;  %v5254_v10 = vld [vmem:[#allocation2 + $0x1] sm:$0xff] }
 0x583   :  { %v8446_v58 = vld [vmem:[#allocation9 + $0x30] sm:$0xff]   ;;  %v8449_v18 = vld [vmem:[#allocation9 + $0xf8] sm:$0xff]   ;;  %v5319_v44 = vld [vmem:[#allocation2 + $0x20] sm:$0xff] }
 0x584   :  { %7694 = vmatpush3.bf16.msra.mxu0 %v8430_v15  ;;  %v8447_v38 = vld [vmem:[#allocation9 + $0xb0] sm:$0xff]   ;;  %v8450_v12 = vld [vmem:[#allocation9 + $0x38] sm:$0xff]   ;;  %v5222_v0 = vld [vmem:[#allocation2] sm:$0xff] }
 0x585   :  { %7758 = vmatpush3.bf16.msra.mxu1 %v8431_v25  ;;  %7695 = vmatprep.subr.bf16.mxu0 %v8432_v40  ;;  %v8451_v21 = vld [vmem:[#allocation9 + $0xb8] sm:$0xff]   ;;  %v5318_v56 = vld [vmem:[#allocation2 + $0x10] sm:$0xff]  ;;  %v5286_v24 = vld [vmem:[#allocation2 + $0x2] sm:$0xff] }
 0x586   :  { %7759 = vmatprep.subr.bf16.mxu1 %v8433_v4  ;;  %v10759_v52 = vld [vmem:[#allocation2 + $0x11] sm:$0xff]  ;;  %v5334_v42 = vpack.c.bf16 %v5319_v44, %v5318_v56  ;;  %v5238_v13 = vpack.c.bf16 %v5318_v56, %v5222_v0  ;;  %v8452_v62 = vld [vmem:[#allocation9 + $0x140] sm:$0xff]   ;;  %v8456_v28 = vld [vmem:[#allocation9 + $0x148] sm:$0xff]  }
 0x587   :  { %v5270_v6 = vpack.c.bf16 %v10759_v52, %v5254_v10  ;;  %v10762_v7 = vld [vmem:[#allocation2 + $0x12] sm:$0xff]  ;;  %v8453_v9 = vld [vmem:[#allocation9 + $0x1c0] sm:$0xff]   ;;  %v8457_v47 = vld [vmem:[#allocation9 + $0x1c8] sm:$0xff]  }
 0x588   :  { %7696 = vmatpush3.bf16.msra.mxu0 %v8434_v59  ;;  %v5302_v5 = vpack.c.bf16 %v10762_v7, %v5286_v24  ;;  %6149 = vmatprep.mubr.bf16.mxu1 %v5334_v42  ;;  %v8454_v33 = vld [vmem:[#allocation9 + $0x100] sm:$0xff]   ;;  %v10767_v3 = vld [vmem:[#allocation2 + $0x31] sm:$0xff]  ;;  %v8458_v63 = vld [vmem:[#allocation9 + $0x108] sm:$0xff]  }
 0x589   :  { %7760 = vmatpush3.bf16.msra.mxu1 %v8435_v45  ;;  %7697 = vmatprep.subr.bf16.mxu0 %v8436_v31  ;;  %v8455_v37 = vld [vmem:[#allocation9 + $0x180] sm:$0xff]   ;;  %v5320_v29 = vld [vmem:[#allocation2 + $0x30] sm:$0xff]  ;;  %v8459_v50 = vld [vmem:[#allocation9 + $0x188] sm:$0xff]  }
 0x58a   :  { %7761 = vmatprep.subr.bf16.mxu1 %v8437_v1  ;;  %6052 = vmatprep.mubr.bf16.mxu0 %v5270_v6  ;;  %v10765_v30 = vld [vmem:[#allocation2 + $0x21] sm:$0xff]  ;;  %v10777_v19 = vpack.c.bf16 %v5320_v29, %v5319_v44  ;;  %v10779_v51 = vld [vmem:[#allocation2 + $0x32] sm:$0xff] }
 0x58b   :  { %v10771_v26 = vpack.c.bf16 %v10767_v3, %v10765_v30  ;;  %v5321_v8 = vld [vmem:[#allocation2 + $0x40] sm:$0xff]  ;;  %v5366_v46 = vpack.c.bf16 %v10765_v30, %v10759_v52  ;;  %v10791_v14 = vld [vmem:[#allocation2 + $0x51] sm:$0xff] }
 0x58c   :  { %7698 = vmatpush3.bf16.msra.mxu0 %v8438_v61  ;;  %v10773_v22 = vld [vmem:[#allocation2 + $0x22] sm:$0xff]  ;;  %v5335_v55 = vpack.c.bf16 %v5321_v8, %v5320_v29  ;;  %v5322_v60 = vld [vmem:[#allocation2 + $0x50] sm:$0xff] }
 0x58d   :  { %7762 = vmatpush3.bf16.msra.mxu1 %v8439_v16  ;;  %7699 = vmatprep.subr.bf16.mxu0 %v8440_v39  ;;  %v5398_v23 = vpack.c.bf16 %v10773_v22, %v10762_v7  ;;  %v10786_v32 = vpack.c.bf16 %v10779_v51, %v10773_v22  ;;  %v10789_v36 = vld [vmem:[#allocation2 + $0x41] sm:$0xff]  ;;  %v10802_v17 = vpack.c.bf16 %v5322_v60, %v5321_v8  ;;  %v10804_v27 = vld [vmem:[#allocation2 + $0x52] sm:$0xff] }
 0x58e   :  { %7763 = vmatprep.subr.bf16.mxu1 %v8441_v54  ;;  %v10796_v11 = vpack.c.bf16 %v10791_v14, %v10789_v36  ;;  %v5323_v2 = vld [vmem:[#allocation2 + $0x60] sm:$0xff]  ;;  %v8460_v25 = vld [vmem:[#allocation9 + $0x150] sm:$0xff]   ;;  %v8487_v7 = vld [vmem:[#allocation9 + $0x218] sm:$0xff]   ;;  %v11327_v52 = vpack.c.bf16 %v10789_v36, %v10767_v3 }
 0x58f   :  { %v10798_v41 = vld [vmem:[#allocation2 + $0x42] sm:$0xff]  ;;  %v5336_v53 = vpack.c.bf16 %v5323_v2, %v5322_v60  ;;  %v8461_v40 = vld [vmem:[#allocation9 + $0x1d0] sm:$0xff]  }
 0x590   :  { %7700 = vmatpush3.bf16.msra.mxu0 %v8442_v20  ;;  %v10811_v15 = vpack.c.bf16 %v10804_v27, %v10798_v41  ;;  %v8462_v4 = vld [vmem:[#allocation9 + $0x110] sm:$0xff]   ;;  %v10813_v45 = vld [vmem:[#allocation2 + $0x61] sm:$0xff]  ;;  %v11326_v49 = vpack.c.bf16 %v10798_v41, %v10779_v51 }
 0x591   :  { %7764 = vmatpush3.bf16.msra.mxu1 %v8443_v57  ;;  %7701 = vmatprep.subr.bf16.mxu0 %v8444_v35  ;;  %v8463_v59 = vld [vmem:[#allocation9 + $0x190] sm:$0xff]   ;;  %v10821_v16 = vld [vmem:[#allocation2 + $0x80] sm:$0xff]  ;;  %v8489_v22 = vld [vmem:[#allocation9 + $0x228] sm:$0xff]   ;;  %v11329_v3 = vpack.c.bf16 %v10813_v45, %v10791_v14 }
 0x592   :  { %7765 = vmatprep.subr.bf16.mxu1 %v8445_v48  ;;  %v10815_v31 = vld [vmem:[#allocation2 + $0x71] sm:$0xff]  ;;  %v10823_v39 = vld [vmem:[#allocation2 + $0x62] sm:$0xff] }
 0x593   :  { %v10819_v1 = vpack.c.bf16 %v10815_v31, %v10813_v45  ;;  %v5324_v61 = vld [vmem:[#allocation2 + $0x70] sm:$0xff]  ;;  %v5327_v44 = vld [vmem:[#allocation2 + $0xc0] sm:$0xff]  ;;  %v11328_v30 = vpack.c.bf16 %v10823_v39, %v10804_v27 }
 0x594   :  { %7702 = vmatpush3.bf16.msra.mxu0 %v8446_v58  ;;  %v5337_v20 = vpack.c.bf16 %v10821_v16, %v5324_v61  ;;  %v10829_v57 = vpack.c.bf16 %v5324_v61, %v5323_v2  ;;  %v10831_v35 = vld [vmem:[#allocation2 + $0x72] sm:$0xff]  ;;  %v5230_v0 = vld [vmem:[#allocation2 + $0xa0] sm:$0xff]  ;;  %v8473_v61 = vld [vmem:[#allocation9 + $0x1e8] sm:$0xff]  }
 0x595   :  { %7766 = vmatpush3.bf16.msra.mxu1 %v8447_v38  ;;  %7703 = vmatprep.subr.bf16.mxu0 %v8448_v43  ;;  %v10839_v58 = vpack.c.bf16 %v10831_v35, %v10823_v39  ;;  %v8464_v38 = vld [vmem:[#allocation9 + $0x158] sm:$0xff]   ;;  %v5326_v6 = vld [vmem:[#allocation2 + $0xb0] sm:$0xff]  ;;  %v8471_v29 = vld [vmem:[#allocation9 + $0x1a0] sm:$0xff]  }
 0x596   :  { %7767 = vmatprep.subr.bf16.mxu1 %v8449_v18  ;;  %v8465_v43 = vld [vmem:[#allocation9 + $0x1d8] sm:$0xff]   ;;  %v5338_v24 = vpack.c.bf16 %v5327_v44, %v5326_v6  ;;  %v5242_v42 = vpack.c.bf16 %v5326_v6, %v5230_v0  ;;  %v10849_v8 = vld [vmem:[#allocation2 + $0xc1] sm:$0xff] }
 0x597   :  { %v8466_v18 = vld [vmem:[#allocation9 + $0x118] sm:$0xff]   ;;  %v10927_v54 = vld [vmem:[#allocation2 + $0x81] sm:$0xff] }
 0x598   :  { %7704 = vmatpush3.bf16.msra.mxu0 %v8450_v12  ;;  %v8467_v12 = vld [vmem:[#allocation9 + $0x198] sm:$0xff]  }
 0x599   :  { %7768 = vmatpush3.bf16.msra.mxu1 %v8451_v21  ;;  %7817 = vmatprep.subr.bf16.mxu0 %v8452_v62  ;;  %v5262_v21 = vld [vmem:[#allocation2 + $0xa1] sm:$0xff]  ;;  %v10841_v10 = vld [vmem:[#allocation2 + $0xb1] sm:$0xff] }
 0x59a   :  { %7881 = vmatprep.subr.bf16.mxu1 %v8453_v9  ;;  %v5274_v56 = vpack.c.bf16 %v10841_v10, %v5262_v21  ;;  %v8468_v9 = vld [vmem:[#allocation9 + $0x160] sm:$0xff]   ;;  %v10942_v48 = vld [vmem:[#allocation2 + $0x131] sm:$0xff] }
 0x59b   :  { %6053 = vmatmul.mubr.bf16.vlgmr.msra.gmra.mrb[0].mxu0 %v5238_v13  ;;  %v5294_v13 = vld [vmem:[#allocation2 + $0xa2] sm:$0xff] }
 0x59c   :  { %6150 = vmatmul.mubr.bf16.vlgmr.msra.gmra.mrb[0].mxu1 %v5302_v5  ;;  %7818 = vmatpush3.bf16.msra.mxu0 %v8454_v33  ;;  %v10844_v5 = vld [vmem:[#allocation2 + $0xb2] sm:$0xff]  ;;  %v8469_v33 = vld [vmem:[#allocation9 + $0x1e0] sm:$0xff]  }
 0x59d   :  { %7882 = vmatpush3.bf16.msra.mxu1 %v8455_v37  ;;  %6060 = vmatprep.mubr.bf16.mxu0 %v10771_v26  ;;  %v5306_v62 = vpack.c.bf16 %v10844_v5, %v5294_v13  ;;  %v8470_v37 = vld [vmem:[#allocation9 + $0x120] sm:$0xff]  }
 0x59e   :  { %6157 = vmatprep.mubr.bf16.mxu1 %v5335_v55  ;;  %7819 = vmatprep.subr.bf16.mxu0 %v8456_v28  ;;  %v10851_v55 = vld [vmem:[#allocation2 + $0xd1] sm:$0xff]  ;;  %v5331_v21 = vld [vmem:[#allocation2 + $0x100] sm:$0xff] }
 0x59f   :  { %7883 = vmatprep.subr.bf16.mxu1 %v8457_v47  ;;  %v5328_v28 = vld [vmem:[#allocation2 + $0xd0] sm:$0xff]  ;;  %v5329_v47 = vld [vmem:[#allocation2 + $0xe0] sm:$0xff] }
 0x5a0   :  { %7820 = vmatpush3.bf16.msra.mxu0 %v8458_v63  ;;  %v5339_v60 = vpack.c.bf16 %v5329_v47, %v5328_v28  ;;  %v10859_v2 = vpack.c.bf16 %v5328_v28, %v5327_v44  ;;  %v10894_v28 = vld [vmem:[#allocation2 + $0x101] sm:$0xff] }
 0x5a1   :  { %7884 = vmatpush3.bf16.msra.mxu1 %v8459_v50  ;;  %7821 = vmatprep.subr.bf16.mxu0 %v8460_v25  ;;  %v10857_v50 = vpack.c.bf16 %v10851_v55, %v10849_v8  ;;  %v10863_v25 = vld [vmem:[#allocation2 + $0xd2] sm:$0xff]  ;;  %v10922_v63 = vld [vmem:[#allocation2 + $0x82] sm:$0xff] }
 0x5a2   :  { %7885 = vmatprep.subr.bf16.mxu1 %v8461_v40 }
 0x5a3   :  { %6061 = vmatmul.mubr.bf16.gmra.mrb[4].mxu0 %v10777_v19 }
 0x5a4   :  { %6158 = vmatmul.mubr.bf16.gmra.mrb[4].mxu1 %v10786_v32  ;;  %6068 = vmatprep.mubr.bf16.mxu0 %v10796_v11 }
 0x5a5   :  { %6165 = vmatprep.mubr.bf16.mxu1 %v5336_v53  ;;  %7822 = vmatpush3.bf16.msra.mxu0 %v8462_v4  ;;  %v10861_v53 = vld [vmem:[#allocation2 + $0xc2] sm:$0xff] }
 0x5a6   :  { %7886 = vmatpush3.bf16.msra.mxu1 %v8463_v59  ;;  %7823 = vmatprep.subr.bf16.mxu0 %v8464_v38  ;;  %v10867_v40 = vpack.c.bf16 %v10863_v25, %v10861_v53  ;;  %v8472_v4 = vld [vmem:[#allocation9 + $0x168] sm:$0xff]   ;;  %v5401_v59 = vpack.c.bf16 %v10922_v63, %v10831_v35  ;;  %v11330_v51 = vpack.c.bf16 %v10861_v53, %v10844_v5 }
 0x5a7   :  { %7887 = vmatprep.subr.bf16.mxu1 %v8465_v43  ;;  %v8475_v38 = vld [vmem:[#allocation9 + $0x1a8] sm:$0xff]  }
 0x5a8   :  { %v10871_v43 = vld [vmem:[#allocation2 + $0xe1] sm:$0xff] }
 0x5a9   :  { %7824 = vmatpush3.bf16.msra.mxu0 %v8466_v18  ;;  %v10874_v18 = vld [vmem:[#allocation2 + $0xf1] sm:$0xff]  ;;  %v10940_v35 = vld [vmem:[#allocation2 + $0x121] sm:$0xff]  ;;  %v11333_v14 = vpack.c.bf16 %v10871_v43, %v10851_v55 }
 0x5aa   :  { %7888 = vmatpush3.bf16.msra.mxu1 %v8467_v12  ;;  %7825 = vmatprep.subr.bf16.mxu0 %v8468_v9  ;;  %v5330_v12 = vld [vmem:[#allocation2 + $0xf0] sm:$0xff]  ;;  %v10880_v6 = vpack.c.bf16 %v10874_v18, %v10871_v43  ;;  %v8484_v9 = vld [vmem:[#allocation9 + $0x200] sm:$0xff]   ;;  %v11335_v41 = vpack.c.bf16 %v10894_v28, %v10874_v18 }
 0x5ab   :  { %6069 = vmatmul.mubr.bf16.gmra.mrb[8].mxu0 %v10802_v17  ;;  %7889 = vmatprep.subr.bf16.mxu1 %v8469_v33  ;;  %v5340_v44 = vpack.c.bf16 %v5331_v21, %v5330_v12  ;;  %v10882_v0 = vpack.c.bf16 %v5330_v12, %v5329_v47  ;;  %v8477_v33 = vld [vmem:[#allocation9 + $0x1f0] sm:$0xff]  }
 0x5ac   :  { %6166 = vmatmul.mubr.bf16.gmra.mrb[8].mxu1 %v10811_v15  ;;  %6076 = vmatprep.mubr.bf16.mxu0 %v10819_v1  ;;  %v10896_v47 = vld [vmem:[#allocation2 + $0x111] sm:$0xff] }
 0x5ad   :  { %6173 = vmatprep.mubr.bf16.mxu1 %v5337_v20  ;;  %7826 = vmatpush3.bf16.msra.mxu0 %v8470_v37  ;;  %v8474_v20 = vld [vmem:[#allocation9 + $0x128] sm:$0xff]   ;;  %v8478_v37 = vld [vmem:[#allocation9 + $0x130] sm:$0xff]  }
 0x5ae   :  { %7890 = vmatpush3.bf16.msra.mxu1 %v8471_v29  ;;  %7827 = vmatprep.subr.bf16.mxu0 %v8472_v4  ;;  %v8479_v29 = vld [vmem:[#allocation9 + $0x1b0] sm:$0xff]   ;;  %v10898_v4 = vld [vmem:[#allocation2 + $0x120] sm:$0xff] }
 0x5af   :  { %7891 = vmatprep.subr.bf16.mxu1 %v8473_v61  ;;  %v10929_v61 = vld [vmem:[#allocation2 + $0x90] sm:$0xff] }
 0x5b1   :  { %7828 = vmatpush3.bf16.msra.mxu0 %v8474_v20  ;;  %v10905_v20 = vpack.c.bf16 %v10896_v47, %v10894_v28 }
 0x5b2   :  { %7892 = vmatpush3.bf16.msra.mxu1 %v8475_v38 }
 0x5b3   :  { %6077 = vmatmul.mubr.bf16.gmra.mrb[12].mxu0 %v10829_v57  ;;  %7893 = vmatprep.subr.bf16.mxu1 %v8477_v33  ;;  %v10912_v33 = vld [vmem:[#allocation2 + $0x112] sm:$0xff] }
 0x5b4   :  { %6174 = vmatmul.mubr.bf16.gmra.mrb[12].mxu1 %v10839_v58  ;;  %6084 = vmatprep.mubr.bf16.mxu0 %v5274_v56  ;;  %v8481_v56 = vld [vmem:[#allocation9 + $0x1f8] sm:$0xff]  }
 0x5b5   :  { %6181 = vmatprep.mubr.bf16.mxu1 %v5338_v24  ;;  %v10884_v24 = vld [vmem:[#allocation2 + $0xe2] sm:$0xff] }
 0x5b6   :  { %7894 = vmatpush3.bf16.msra.mxu1 %v8479_v29  ;;  %v8480_v29 = vld [vmem:[#allocation9 + $0x178] sm:$0xff]   ;;  %v11332_v36 = vpack.c.bf16 %v10884_v24, %v10863_v25 }
 0x5b7   :  { %7895 = vmatprep.subr.bf16.mxu1 %v8481_v56 }
 0x5bb   :  { %6085 = vmatmul.mubr.bf16.gmra.mrb[16].mxu0 %v5242_v42  ;;  %v10886_v42 = vld [vmem:[#allocation2 + $0xf2] sm:$0xff] }
 0x5bc   :  { %6182 = vmatmul.mubr.bf16.gmra.mrb[16].mxu1 %v5306_v62  ;;  %6092 = vmatprep.mubr.bf16.mxu0 %v10857_v50  ;;  %v10890_v13 = vpack.c.bf16 %v10886_v42, %v10884_v24  ;;  %v8476_v62 = vld [vmem:[#allocation9 + $0x170] sm:$0xff]  }
 0x5bd   :  { %6189 = vmatprep.mubr.bf16.mxu1 %v5339_v60  ;;  %7829 = vmatprep.subr.bf16.mxu0 %v8476_v62  ;;  %v5332_v60 = vld [vmem:[#allocation2 + $0x110] sm:$0xff]  ;;  %v10910_v62 = vld [vmem:[#allocation2 + $0x102] sm:$0xff] }
 0x5be   :  { %7830 = vmatpush3.bf16.msra.mxu0 %v8478_v37  ;;  %v5341_v38 = vpack.c.bf16 %v10898_v4, %v5332_v60  ;;  %v10908_v12 = vpack.c.bf16 %v5332_v60, %v5331_v21  ;;  %v10918_v37 = vpack.c.bf16 %v10912_v33, %v10910_v62  ;;  %v8482_v21 = vld [vmem:[#allocation9 + $0x138] sm:$0xff]  }
 0x5bf   :  { %7831 = vmatprep.subr.bf16.mxu0 %v8480_v29  ;;  %v8483_v60 = vld [vmem:[#allocation9 + $0x1b8] sm:$0xff]   ;;  %v5369_v29 = vpack.c.bf16 %v10927_v54, %v10815_v31  ;;  %v10950_v31 = vld [vmem:[#allocation2 + $0x130] sm:$0xff] }
 0x5c0   :  { %7896 = vmatpush3.bf16.msra.mxu1 %v8483_v60  ;;  %v10938_v60 = vld [vmem:[#allocation2 + $0x122] sm:$0xff]  ;;  %v11337_v27 = vpack.c.bf16 %v10950_v31, %v10898_v4 }
 0x5c1   :  { %8105 = vmatprep.subr.bf16.mxu1 %v8484_v9  ;;  %v5405_v34 = vpack.c.bf16 %v10938_v60, %v10912_v33 }
 0x5c2   :  { %7832 = vmatpush3.bf16.msra.mxu0 %v8482_v21  ;;  %v5433_v21 = vpack.c.bf16 %v10929_v61, %v10821_v16  ;;  %v10956_v61 = vld [vmem:[#allocation2 + $0x132] sm:$0xff]  ;;  %v8485_v16 = vld [vmem:[#allocation9 + $0x208] sm:$0xff]  }
 0x5c3   :  { %6093 = vmatmul.mubr.bf16.gmra.mrb[20].mxu0 %v10859_v2  ;;  %8057 = vmatprep.subr.bf16.mxu0 %v8484_v9 }
 0x5c4   :  { %6190 = vmatmul.mubr.bf16.gmra.mrb[20].mxu1 %v10867_v40  ;;  %6100 = vmatprep.mubr.bf16.mxu0 %v10880_v6 }
 0x5c5   :  { %6197 = vmatprep.mubr.bf16.mxu1 %v5340_v44  ;;  %v5453_v44 = vld [vmem:[#allocation2 + $0x91] sm:$0xff] }
 0x5c6   :  { %v5465_v56 = vpack.c.bf16 %v5453_v44, %v10927_v54  ;;  %v5373_v44 = vpack.c.bf16 %v10940_v35, %v10896_v47  ;;  %v10954_v54 = vld [vmem:[#allocation2 + $0x92] sm:$0xff] }
 0x5cb   :  { %6101 = vmatmul.mubr.bf16.gmra.mrb[24].mxu0 %v10882_v0 }
 0x5cc   :  { %6198 = vmatmul.mubr.bf16.gmra.mrb[24].mxu1 %v10890_v13  ;;  %6108 = vmatprep.mubr.bf16.mxu0 %v10905_v20 }
 0x5cd   :  { %6205 = vmatprep.mubr.bf16.mxu1 %v5341_v38  ;;  %v8486_v38 = vld [vmem:[#allocation9 + $0x210] sm:$0xff]  }
 0x5d3   :  { %6109 = vmatmul.mubr.bf16.gmra.mrb[28].mxu0 %v10908_v12 }
 0x5d4   :  { %6206 = vmatmul.mubr.bf16.gmra.mrb[28].mxu1 %v10918_v37  ;;  %6246 = vmatprep.mubr.bf16.mxu0 %v5398_v23  ;;  %v11331_v23 = vpack.c.bf16 %v10849_v8, %v10841_v10 }
 0x5d5   :  { %6343 = vmatprep.mubr.bf16.mxu1 %v10771_v26  ;;  %v8488_v26 = vld [vmem:[#allocation9 + $0x220] sm:$0xff]  }
 0x5db   :  { %6247 = vmatmul.mubr.bf16.vlgmr.msra.gmra.mrb[32].mxu0 %v5366_v46  ;;  %v8490_v46 = vld [vmem:[#allocation9 + $0x230] sm:$0xff]  }
 0x5dc   :  { %6344 = vmatmul.mubr.bf16.vlgmr.msra.gmra.mrb[32].mxu1 %v10777_v19  ;;  %8058 = vmatpush3.bf16.msra.mxu0 %v8484_v9  ;;  %v8491_v19 = vld [vmem:[#allocation9 + $0x238] sm:$0xff]  }
 0x5dd   :  { %8113 = vmatpush3.bf16.msra.mxu1 %v8484_v9  ;;  %6254 = vmatprep.mubr.bf16.mxu0 %v11326_v49  ;;  %v11339_v49 = vpack.c.bf16 %v10956_v61, %v10938_v60 }
 0x5de   :  { %6351 = vmatprep.mubr.bf16.mxu1 %v10796_v11  ;;  %8059 = vmatprep.subr.bf16.mxu0 %v8485_v16  ;;  %v11334_v11 = vpack.c.bf16 %v10910_v62, %v10886_v42 }
 0x5df   :  { %8106 = vmatprep.subr.bf16.mxu1 %v8485_v16 }
 0x5e0   :  { %8060 = vmatpush3.bf16.msra.mxu0 %v8485_v16 }
 0x5e1   :  { %8114 = vmatpush3.bf16.msra.mxu1 %v8485_v16  ;;  %8061 = vmatprep.subr.bf16.mxu0 %v8486_v38 }
 0x5e2   :  { %8107 = vmatprep.subr.bf16.mxu1 %v8486_v38 }
 0x5e3   :  { %6255 = vmatmul.mubr.bf16.gmra.mrb[36].mxu0 %v11327_v52 }
 0x5e4   :  { %6352 = vmatmul.mubr.bf16.gmra.mrb[36].mxu1 %v10802_v17  ;;  %6262 = vmatprep.mubr.bf16.mxu0 %v11328_v30  ;;  %v11336_v17 = vpack.c.bf16 %v10942_v48, %v10940_v35 }
 0x5e5   :  { %6359 = vmatprep.mubr.bf16.mxu1 %v10819_v1  ;;  %8062 = vmatpush3.bf16.msra.mxu0 %v8486_v38 }
 0x5e6   :  { %8115 = vmatpush3.bf16.msra.mxu1 %v8486_v38  ;;  %8063 = vmatprep.subr.bf16.mxu0 %v8487_v7 }
 0x5e7   :  { %8108 = vmatprep.subr.bf16.mxu1 %v8487_v7 }
 0x5e9   :  { %8064 = vmatpush3.bf16.msra.mxu0 %v8487_v7 }
 0x5ea   :  { %8116 = vmatpush3.bf16.msra.mxu1 %v8487_v7  ;;  %8065 = vmatprep.subr.bf16.mxu0 %v8488_v26 }
 0x5eb   :  { %6263 = vmatmul.mubr.bf16.gmra.mrb[40].mxu0 %v11329_v3  ;;  %8109 = vmatprep.subr.bf16.mxu1 %v8488_v26 }
 0x5ec   :  { %6360 = vmatmul.mubr.bf16.gmra.mrb[40].mxu1 %v10829_v57  ;;  %6270 = vmatprep.mubr.bf16.mxu0 %v5401_v59 }
 0x5ed   :  { %6367 = vmatprep.mubr.bf16.mxu1 %v5465_v56  ;;  %8066 = vmatpush3.bf16.msra.mxu0 %v8488_v26 }
 0x5ee   :  { %8117 = vmatpush3.bf16.msra.mxu1 %v8488_v26  ;;  %8067 = vmatprep.subr.bf16.mxu0 %v8489_v22 }
 0x5ef   :  { %8110 = vmatprep.subr.bf16.mxu1 %v8489_v22 }
 0x5f1   :  { %8068 = vmatpush3.bf16.msra.mxu0 %v8489_v22 }
 0x5f2   :  { %8118 = vmatpush3.bf16.msra.mxu1 %v8489_v22  ;;  %8069 = vmatprep.subr.bf16.mxu0 %v8490_v46 }
 0x5f3   :  { %6271 = vmatmul.mubr.bf16.gmra.mrb[44].mxu0 %v5369_v29  ;;  %8111 = vmatprep.subr.bf16.mxu1 %v8490_v46 }
 0x5f4   :  { %6368 = vmatmul.mubr.bf16.gmra.mrb[44].mxu1 %v5433_v21  ;;  %6278 = vmatprep.mubr.bf16.mxu0 %v11330_v51 }
 0x5f5   :  { %6375 = vmatprep.mubr.bf16.mxu1 %v10857_v50  ;;  %8070 = vmatpush3.bf16.msra.mxu0 %v8490_v46 }
 0x5f6   :  { %8119 = vmatpush3.bf16.msra.mxu1 %v8490_v46  ;;  %8071 = vmatprep.subr.bf16.mxu0 %v8491_v19 }
 0x5f7   :  { %8112 = vmatprep.subr.bf16.mxu1 %v8491_v19 }
 0x5f9   :  { %8072 = vmatpush3.bf16.msra.mxu0 %v8491_v19 }
 0x5fa   :  { %8120 = vmatpush3.bf16.msra.mxu1 %v8491_v19 }
 0x5fb   :  { %6279 = vmatmul.mubr.bf16.gmra.mrb[48].mxu0 %v11331_v23 }
 0x5fc   :  { %6376 = vmatmul.mubr.bf16.gmra.mrb[48].mxu1 %v10859_v2  ;;  %6286 = vmatprep.mubr.bf16.mxu0 %v11332_v36 }
 0x5fd   :  { %6383 = vmatprep.mubr.bf16.mxu1 %v10880_v6 }
 0x603   :  { %6287 = vmatmul.mubr.bf16.gmra.mrb[52].mxu0 %v11333_v14 }
 0x604   :  { %6384 = vmatmul.mubr.bf16.gmra.mrb[52].mxu1 %v10882_v0  ;;  %6294 = vmatprep.mubr.bf16.mxu0 %v11334_v11 }
 0x605   :  { %6391 = vmatprep.mubr.bf16.mxu1 %v10905_v20 }
 0x60b   :  { %6295 = vmatmul.mubr.bf16.gmra.mrb[56].mxu0 %v11335_v41 }
 0x60c   :  { %6392 = vmatmul.mubr.bf16.gmra.mrb[56].mxu1 %v10908_v12  ;;  %6302 = vmatprep.mubr.bf16.mxu0 %v5405_v34  ;;  %v11338_v34 = vpack.c.bf16 %v10954_v54, %v10922_v63 }
 0x60d   :  { %6399 = vmatprep.mubr.bf16.mxu1 %v11336_v17 }
 0x613   :  { %6303 = vmatmul.mubr.bf16.gmra.mrb[60].mxu0 %v5373_v44 }
 0x614   :  { %6400 = vmatmul.mubr.bf16.gmra.mrb[60].mxu1 %v11337_v27  ;;  %8073 = vmatprep.mubr.bf16.mxu0 %v10786_v32 }
 0x615   :  { %8081 = vmatprep.mubr.bf16.mxu1 %v10867_v40 }
 0x61b   :  { %8074 = vmatmul.mubr.bf16.vlgmr.msra.gmra.mrb[64].mxu0 %v10811_v15  ;;  %v11039_v15 = vld [vmem:[%s11192_s12] ss:$0 sm:$0xff] }
 0x61c   :  { %8082 = vmatmul.mubr.bf16.vlgmr.msra.gmra.mrb[64].mxu1 %v10890_v13  ;;  %8077 = vmatprep.mubr.bf16.mxu0 %v10839_v58 }
 0x61d   :  { %8085 = vmatprep.mubr.bf16.mxu1 %v10918_v37 }
 0x623   :  { %8078 = vmatmul.mubr.bf16.gmra.mrb[68].mxu0 %v11338_v34 }
 0x624   :  { %8086 = vmatmul.mubr.bf16.gmra.mrb[68].mxu1 %v11339_v49 }
 0x66e   :  { %v7705_v45 = vpop.f32.mrb[0].mxu0 }
 0x66f   :  { %v7769_v32 = vpop.f32.mrb[0].mxu1  ;;  %v7706_v1 = vpop.f32.mrb[1].mxu0 }
 0x670   :  { %v7707_v39 = vadd.f32 %v7706_v1, %v7705_v45  ;;  %v7770_v57 = vpop.f32.mrb[1].mxu1  ;;  %v7708_v48 = vpop.f32.mrb[2].mxu0 }
 0x671   :  { %v7771_v58 = vadd.f32 %v7770_v57, %v7769_v32  ;;  %v7772_v10 = vpop.f32.mrb[2].mxu1  ;;  %v7709_v5 = vpop.f32.mrb[3].mxu0 }
 0x672   :  { %v6055_v8 = vadd.f32 %v7707_v39, %v11039_v15  ;;  %v7710_v55 = vadd.f32 %v7709_v5, %v7708_v48  ;;  %v7773_v63 = vpop.f32.mrb[3].mxu1 }
 0x673   :  { %v7774_v50 = vadd.f32 %v7773_v63, %v7772_v10 }
 0x674   :  { %v11042_v2 = vadd.f32 %v7771_v58, %v6055_v8  ;;  %v6058_v53 = vadd.f32 %v7710_v55, %v11039_v15 }
 0x676   :  { %v11045_v25 = vadd.f32 %v7774_v50, %v6058_v53  ;;  %v7711_v40 = vpop.f32.mrb[4].mxu0 }
 0x677   :  { %v7775_v59 = vpop.f32.mrb[4].mxu1  ;;  %v7712_v43 = vpop.f32.mrb[5].mxu0 }
 0x678   :  { %v7713_v18 = vadd.f32 %v7712_v43, %v7711_v40  ;;  %v7776_v6 = vpop.f32.mrb[5].mxu1  ;;  %v7714_v0 = vpop.f32.mrb[6].mxu0 }
 0x679   :  { %v7777_v24 = vadd.f32 %v7776_v6, %v7775_v59  ;;  %v7778_v42 = vpop.f32.mrb[6].mxu1  ;;  %v7715_v13 = vpop.f32.mrb[7].mxu0 }
 0x67a   :  { %v6063_v9 = vadd.f32 %v7713_v18, %v11039_v15  ;;  %v7716_v28 = vadd.f32 %v7715_v13, %v7714_v0  ;;  %v7779_v47 = vpop.f32.mrb[7].mxu1 }
 0x67b   :  { %v7780_v4 = vadd.f32 %v7779_v47, %v7778_v42 }
 0x67c   :  { %v11048_v20 = vadd.f32 %v7777_v24, %v6063_v9  ;;  %v6066_v12 = vadd.f32 %v7716_v28, %v11039_v15 }
 0x67e   :  { %v11051_v62 = vadd.f32 %v7780_v4, %v6066_v12  ;;  %v7717_v33 = vpop.f32.mrb[8].mxu0 }
 0x67f   :  { %v7781_v37 = vpop.f32.mrb[8].mxu1  ;;  %v7718_v56 = vpop.f32.mrb[9].mxu0 }
 0x680   :  { %v7719_v29 = vadd.f32 %v7718_v56, %v7717_v33  ;;  %v7782_v21 = vpop.f32.mrb[9].mxu1  ;;  %v7720_v60 = vpop.f32.mrb[10].mxu0 }
 0x681   :  { %v7783_v35 = vadd.f32 %v7782_v21, %v7781_v37  ;;  %v7784_v44 = vpop.f32.mrb[10].mxu1  ;;  %v7721_v31 = vpop.f32.mrb[11].mxu0 }
 0x682   :  { %v6071_v16 = vadd.f32 %v7719_v29, %v11039_v15  ;;  %v7722_v54 = vadd.f32 %v7721_v31, %v7720_v60  ;;  %v7785_v61 = vpop.f32.mrb[11].mxu1 }
 0x683   :  { %v7786_v38 = vadd.f32 %v7785_v61, %v7784_v44 }
 0x684   :  { %v11054_v7 = vadd.f32 %v7783_v35, %v6071_v16  ;;  %v6074_v52 = vadd.f32 %v7722_v54, %v11039_v15 }
 0x686   :  { %v11057_v30 = vadd.f32 %v7786_v38, %v6074_v52  ;;  %v7723_v26 = vpop.f32.mrb[12].mxu0 }
 0x687   :  { %v7787_v22 = vpop.f32.mrb[12].mxu1  ;;  %v7724_v3 = vpop.f32.mrb[13].mxu0 }
 0x688   :  { %v7725_v46 = vadd.f32 %v7724_v3, %v7723_v26  ;;  %v7788_v19 = vpop.f32.mrb[13].mxu1  ;;  %v7726_v51 = vpop.f32.mrb[14].mxu0 }
 0x689   :  { %v7789_v23 = vadd.f32 %v7788_v19, %v7787_v22  ;;  %v7790_v36 = vpop.f32.mrb[14].mxu1  ;;  %v7727_v14 = vpop.f32.mrb[15].mxu0 }
 0x68a   :  { %v6079_v11 = vadd.f32 %v7725_v46, %v11039_v15  ;;  %v7728_v41 = vadd.f32 %v7727_v14, %v7726_v51  ;;  %v7791_v17 = vpop.f32.mrb[15].mxu1 }
 0x68b   :  { %v7792_v27 = vadd.f32 %v7791_v17, %v7790_v36 }
 0x68c   :  { %v11060_v34 = vadd.f32 %v7789_v23, %v6079_v11  ;;  %v6082_v49 = vadd.f32 %v7728_v41, %v11039_v15 }
 0x68e   :  { %v11063_v45 = vadd.f32 %v7792_v27, %v6082_v49  ;;  %v7729_v32 = vpop.f32.mrb[16].mxu0 }
 0x68f   :  { %v7793_v1 = vpop.f32.mrb[16].mxu1  ;;  %v7730_v39 = vpop.f32.mrb[17].mxu0 }
 0x690   :  { %v7731_v57 = vadd.f32 %v7730_v39, %v7729_v32  ;;  %v7794_v48 = vpop.f32.mrb[17].mxu1  ;;  %v7732_v58 = vpop.f32.mrb[18].mxu0 }
 0x691   :  { %v7795_v10 = vadd.f32 %v7794_v48, %v7793_v1  ;;  %v7796_v5 = vpop.f32.mrb[18].mxu1  ;;  %v7733_v8 = vpop.f32.mrb[19].mxu0 }
 0x692   :  { %v6087_v55 = vadd.f32 %v7731_v57, %v11039_v15  ;;  %v7734_v63 = vadd.f32 %v7733_v8, %v7732_v58  ;;  %v7797_v50 = vpop.f32.mrb[19].mxu1 }
 0x693   :  { %v7798_v53 = vadd.f32 %v7797_v50, %v7796_v5 }
 0x694   :  { %v11066_v40 = vadd.f32 %v7795_v10, %v6087_v55  ;;  %v6090_v59 = vadd.f32 %v7734_v63, %v11039_v15 }
 0x696   :  { %v11069_v43 = vadd.f32 %v7798_v53, %v6090_v59  ;;  %v7735_v18 = vpop.f32.mrb[20].mxu0 }
 0x697   :  { %v7799_v6 = vpop.f32.mrb[20].mxu1  ;;  %v7736_v0 = vpop.f32.mrb[21].mxu0 }
 0x698   :  { %v7737_v24 = vadd.f32 %v7736_v0, %v7735_v18  ;;  %v7800_v42 = vpop.f32.mrb[21].mxu1  ;;  %v7738_v13 = vpop.f32.mrb[22].mxu0 }
 0x699   :  { %v7801_v9 = vadd.f32 %v7800_v42, %v7799_v6  ;;  %v7802_v28 = vpop.f32.mrb[22].mxu1  ;;  %v7739_v47 = vpop.f32.mrb[23].mxu0 }
 0x69a   :  { %v6095_v4 = vadd.f32 %v7737_v24, %v11039_v15  ;;  %v7740_v12 = vadd.f32 %v7739_v47, %v7738_v13  ;;  %v7803_v33 = vpop.f32.mrb[23].mxu1 }
 0x69b   :  { %v7804_v37 = vadd.f32 %v7803_v33, %v7802_v28 }
 0x69c   :  { %v11072_v56 = vadd.f32 %v7801_v9, %v6095_v4  ;;  %v6098_v29 = vadd.f32 %v7740_v12, %v11039_v15 }
 0x69e   :  { %v11075_v21 = vadd.f32 %v7804_v37, %v6098_v29  ;;  %v7741_v60 = vpop.f32.mrb[24].mxu0 }
 0x69f   :  { %v7805_v35 = vpop.f32.mrb[24].mxu1  ;;  %v7742_v44 = vpop.f32.mrb[25].mxu0 }
 0x6a0   :  { %v7743_v31 = vadd.f32 %v7742_v44, %v7741_v60  ;;  %v7806_v16 = vpop.f32.mrb[25].mxu1  ;;  %v7744_v54 = vpop.f32.mrb[26].mxu0 }
 0x6a1   :  { %v7807_v61 = vadd.f32 %v7806_v16, %v7805_v35  ;;  %v7808_v38 = vpop.f32.mrb[26].mxu1  ;;  %v7745_v52 = vpop.f32.mrb[27].mxu0 }
 0x6a2   :  { %v6103_v26 = vadd.f32 %v7743_v31, %v11039_v15  ;;  %v7746_v22 = vadd.f32 %v7745_v52, %v7744_v54  ;;  %v7809_v3 = vpop.f32.mrb[27].mxu1 }
 0x6a3   :  { %v7810_v46 = vadd.f32 %v7809_v3, %v7808_v38 }
 0x6a4   :  { %v11078_v19 = vadd.f32 %v7807_v61, %v6103_v26  ;;  %v6106_v51 = vadd.f32 %v7746_v22, %v11039_v15 }
 0x6a6   :  { %v11081_v23 = vadd.f32 %v7810_v46, %v6106_v51  ;;  %v7747_v36 = vpop.f32.mrb[28].mxu0 }
 0x6a7   :  { %v7811_v14 = vpop.f32.mrb[28].mxu1  ;;  %v7748_v11 = vpop.f32.mrb[29].mxu0 }
 0x6a8   :  { %v7749_v41 = vadd.f32 %v7748_v11, %v7747_v36  ;;  %v7812_v17 = vpop.f32.mrb[29].mxu1  ;;  %v7750_v27 = vpop.f32.mrb[30].mxu0 }
 0x6a9   :  { %v7813_v49 = vadd.f32 %v7812_v17, %v7811_v14  ;;  %v7814_v32 = vpop.f32.mrb[30].mxu1  ;;  %v7751_v1 = vpop.f32.mrb[31].mxu0 }
 0x6aa   :  { %v6111_v39 = vadd.f32 %v7749_v41, %v11039_v15  ;;  %v7752_v57 = vadd.f32 %v7751_v1, %v7750_v27  ;;  %v7815_v48 = vpop.f32.mrb[31].mxu1 }
 0x6ab   :  { %v7816_v58 = vadd.f32 %v7815_v48, %v7814_v32 }
 0x6ac   :  { %v11084_v10 = vadd.f32 %v7813_v49, %v6111_v39  ;;  %v6114_v5 = vadd.f32 %v7752_v57, %v11039_v15 }
 0x6ae   :  { %v11087_v8 = vadd.f32 %v7816_v58, %v6114_v5  ;;  %v7833_v55 = vpop.f32.mrb[32].mxu0 }
 0x6af   :  { %v7897_v63 = vpop.f32.mrb[32].mxu1  ;;  %v7834_v50 = vpop.f32.mrb[33].mxu0 }
 0x6b0   :  { %v7835_v53 = vadd.f32 %v7834_v50, %v7833_v55  ;;  %v7898_v59 = vpop.f32.mrb[33].mxu1  ;;  %v7836_v18 = vpop.f32.mrb[34].mxu0 }
 0x6b1   :  { %v7899_v6 = vadd.f32 %v7898_v59, %v7897_v63  ;;  %v7900_v0 = vpop.f32.mrb[34].mxu1  ;;  %v7837_v24 = vpop.f32.mrb[35].mxu0 }
 0x6b2   :  { %v6249_v42 = vadd.f32 %v7835_v53, %v11042_v2  ;;  %v7838_v13 = vadd.f32 %v7837_v24, %v7836_v18  ;;  %v7901_v9 = vpop.f32.mrb[35].mxu1 }
 0x6b3   :  { %v7902_v28 = vadd.f32 %v7901_v9, %v7900_v0 }
 0x6b4   :  { %v6252_v47 = vadd.f32 %v7838_v13, %v11045_v25  ;;  %v11091_v4 = vadd.f32 %v7899_v6, %v6249_v42 }
 0x6b6   :  { %v7839_v15 = vpop.f32.mrb[36].mxu0  ;;  %v11093_v12 = vadd.f32 %v7902_v28, %v6252_v47 }
 0x6b7   :  { %v7903_v33 = vpop.f32.mrb[36].mxu1  ;;  %v7840_v37 = vpop.f32.mrb[37].mxu0 }
 0x6b8   :  { %v7841_v29 = vadd.f32 %v7840_v37, %v7839_v15  ;;  %v7904_v60 = vpop.f32.mrb[37].mxu1  ;;  %v7842_v35 = vpop.f32.mrb[38].mxu0 }
 0x6b9   :  { %v7905_v44 = vadd.f32 %v7904_v60, %v7903_v33  ;;  %v7906_v31 = vpop.f32.mrb[38].mxu1  ;;  %v7843_v16 = vpop.f32.mrb[39].mxu0 }
 0x6ba   :  { %v6257_v2 = vadd.f32 %v7841_v29, %v11048_v20  ;;  %v7844_v54 = vadd.f32 %v7843_v16, %v7842_v35  ;;  %v7907_v61 = vpop.f32.mrb[39].mxu1 }
 0x6bb   :  { %v7908_v38 = vadd.f32 %v7907_v61, %v7906_v31 }
 0x6bc   :  { %v6260_v25 = vadd.f32 %v7844_v54, %v11051_v62  ;;  %v11097_v52 = vadd.f32 %v7905_v44, %v6257_v2 }
 0x6be   :  { %v7845_v26 = vpop.f32.mrb[40].mxu0  ;;  %v11099_v22 = vadd.f32 %v7908_v38, %v6260_v25 }
 0x6bf   :  { %v7909_v3 = vpop.f32.mrb[40].mxu1  ;;  %v7846_v46 = vpop.f32.mrb[41].mxu0 }
 0x6c0   :  { %v7847_v51 = vadd.f32 %v7846_v46, %v7845_v26  ;;  %v7910_v36 = vpop.f32.mrb[41].mxu1  ;;  %v7848_v14 = vpop.f32.mrb[42].mxu0 }
 0x6c1   :  { %v7911_v11 = vadd.f32 %v7910_v36, %v7909_v3  ;;  %v7912_v41 = vpop.f32.mrb[42].mxu1  ;;  %v7849_v17 = vpop.f32.mrb[43].mxu0 }
 0x6c2   :  { %v6265_v20 = vadd.f32 %v7847_v51, %v11054_v7  ;;  %v7850_v27 = vadd.f32 %v7849_v17, %v7848_v14  ;;  %v7913_v49 = vpop.f32.mrb[43].mxu1 }
 0x6c3   :  { %v7914_v32 = vadd.f32 %v7913_v49, %v7912_v41 }
 0x6c4   :  { %v6268_v62 = vadd.f32 %v7850_v27, %v11057_v30  ;;  %v11103_v1 = vadd.f32 %v7911_v11, %v6265_v20 }
 0x6c6   :  { %v7851_v39 = vpop.f32.mrb[44].mxu0  ;;  %v11105_v57 = vadd.f32 %v7914_v32, %v6268_v62 }
 0x6c7   :  { %v7915_v48 = vpop.f32.mrb[44].mxu1  ;;  %v7852_v58 = vpop.f32.mrb[45].mxu0 }
 0x6c8   :  { %v7853_v5 = vadd.f32 %v7852_v58, %v7851_v39  ;;  %v7916_v55 = vpop.f32.mrb[45].mxu1  ;;  %v7854_v63 = vpop.f32.mrb[46].mxu0 }
 0x6c9   :  { %v7917_v50 = vadd.f32 %v7916_v55, %v7915_v48  ;;  %v7918_v53 = vpop.f32.mrb[46].mxu1  ;;  %v7855_v59 = vpop.f32.mrb[47].mxu0 }
 0x6ca   :  { %v6273_v7 = vadd.f32 %v7853_v5, %v11060_v34  ;;  %v7856_v18 = vadd.f32 %v7855_v59, %v7854_v63  ;;  %v7919_v6 = vpop.f32.mrb[47].mxu1 }
 0x6cb   :  { %v7920_v0 = vadd.f32 %v7919_v6, %v7918_v53 }
 0x6cc   :  { %v6276_v30 = vadd.f32 %v7856_v18, %v11063_v45  ;;  %v11109_v24 = vadd.f32 %v7917_v50, %v6273_v7 }
 0x6ce   :  { %v7857_v42 = vpop.f32.mrb[48].mxu0  ;;  %v11111_v13 = vadd.f32 %v7920_v0, %v6276_v30 }
 0x6cf   :  { %v7921_v9 = vpop.f32.mrb[48].mxu1  ;;  %v7858_v28 = vpop.f32.mrb[49].mxu0 }
 0x6d0   :  { %v7859_v47 = vadd.f32 %v7858_v28, %v7857_v42  ;;  %v7922_v15 = vpop.f32.mrb[49].mxu1  ;;  %v7860_v33 = vpop.f32.mrb[50].mxu0 }
 0x6d1   :  { %v7923_v37 = vadd.f32 %v7922_v15, %v7921_v9  ;;  %v7924_v29 = vpop.f32.mrb[50].mxu1  ;;  %v7861_v60 = vpop.f32.mrb[51].mxu0 }
 0x6d2   :  { %v6281_v34 = vadd.f32 %v7859_v47, %v11066_v40  ;;  %v7862_v35 = vadd.f32 %v7861_v60, %v7860_v33  ;;  %v7925_v44 = vpop.f32.mrb[51].mxu1 }
 0x6d3   :  { %v7926_v31 = vadd.f32 %v7925_v44, %v7924_v29 }
 0x6d4   :  { %v6284_v45 = vadd.f32 %v7862_v35, %v11069_v43  ;;  %v6378_v16 = vadd.f32 %v7923_v37, %v6281_v34 }
 0x6d6   :  { %v7863_v2 = vpop.f32.mrb[52].mxu0  ;;  %v11115_v54 = vadd.f32 %v7926_v31, %v6284_v45 }
 0x6d7   :  { %v7927_v61 = vpop.f32.mrb[52].mxu1  ;;  %v7864_v38 = vpop.f32.mrb[53].mxu0 }
 0x6d8   :  { %v7865_v25 = vadd.f32 %v7864_v38, %v7863_v2  ;;  %v7928_v26 = vpop.f32.mrb[53].mxu1  ;;  %v7866_v3 = vpop.f32.mrb[54].mxu0 }
 0x6d9   :  { %v7929_v46 = vadd.f32 %v7928_v26, %v7927_v61  ;;  %v7930_v51 = vpop.f32.mrb[54].mxu1  ;;  %v7867_v36 = vpop.f32.mrb[55].mxu0 }
 0x6da   :  { %v6289_v14 = vadd.f32 %v7865_v25, %v11072_v56  ;;  %v7868_v40 = vadd.f32 %v7867_v36, %v7866_v3  ;;  %v7931_v11 = vpop.f32.mrb[55].mxu1 }
 0x6db   :  { %v7932_v41 = vadd.f32 %v7931_v11, %v7930_v51 }
 0x6dc   :  { %v6292_v17 = vadd.f32 %v7868_v40, %v11075_v21  ;;  %v6386_v43 = vadd.f32 %v7929_v46, %v6289_v14 }
 0x6de   :  { %v7869_v20 = vpop.f32.mrb[56].mxu0  ;;  %v6389_v27 = vadd.f32 %v7932_v41, %v6292_v17 }
 0x6df   :  { %v7933_v49 = vpop.f32.mrb[56].mxu1  ;;  %v7870_v32 = vpop.f32.mrb[57].mxu0 }
 0x6e0   :  { %v7871_v62 = vadd.f32 %v7870_v32, %v7869_v20  ;;  %v7934_v39 = vpop.f32.mrb[57].mxu1  ;;  %v7872_v48 = vpop.f32.mrb[58].mxu0 }
 0x6e1   :  { %v7935_v58 = vadd.f32 %v7934_v39, %v7933_v49  ;;  %v7936_v5 = vpop.f32.mrb[58].mxu1  ;;  %v7873_v55 = vpop.f32.mrb[59].mxu0 }
 0x6e2   :  { %v6297_v63 = vadd.f32 %v7871_v62, %v11078_v19  ;;  %v7874_v50 = vadd.f32 %v7873_v55, %v7872_v48  ;;  %v7937_v56 = vpop.f32.mrb[59].mxu1 }
 0x6e3   :  { %v7938_v53 = vadd.f32 %v7937_v56, %v7936_v5 }
 0x6e4   :  { %v6300_v59 = vadd.f32 %v7874_v50, %v11081_v23  ;;  %v6394_v7 = vadd.f32 %v7935_v58, %v6297_v63 }
 0x6e6   :  { %v7875_v21 = vpop.f32.mrb[60].mxu0  ;;  %v6397_v18 = vadd.f32 %v7938_v53, %v6300_v59 }
 0x6e7   :  { %v7939_v6 = vpop.f32.mrb[60].mxu1  ;;  %v7876_v0 = vpop.f32.mrb[61].mxu0 }
 0x6e8   :  { %v7877_v30 = vadd.f32 %v7876_v0, %v7875_v21  ;;  %v7940_v42 = vpop.f32.mrb[61].mxu1  ;;  %v7878_v9 = vpop.f32.mrb[62].mxu0 }
 0x6e9   :  { %v7941_v28 = vadd.f32 %v7940_v42, %v7939_v6  ;;  %v7942_v47 = vpop.f32.mrb[62].mxu1  ;;  %v7879_v15 = vpop.f32.mrb[63].mxu0 }
 0x6ea   :  { %v6305_v33 = vadd.f32 %v7877_v30, %v11084_v10  ;;  %v7880_v37 = vadd.f32 %v7879_v15, %v7878_v9  ;;  %v7943_v19 = vpop.f32.mrb[63].mxu1 }
 0x6eb   :  { %v7944_v29 = vadd.f32 %v7943_v19, %v7942_v47 }
 0x6ec   :  { %v6308_v60 = vadd.f32 %v7880_v37, %v11087_v8  ;;  %v6402_v34 = vadd.f32 %v7941_v28, %v6305_v33 }
 0x6ee   :  { %v8075_v23 = vpop.f32.mrb[64].mxu0  ;;  %v6405_v35 = vadd.f32 %v7944_v29, %v6308_v60 }
 0x6ef   :  { %v6451_v44 = vadd.f32 %v8075_v23, %v11097_v52  ;;  %v8083_v31 = vpop.f32.mrb[64].mxu1  ;;  %v6442_v45 = vpop.f32.mrb[65].mxu0 }
 0x6f0   :  { %v6483_v2 = vadd.f32 %v8083_v31, %v6386_v43  ;;  %v6443_v61 = vadd.f32 %v6442_v45, %v11091_v4  ;;  %v6474_v38 = vpop.f32.mrb[65].mxu1  ;;  %v8076_v25 = vpop.f32.mrb[66].mxu0 }
 0x6f1   :  { %6507 = vst [vmem:[%s11193_s13 + $0x10] sm:$0xff] %v6451_v44  ;;  %v6475_v10 = vadd.f32 %v6474_v38, %v6378_v16  ;;  %v6454_v26 = vadd.f32 %v8076_v25, %v11099_v22  ;;  %v8084_v8 = vpop.f32.mrb[66].mxu1  ;;  %v6445_v3 = vpop.f32.mrb[67].mxu0 }
 0x6f2   :  { %6515 = vst [vmem:[%s11193_s13 + $0x50] sm:$0xff] %v6483_v2  ;;  %6505 = vst [vmem:[%s11193_s13] sm:$0xff] %v6443_v61  ;;  %v6486_v4 = vadd.f32 %v8084_v8, %v6389_v27  ;;  %v6446_v52 = vadd.f32 %v6445_v3, %v11093_v12  ;;  %v6477_v46 = vpop.f32.mrb[67].mxu1 }
 0x6f3   :  { %6513 = vst [vmem:[%s11193_s13 + $0x40] sm:$0xff] %v6475_v10  ;;  %6508 = vst [vmem:[%s11193_s13 + $0x18] sm:$0xff] %v6454_v26  ;;  %v6478_v22 = vadd.f32 %v6477_v46, %v11115_v54 }
 0x6f4   :  { %6516 = vst [vmem:[%s11193_s13 + $0x58] sm:$0xff] %v6486_v4  ;;  %6506 = vst [vmem:[%s11193_s13 + $0x8] sm:$0xff] %v6446_v52 }
 0x6f5   :  { %6514 = vst [vmem:[%s11193_s13 + $0x48] sm:$0xff] %v6478_v22 }
 0x6f6   :  { %v8079_v12 = vpop.f32.mrb[68].mxu0 }
 0x6f7   :  { %v6467_v16 = vadd.f32 %v8079_v12, %v11109_v24  ;;  %v8087_v51 = vpop.f32.mrb[68].mxu1  ;;  %v6458_v36 = vpop.f32.mrb[69].mxu0 }
 0x6f8   :  { %v6499_v14 = vadd.f32 %v8087_v51, %v6402_v34  ;;  %v6459_v54 = vadd.f32 %v6458_v36, %v11103_v1  ;;  %v6490_v40 = vpop.f32.mrb[69].mxu1  ;;  %v8080_v11 = vpop.f32.mrb[70].mxu0 }
 0x6f9   :  { %6511 = vst [vmem:[%s11193_s13 + $0x30] sm:$0xff] %v6467_v16  ;;  %v6491_v41 = vadd.f32 %v6490_v40, %v6394_v7  ;;  %v6470_v17 = vadd.f32 %v8080_v11, %v11111_v13  ;;  %v8088_v43 = vpop.f32.mrb[70].mxu1  ;;  %v6461_v20 = vpop.f32.mrb[71].mxu0 }
 0x6fa   :  { %6519 = vst [vmem:[%s11193_s13 + $0x70] sm:$0xff] %v6499_v14  ;;  %6509 = vst [vmem:[%s11193_s13 + $0x20] sm:$0xff] %v6459_v54  ;;  %v6502_v1 = vadd.f32 %v8088_v43, %v6405_v35  ;;  %v6462_v24 = vadd.f32 %v6461_v20, %v11105_v57  ;;  %v6493_v27 = vpop.f32.mrb[71].mxu1 }
 0x6fb   :  { %6517 = vst [vmem:[%s11193_s13 + $0x60] sm:$0xff] %v6491_v41  ;;  %6512 = vst [vmem:[%s11193_s13 + $0x38] sm:$0xff] %v6470_v17  ;;  %v6494_v13 = vadd.f32 %v6493_v27, %v6397_v18 }
 0x6fc   :  { %6520 = vst [vmem:[%s11193_s13 + $0x78] sm:$0xff] %v6502_v1  ;;  %6510 = vst [vmem:[%s11193_s13 + $0x28] sm:$0xff] %v6462_v24 }
 0x6fd   :  { %6518 = vst [vmem:[%s11193_s13 + $0x68] sm:$0xff] %v6494_v13 }
 0x6fe   :  { %6525 = vsyncpa [#allocation5], 1 }
 0x6ff   :  { %6526 = vsyncpa [#allocation7], 1 }
 0x700   :  { %6527 = vsyncpa [#allocation10], 1 }

</bundles_post_ra>
